<compile_context>
chip_gen: v6e
topology: v6e:2x2x1
jax: 0.10.0
libtpu: 0.0.40
codegen_flags: <defaults>
</compile_context>

<pallas_src>
import functools

import jax
import jax.numpy as jnp
from jax.experimental import pallas as pl
from jax.experimental.pallas import tpu as pltpu

LN_EPS = 1e-5  # PyTorch nn.LayerNorm default


def _round_up(x, m):
    return ((x + m - 1) // m) * m


def _cdiv(a, b):
    return (a + b - 1) // b


def _silu(x):
    return x * jax.nn.sigmoid(x)


def _layernorm(x, gamma, beta, true_dim):
    """LayerNorm over the first `true_dim` lanes of a zero-padded x.

    Invariant: lanes >= true_dim of x are exactly zero (padded weight columns
    and biases are zero), so sums over all lanes equal sums over the true
    lanes.  gamma/beta are zero on padded lanes, so padded lanes of the output
    stay exactly zero and the invariant propagates to the next layer.
    Uses var = E[x^2] - mean^2 so both XLU reductions can issue back-to-back.
    """
    n = jnp.float32(true_dim)
    s1 = jnp.sum(x, axis=-1, keepdims=True)
    s2 = jnp.sum(x * x, axis=-1, keepdims=True)
    mean = s1 / n
    var = jnp.maximum(s2 / n - mean * mean, 0.0)
    inv = jax.lax.rsqrt(var + LN_EPS)
    return (x - mean) * inv * gamma + beta


def _actor_kernel(n_layers, feature_dim, hidden_dim,
                  enc_ref, w_tr_ref, v_tr_ref, w_p0_ref, v_p0_ref,
                  w_hid_ref, v_hid_ref, w_fin_ref, v_fin_ref, mu_ref):
    """Fused trunk + policy MLP + tanh.

    enc_ref : (TB, Ep)              f32 encodings (Ep = enc_dim rounded to 8)
    w_tr    : (Ep, Fp)   bf16       trunk Linear weight
    v_tr    : (8,  Fp)   f32        rows: 0 bias, 1 gamma, 2 beta
    w_p0    : (Fp, Hp)   bf16       first policy Linear
    v_p0    : (8,  Hp)   f32
    w_hid   : (L-1, Hp, Hp) bf16    hidden policy Linears
    v_hid   : (L-1, 8,  Hp) f32
    w_fin   : (Hp, Ap)   bf16       final Linear
    v_fin   : (8,  Ap)   f32        row 0 = bias
    mu_ref  : (TB, Ap)   f32        tanh(mu), padded lanes are zero
    """
    x_full = enc_ref[...].astype(jnp.float32)
    TB = x_full.shape[0]
    # Two-way row-chunk interleave: independent chains per chunk let the
    # scheduler overlap one half's MXU pass with the other's LN/SiLU work.
    n_chunks = 2 if (TB >= 16 and TB % 16 == 0) else 1
    cs = TB // n_chunks
    chunks = [x_full[c * cs:(c + 1) * cs, :] for c in range(n_chunks)]

    def lin_ln_silu(xs, w, vec, true_dim):
        b, g, be = vec[0:1, :], vec[1:2, :], vec[2:3, :]
        out = []
        for x in xs:
            y = jnp.dot(x.astype(jnp.bfloat16), w,
                        preferred_element_type=jnp.float32) + b
            out.append(_silu(_layernorm(y, g, be, true_dim)))
        return out

    # trunk: Linear -> LN -> SiLU
    chunks = lin_ln_silu(chunks, w_tr_ref[...], v_tr_ref[...], feature_dim)
    # policy layer 0: feature_dim -> hidden
    chunks = lin_ln_silu(chunks, w_p0_ref[...], v_p0_ref[...], hidden_dim)
    # policy hidden layers
    for li in range(n_layers - 1):
        chunks = lin_ln_silu(chunks, w_hid_ref[li], v_hid_ref[li], hidden_dim)

    # final Linear(hidden, action_dim) + tanh; lane-dense store.
    w_fin = w_fin_ref[...]
    b_fin = v_fin_ref[0:1, :]
    for c, x in enumerate(chunks):
        mu = jnp.dot(x.astype(jnp.bfloat16), w_fin,
                     preferred_element_type=jnp.float32) + b_fin
        mu_ref[pl.ds(c * cs, cs), :] = jnp.tanh(mu).astype(mu_ref.dtype)


def pack_actor_params(params, *, enc_dim, feature_dim, hidden_dim, action_dim,
                      n_layers=4):
    """Pack the flat param tuple into per-layer padded bf16/f32 slabs (call once)."""
    Ep = _round_up(enc_dim, 8)
    Fp = _round_up(feature_dim, 128)
    Hp = _round_up(hidden_dim, 128)
    Ap = _round_up(action_dim, 128)

    def pad_w(w, r, c):
        out = jnp.zeros((r, c), jnp.float32).at[:w.shape[0], :w.shape[1]].set(w)
        return out.astype(jnp.bfloat16)

    def pad_vec(b, g, be, c):
        v = jnp.zeros((8, c), jnp.float32)
        v = v.at[0, :b.shape[-1]].set(b.reshape(-1))
        if g is not None:
            v = v.at[1, :g.shape[-1]].set(g.reshape(-1))
            v = v.at[2, :be.shape[-1]].set(be.reshape(-1))
        return v

    idx = 0
    w, b, g, be = params[idx:idx + 4]; idx += 4
    w_tr, v_tr = pad_w(w, Ep, Fp), pad_vec(b, g, be, Fp)

    w, b, g, be = params[idx:idx + 4]; idx += 4
    w_p0, v_p0 = pad_w(w, Fp, Hp), pad_vec(b, g, be, Hp)

    n_hid = n_layers - 1
    w_hid = jnp.zeros((max(n_hid, 1), Hp, Hp), jnp.bfloat16)
    v_hid = jnp.zeros((max(n_hid, 1), 8, Hp), jnp.float32)
    for li in range(n_hid):
        w, b, g, be = params[idx:idx + 4]; idx += 4
        w_hid = w_hid.at[li].set(pad_w(w, Hp, Hp))
        v_hid = v_hid.at[li].set(pad_vec(b, g, be, Hp))

    w, b = params[idx], params[idx + 1]
    w_fin, v_fin = pad_w(w, Hp, Ap), pad_vec(b, None, None, Ap)

    return dict(w_tr=w_tr, v_tr=v_tr, w_p0=w_p0, v_p0=v_p0,
                w_hid=w_hid, v_hid=v_hid, w_fin=w_fin, v_fin=v_fin,
                dims=(enc_dim, feature_dim, hidden_dim, action_dim, n_layers))


def actor_fixed_std_forward(enc, packed, std):
    """enc: [B, enc_dim] f32, packed: pack_actor_params(...) -> (mu [B,A], std [B,A])."""
    enc_dim, feature_dim, hidden_dim, action_dim, n_layers = packed["dims"]
    B, ed = enc.shape
    assert ed == enc_dim
    Ep = _round_up(enc_dim, 8)
    Ap = _round_up(action_dim, 128)

    # Batch tiling: big tiles for large B, >=2 balanced tiles (v7x megacore)
    # for mid-size B, minimal padding overshoot, multiples of 16 so the kernel
    # can split the tile into two 8-row-aligned chunks.
    B8 = _round_up(B, 8)
    if B8 <= 8:
        TB = B8
    else:
        target_tiles = max(2, _cdiv(B8, 1024))
        TB = _round_up(_cdiv(B8, target_tiles), 16)
    B_pad = _round_up(B8, TB)
    n_tiles = B_pad // TB

    if B_pad == B and Ep == enc_dim:
        enc_p = enc.astype(jnp.float32)
    else:
        enc_p = jnp.zeros((B_pad, Ep), jnp.float32).at[:B, :enc_dim].set(
            enc.astype(jnp.float32))

    weight_arrays = (packed["w_tr"], packed["v_tr"], packed["w_p0"],
                     packed["v_p0"], packed["w_hid"], packed["v_hid"],
                     packed["w_fin"], packed["v_fin"])

    kernel = functools.partial(_actor_kernel, n_layers, feature_dim, hidden_dim)

    # Explicit VMEM budget: weights (conservatively x2) + double-buffered IO.
    weight_bytes = sum(int(a.size) * a.dtype.itemsize for a in weight_arrays)
    io_bytes = 2 * TB * (Ep + Ap) * 4
    vmem_limit = int(min(max(2 * weight_bytes + io_bytes + (4 << 20), 32 << 20),
                         64 << 20))

    def _weight_spec(arr, single_buffer):
        nd = arr.ndim
        idx_map = lambda i, _nd=nd: (0,) * _nd   # grid-invariant: DMA'd once
        if single_buffer:
            return pl.BlockSpec(arr.shape, idx_map, pipeline_mode=pl.Buffered(1))
        return pl.BlockSpec(arr.shape, idx_map)

    def _run(single_buffer_weights):
        return pl.pallas_call(
            kernel,
            out_shape=jax.ShapeDtypeStruct((B_pad, Ap), jnp.float32),
            grid=(n_tiles,),
            in_specs=[pl.BlockSpec((TB, Ep), lambda i: (i, 0))]
                     + [_weight_spec(a, single_buffer_weights)
                        for a in weight_arrays],
            out_specs=pl.BlockSpec((TB, Ap), lambda i: (i, 0)),
            compiler_params=pltpu.CompilerParams(
                dimension_semantics=("parallel",),
                vmem_limit_bytes=vmem_limit),
        )(enc_p, *weight_arrays)

    try:
        # Weight specs never change block index -> single-buffer them (saves VMEM).
        mu_pad = _run(True)
    except Exception:
        # Fallback for JAX versions that reject pipeline_mode=pl.Buffered(1).
        mu_pad = _run(False)

    mu = mu_pad[:B, :action_dim]
    std_arr = jnp.full_like(mu, jnp.float32(std))
    return mu, std_arr


def init_actor_params(key, enc_dim, feature_dim, hidden_dim, action_dim,
                      n_layers=4):
    """Deterministic synthetic init. Linear weights (in, out); vectors (1, dim)."""
    params = []

    def linear(key, in_dim, out_dim):
        kw, kb = jax.random.split(key)
        scale = 1.0 / jnp.sqrt(jnp.float32(in_dim))
        w = jax.random.normal(kw, (in_dim, out_dim), jnp.float32) * scale
        b = jax.random.normal(kb, (1, out_dim), jnp.float32) * 0.01
        return w, b

    def ln(dim):
        return jnp.ones((1, dim), jnp.float32), jnp.zeros((1, dim), jnp.float32)

    keys = jax.random.split(key, n_layers + 2)

    # trunk
    w, b = linear(keys[0], enc_dim, feature_dim)
    g, be = ln(feature_dim)
    params += [w, b, g, be]

    # policy hidden layers
    in_dim = feature_dim
    for i in range(n_layers):
        w, b = linear(keys[1 + i], in_dim, hidden_dim)
        g, be = ln(hidden_dim)
        params += [w, b, g, be]
        in_dim = hidden_dim

    # final Linear(hidden_dim, action_dim)
    w, b = linear(keys[-1], hidden_dim, action_dim)
    params += [w, b]
    return tuple(params)


def actor_reference(enc, params, std, n_layers, matmul_dtype=jnp.float32):
    """Pure-JAX reference (unpadded).  matmul_dtype=bf16 emulates the kernel's
    bf16 MXU operands (f32 accumulation) for a tight structural check."""
    def layernorm(x, g, be):
        mean = jnp.mean(x, axis=-1, keepdims=True)
        xc = x - mean
        var = jnp.mean(xc * xc, axis=-1, keepdims=True)
        return xc * jax.lax.rsqrt(var + LN_EPS) * g + be

    def dot(x, w):
        return jnp.dot(x.astype(matmul_dtype), w.astype(matmul_dtype),
                       preferred_element_type=jnp.float32)

    x = enc.astype(jnp.float32)
    idx = 0
    for _ in range(n_layers + 1):
        w, b, g, be = params[idx:idx + 4]
        idx += 4
        x = _silu(layernorm(dot(x, w) + b, g, be))
    w, b = params[idx], params[idx + 1]
    mu = jnp.tanh(dot(x, w) + b)
    return mu, jnp.full_like(mu, jnp.float32(std))


if __name__ == "__main__":
    B = 24
    enc_dim = 32
    feature_dim = 48
    hidden_dim = 64
    action_dim = 6
    n_layers = 4
    std = 0.2

    key = jax.random.PRNGKey(0)
    k_enc, k_params = jax.random.split(key)

    enc = jax.random.normal(k_enc, (B, enc_dim), jnp.float32)
    params = init_actor_params(
        k_params, enc_dim, feature_dim, hidden_dim, action_dim, n_layers=n_layers)

    # Pack / pad weights ONCE (outside the per-step forward).
    packed = pack_actor_params(
        params, enc_dim=enc_dim, feature_dim=feature_dim,
        hidden_dim=hidden_dim, action_dim=action_dim, n_layers=n_layers)

    mu, std_arr = actor_fixed_std_forward(enc, packed, std)
    mu = jax.block_until_ready(mu)

    mu_bf16, _ = actor_reference(enc, params, std, n_layers,
                                 matmul_dtype=jnp.bfloat16)
    mu_f32, std_ref = actor_reference(enc, params, std, n_layers)

    assert mu.shape == (B, action_dim), mu.shape
    assert std_arr.shape == (B, action_dim), std_arr.shape
    # Tight check vs bf16-matmul reference (same arithmetic as the kernel).
    assert jnp.allclose(mu, mu_bf16, atol=1e-2, rtol=1e-2), (
        f"bf16-ref max abs diff {jnp.max(jnp.abs(mu - mu_bf16))}")
    # Loose sanity check vs the full-f32 module (bf16 MXU rounding budget).
    assert jnp.allclose(mu, mu_f32, atol=1e-1), (
        f"f32-ref max abs diff {jnp.max(jnp.abs(mu - mu_f32))}")
    assert jnp.allclose(std_arr, std_ref), "std mismatch"

    print("KERNEL_OK")
</pallas_src>

<mosaic_0001>
module attributes {stable_mosaic.version = 11 : i64} {
  func.func @_actor_kernel(%arg0: i32, %arg1: memref<16x32xf32, #tpu.memory_space<vmem>>, %arg2: memref<32x128xbf16, #tpu.memory_space<vmem>>, %arg3: memref<8x128xf32, #tpu.memory_space<vmem>>, %arg4: memref<128x128xbf16, #tpu.memory_space<vmem>>, %arg5: memref<8x128xf32, #tpu.memory_space<vmem>>, %arg6: memref<3x128x128xbf16, #tpu.memory_space<vmem>>, %arg7: memref<3x8x128xf32, #tpu.memory_space<vmem>>, %arg8: memref<128x128xbf16, #tpu.memory_space<vmem>>, %arg9: memref<8x128xf32, #tpu.memory_space<vmem>>, %arg10: memref<16x128xf32, #tpu.memory_space<vmem>>) attributes {dimension_semantics = [#tpu.dimension_semantics<parallel>], iteration_bounds = array<i64: 2>, scalar_prefetch = 0 : i64, scratch_operands = 0 : i64, tpu.core_type = #tpu.core_type<tc>, window_params = [{transform_indices = @transform_0, window_bounds = array<i64: 16, 32>}, {pipeline_mode = #tpu.pipeline_mode<synchronous>, transform_indices = @transform_1, window_bounds = array<i64: 32, 128>}, {pipeline_mode = #tpu.pipeline_mode<synchronous>, transform_indices = @transform_2, window_bounds = array<i64: 8, 128>}, {pipeline_mode = #tpu.pipeline_mode<synchronous>, transform_indices = @transform_3, window_bounds = array<i64: 128, 128>}, {pipeline_mode = #tpu.pipeline_mode<synchronous>, transform_indices = @transform_4, window_bounds = array<i64: 8, 128>}, {pipeline_mode = #tpu.pipeline_mode<synchronous>, transform_indices = @transform_5, window_bounds = array<i64: 3, 128, 128>}, {pipeline_mode = #tpu.pipeline_mode<synchronous>, transform_indices = @transform_6, window_bounds = array<i64: 3, 8, 128>}, {pipeline_mode = #tpu.pipeline_mode<synchronous>, transform_indices = @transform_7, window_bounds = array<i64: 128, 128>}, {pipeline_mode = #tpu.pipeline_mode<synchronous>, transform_indices = @transform_8, window_bounds = array<i64: 8, 128>}, {transform_indices = @transform_9, window_bounds = array<i64: 16, 128>}]} {
    %c0 = arith.constant 0 : index
    %c0_0 = arith.constant 0 : index
    %0 = vector.load %arg1[%c0, %c0_0] : memref<16x32xf32, #tpu.memory_space<vmem>>, vector<16x32xf32>
    %1 = vector.extract_strided_slice %0 {offsets = [0, 0], sizes = [8, 32], strides = [1, 1]} : vector<16x32xf32> to vector<8x32xf32>
    %2 = vector.extract_strided_slice %0 {offsets = [8, 0], sizes = [8, 32], strides = [1, 1]} : vector<16x32xf32> to vector<8x32xf32>
    %c0_1 = arith.constant 0 : index
    %c0_2 = arith.constant 0 : index
    %3 = vector.load %arg2[%c0_1, %c0_2] : memref<32x128xbf16, #tpu.memory_space<vmem>>, vector<32x128xbf16>
    %c0_3 = arith.constant 0 : index
    %c0_4 = arith.constant 0 : index
    %4 = vector.load %arg3[%c0_3, %c0_4] : memref<8x128xf32, #tpu.memory_space<vmem>>, vector<8x128xf32>
    %5 = vector.extract_strided_slice %4 {offsets = [0, 0], sizes = [1, 128], strides = [1, 1]} : vector<8x128xf32> to vector<1x128xf32>
    %6 = vector.extract_strided_slice %4 {offsets = [1, 0], sizes = [1, 128], strides = [1, 1]} : vector<8x128xf32> to vector<1x128xf32>
    %7 = vector.extract_strided_slice %4 {offsets = [2, 0], sizes = [1, 128], strides = [1, 1]} : vector<8x128xf32> to vector<1x128xf32>
    %8 = arith.truncf %1 : vector<8x32xf32> to vector<8x32xbf16>
    %cst = arith.constant dense<0.000000e+00> : vector<8x128xf32>
    %9 = tpu.matmul %8, %3, %cst {dimension_numbers = #tpu.dot_dimension_numbers<[1], [0], [0], [1], [0, 0, 1, 1], [], []>} : vector<8x32xbf16>, vector<32x128xbf16>, vector<8x128xf32> -> vector<8x128xf32>
    %10 = vector.broadcast %5 : vector<1x128xf32> to vector<8x128xf32>
    %11 = arith.addf %9, %10 : vector<8x128xf32>
    %cst_5 = arith.constant dense<0.000000e+00> : vector<8xf32>
    %12 = vector.multi_reduction <add>, %11, %cst_5 [1] : vector<8x128xf32> to vector<8xf32>
    %13 = vector.shape_cast %12 : vector<8xf32> to vector<8x1xf32>
    %14 = arith.mulf %11, %11 : vector<8x128xf32>
    %cst_6 = arith.constant dense<0.000000e+00> : vector<8xf32>
    %15 = vector.multi_reduction <add>, %14, %cst_6 [1] : vector<8x128xf32> to vector<8xf32>
    %16 = vector.shape_cast %15 : vector<8xf32> to vector<8x1xf32>
    %cst_7 = arith.constant 4.800000e+01 : f32
    %17 = vector.broadcast %cst_7 : f32 to vector<8x1xf32>
    %18 = arith.divf %13, %17 : vector<8x1xf32>
    %cst_8 = arith.constant 4.800000e+01 : f32
    %19 = vector.broadcast %cst_8 : f32 to vector<8x1xf32>
    %20 = arith.divf %16, %19 : vector<8x1xf32>
    %21 = arith.mulf %18, %18 : vector<8x1xf32>
    %22 = arith.subf %20, %21 : vector<8x1xf32>
    %cst_9 = arith.constant 0.000000e+00 : f32
    %23 = vector.broadcast %cst_9 : f32 to vector<8x1xf32>
    %24 = arith.maximumf %22, %23 : vector<8x1xf32>
    %cst_10 = arith.constant 9.99999974E-6 : f32
    %25 = vector.broadcast %cst_10 : f32 to vector<8x1xf32>
    %26 = arith.addf %24, %25 : vector<8x1xf32>
    %27 = math.rsqrt %26 : vector<8x1xf32>
    %28 = vector.broadcast %18 : vector<8x1xf32> to vector<8x128xf32>
    %29 = arith.subf %11, %28 : vector<8x128xf32>
    %30 = vector.broadcast %27 : vector<8x1xf32> to vector<8x128xf32>
    %31 = arith.mulf %29, %30 : vector<8x128xf32>
    %32 = vector.broadcast %6 : vector<1x128xf32> to vector<8x128xf32>
    %33 = arith.mulf %31, %32 : vector<8x128xf32>
    %34 = vector.broadcast %7 : vector<1x128xf32> to vector<8x128xf32>
    %35 = arith.addf %33, %34 : vector<8x128xf32>
    %36 = arith.negf %35 : vector<8x128xf32>
    %37 = math.exp %36 : vector<8x128xf32>
    %cst_11 = arith.constant 1.000000e+00 : f32
    %38 = vector.broadcast %cst_11 : f32 to vector<8x128xf32>
    %39 = arith.addf %38, %37 : vector<8x128xf32>
    %40 = arith.divf %38, %39 : vector<8x128xf32>
    %41 = arith.mulf %35, %40 : vector<8x128xf32>
    %42 = arith.truncf %2 : vector<8x32xf32> to vector<8x32xbf16>
    %cst_12 = arith.constant dense<0.000000e+00> : vector<8x128xf32>
    %43 = tpu.matmul %42, %3, %cst_12 {dimension_numbers = #tpu.dot_dimension_numbers<[1], [0], [0], [1], [0, 0, 1, 1], [], []>} : vector<8x32xbf16>, vector<32x128xbf16>, vector<8x128xf32> -> vector<8x128xf32>
    %44 = vector.broadcast %5 : vector<1x128xf32> to vector<8x128xf32>
    %45 = arith.addf %43, %44 : vector<8x128xf32>
    %cst_13 = arith.constant dense<0.000000e+00> : vector<8xf32>
    %46 = vector.multi_reduction <add>, %45, %cst_13 [1] : vector<8x128xf32> to vector<8xf32>
    %47 = vector.shape_cast %46 : vector<8xf32> to vector<8x1xf32>
    %48 = arith.mulf %45, %45 : vector<8x128xf32>
    %cst_14 = arith.constant dense<0.000000e+00> : vector<8xf32>
    %49 = vector.multi_reduction <add>, %48, %cst_14 [1] : vector<8x128xf32> to vector<8xf32>
    %50 = vector.shape_cast %49 : vector<8xf32> to vector<8x1xf32>
    %cst_15 = arith.constant 4.800000e+01 : f32
    %51 = vector.broadcast %cst_15 : f32 to vector<8x1xf32>
    %52 = arith.divf %47, %51 : vector<8x1xf32>
    %cst_16 = arith.constant 4.800000e+01 : f32
    %53 = vector.broadcast %cst_16 : f32 to vector<8x1xf32>
    %54 = arith.divf %50, %53 : vector<8x1xf32>
    %55 = arith.mulf %52, %52 : vector<8x1xf32>
    %56 = arith.subf %54, %55 : vector<8x1xf32>
    %cst_17 = arith.constant 0.000000e+00 : f32
    %57 = vector.broadcast %cst_17 : f32 to vector<8x1xf32>
    %58 = arith.maximumf %56, %57 : vector<8x1xf32>
    %cst_18 = arith.constant 9.99999974E-6 : f32
    %59 = vector.broadcast %cst_18 : f32 to vector<8x1xf32>
    %60 = arith.addf %58, %59 : vector<8x1xf32>
    %61 = math.rsqrt %60 : vector<8x1xf32>
    %62 = vector.broadcast %52 : vector<8x1xf32> to vector<8x128xf32>
    %63 = arith.subf %45, %62 : vector<8x128xf32>
    %64 = vector.broadcast %61 : vector<8x1xf32> to vector<8x128xf32>
    %65 = arith.mulf %63, %64 : vector<8x128xf32>
    %66 = vector.broadcast %6 : vector<1x128xf32> to vector<8x128xf32>
    %67 = arith.mulf %65, %66 : vector<8x128xf32>
    %68 = vector.broadcast %7 : vector<1x128xf32> to vector<8x128xf32>
    %69 = arith.addf %67, %68 : vector<8x128xf32>
    %70 = arith.negf %69 : vector<8x128xf32>
    %71 = math.exp %70 : vector<8x128xf32>
    %cst_19 = arith.constant 1.000000e+00 : f32
    %72 = vector.broadcast %cst_19 : f32 to vector<8x128xf32>
    %73 = arith.addf %72, %71 : vector<8x128xf32>
    %74 = arith.divf %72, %73 : vector<8x128xf32>
    %75 = arith.mulf %69, %74 : vector<8x128xf32>
    %c0_20 = arith.constant 0 : index
    %c0_21 = arith.constant 0 : index
    %76 = vector.load %arg4[%c0_20, %c0_21] : memref<128x128xbf16, #tpu.memory_space<vmem>>, vector<128x128xbf16>
    %c0_22 = arith.constant 0 : index
    %c0_23 = arith.constant 0 : index
    %77 = vector.load %arg5[%c0_22, %c0_23] : memref<8x128xf32, #tpu.memory_space<vmem>>, vector<8x128xf32>
    %78 = vector.extract_strided_slice %77 {offsets = [0, 0], sizes = [1, 128], strides = [1, 1]} : vector<8x128xf32> to vector<1x128xf32>
    %79 = vector.extract_strided_slice %77 {offsets = [1, 0], sizes = [1, 128], strides = [1, 1]} : vector<8x128xf32> to vector<1x128xf32>
    %80 = vector.extract_strided_slice %77 {offsets = [2, 0], sizes = [1, 128], strides = [1, 1]} : vector<8x128xf32> to vector<1x128xf32>
    %81 = arith.truncf %41 : vector<8x128xf32> to vector<8x128xbf16>
    %cst_24 = arith.constant dense<0.000000e+00> : vector<8x128xf32>
    %82 = tpu.matmul %81, %76, %cst_24 {dimension_numbers = #tpu.dot_dimension_numbers<[1], [0], [0], [1], [0, 0, 1, 1], [], []>} : vector<8x128xbf16>, vector<128x128xbf16>, vector<8x128xf32> -> vector<8x128xf32>
    %83 = vector.broadcast %78 : vector<1x128xf32> to vector<8x128xf32>
    %84 = arith.addf %82, %83 : vector<8x128xf32>
    %cst_25 = arith.constant dense<0.000000e+00> : vector<8xf32>
    %85 = vector.multi_reduction <add>, %84, %cst_25 [1] : vector<8x128xf32> to vector<8xf32>
    %86 = vector.shape_cast %85 : vector<8xf32> to vector<8x1xf32>
    %87 = arith.mulf %84, %84 : vector<8x128xf32>
    %cst_26 = arith.constant dense<0.000000e+00> : vector<8xf32>
    %88 = vector.multi_reduction <add>, %87, %cst_26 [1] : vector<8x128xf32> to vector<8xf32>
    %89 = vector.shape_cast %88 : vector<8xf32> to vector<8x1xf32>
    %cst_27 = arith.constant 6.400000e+01 : f32
    %90 = vector.broadcast %cst_27 : f32 to vector<8x1xf32>
    %91 = arith.divf %86, %90 : vector<8x1xf32>
    %cst_28 = arith.constant 6.400000e+01 : f32
    %92 = vector.broadcast %cst_28 : f32 to vector<8x1xf32>
    %93 = arith.divf %89, %92 : vector<8x1xf32>
    %94 = arith.mulf %91, %91 : vector<8x1xf32>
    %95 = arith.subf %93, %94 : vector<8x1xf32>
    %cst_29 = arith.constant 0.000000e+00 : f32
    %96 = vector.broadcast %cst_29 : f32 to vector<8x1xf32>
    %97 = arith.maximumf %95, %96 : vector<8x1xf32>
    %cst_30 = arith.constant 9.99999974E-6 : f32
    %98 = vector.broadcast %cst_30 : f32 to vector<8x1xf32>
    %99 = arith.addf %97, %98 : vector<8x1xf32>
    %100 = math.rsqrt %99 : vector<8x1xf32>
    %101 = vector.broadcast %91 : vector<8x1xf32> to vector<8x128xf32>
    %102 = arith.subf %84, %101 : vector<8x128xf32>
    %103 = vector.broadcast %100 : vector<8x1xf32> to vector<8x128xf32>
    %104 = arith.mulf %102, %103 : vector<8x128xf32>
    %105 = vector.broadcast %79 : vector<1x128xf32> to vector<8x128xf32>
    %106 = arith.mulf %104, %105 : vector<8x128xf32>
    %107 = vector.broadcast %80 : vector<1x128xf32> to vector<8x128xf32>
    %108 = arith.addf %106, %107 : vector<8x128xf32>
    %109 = arith.negf %108 : vector<8x128xf32>
    %110 = math.exp %109 : vector<8x128xf32>
    %cst_31 = arith.constant 1.000000e+00 : f32
    %111 = vector.broadcast %cst_31 : f32 to vector<8x128xf32>
    %112 = arith.addf %111, %110 : vector<8x128xf32>
    %113 = arith.divf %111, %112 : vector<8x128xf32>
    %114 = arith.mulf %108, %113 : vector<8x128xf32>
    %115 = arith.truncf %75 : vector<8x128xf32> to vector<8x128xbf16>
    %cst_32 = arith.constant dense<0.000000e+00> : vector<8x128xf32>
    %116 = tpu.matmul %115, %76, %cst_32 {dimension_numbers = #tpu.dot_dimension_numbers<[1], [0], [0], [1], [0, 0, 1, 1], [], []>} : vector<8x128xbf16>, vector<128x128xbf16>, vector<8x128xf32> -> vector<8x128xf32>
    %117 = vector.broadcast %78 : vector<1x128xf32> to vector<8x128xf32>
    %118 = arith.addf %116, %117 : vector<8x128xf32>
    %cst_33 = arith.constant dense<0.000000e+00> : vector<8xf32>
    %119 = vector.multi_reduction <add>, %118, %cst_33 [1] : vector<8x128xf32> to vector<8xf32>
    %120 = vector.shape_cast %119 : vector<8xf32> to vector<8x1xf32>
    %121 = arith.mulf %118, %118 : vector<8x128xf32>
    %cst_34 = arith.constant dense<0.000000e+00> : vector<8xf32>
    %122 = vector.multi_reduction <add>, %121, %cst_34 [1] : vector<8x128xf32> to vector<8xf32>
    %123 = vector.shape_cast %122 : vector<8xf32> to vector<8x1xf32>
    %cst_35 = arith.constant 6.400000e+01 : f32
    %124 = vector.broadcast %cst_35 : f32 to vector<8x1xf32>
    %125 = arith.divf %120, %124 : vector<8x1xf32>
    %cst_36 = arith.constant 6.400000e+01 : f32
    %126 = vector.broadcast %cst_36 : f32 to vector<8x1xf32>
    %127 = arith.divf %123, %126 : vector<8x1xf32>
    %128 = arith.mulf %125, %125 : vector<8x1xf32>
    %129 = arith.subf %127, %128 : vector<8x1xf32>
    %cst_37 = arith.constant 0.000000e+00 : f32
    %130 = vector.broadcast %cst_37 : f32 to vector<8x1xf32>
    %131 = arith.maximumf %129, %130 : vector<8x1xf32>
    %cst_38 = arith.constant 9.99999974E-6 : f32
    %132 = vector.broadcast %cst_38 : f32 to vector<8x1xf32>
    %133 = arith.addf %131, %132 : vector<8x1xf32>
    %134 = math.rsqrt %133 : vector<8x1xf32>
    %135 = vector.broadcast %125 : vector<8x1xf32> to vector<8x128xf32>
    %136 = arith.subf %118, %135 : vector<8x128xf32>
    %137 = vector.broadcast %134 : vector<8x1xf32> to vector<8x128xf32>
    %138 = arith.mulf %136, %137 : vector<8x128xf32>
    %139 = vector.broadcast %79 : vector<1x128xf32> to vector<8x128xf32>
    %140 = arith.mulf %138, %139 : vector<8x128xf32>
    %141 = vector.broadcast %80 : vector<1x128xf32> to vector<8x128xf32>
    %142 = arith.addf %140, %141 : vector<8x128xf32>
    %143 = arith.negf %142 : vector<8x128xf32>
    %144 = math.exp %143 : vector<8x128xf32>
    %cst_39 = arith.constant 1.000000e+00 : f32
    %145 = vector.broadcast %cst_39 : f32 to vector<8x128xf32>
    %146 = arith.addf %145, %144 : vector<8x128xf32>
    %147 = arith.divf %145, %146 : vector<8x128xf32>
    %148 = arith.mulf %142, %147 : vector<8x128xf32>
    %c0_40 = arith.constant 0 : index
    %c0_41 = arith.constant 0 : index
    %c0_42 = arith.constant 0 : index
    %149 = vector.load %arg6[%c0_40, %c0_41, %c0_42] : memref<3x128x128xbf16, #tpu.memory_space<vmem>>, vector<1x128x128xbf16>
    %150 = vector.shape_cast %149 : vector<1x128x128xbf16> to vector<128x128xbf16>
    %c0_43 = arith.constant 0 : index
    %c0_44 = arith.constant 0 : index
    %c0_45 = arith.constant 0 : index
    %151 = vector.load %arg7[%c0_43, %c0_44, %c0_45] : memref<3x8x128xf32, #tpu.memory_space<vmem>>, vector<1x8x128xf32>
    %152 = vector.shape_cast %151 : vector<1x8x128xf32> to vector<8x128xf32>
    %153 = vector.extract_strided_slice %152 {offsets = [0, 0], sizes = [1, 128], strides = [1, 1]} : vector<8x128xf32> to vector<1x128xf32>
    %154 = vector.extract_strided_slice %152 {offsets = [1, 0], sizes = [1, 128], strides = [1, 1]} : vector<8x128xf32> to vector<1x128xf32>
    %155 = vector.extract_strided_slice %152 {offsets = [2, 0], sizes = [1, 128], strides = [1, 1]} : vector<8x128xf32> to vector<1x128xf32>
    %156 = arith.truncf %114 : vector<8x128xf32> to vector<8x128xbf16>
    %cst_46 = arith.constant dense<0.000000e+00> : vector<8x128xf32>
    %157 = tpu.matmul %156, %150, %cst_46 {dimension_numbers = #tpu.dot_dimension_numbers<[1], [0], [0], [1], [0, 0, 1, 1], [], []>} : vector<8x128xbf16>, vector<128x128xbf16>, vector<8x128xf32> -> vector<8x128xf32>
    %158 = vector.broadcast %153 : vector<1x128xf32> to vector<8x128xf32>
    %159 = arith.addf %157, %158 : vector<8x128xf32>
    %cst_47 = arith.constant dense<0.000000e+00> : vector<8xf32>
    %160 = vector.multi_reduction <add>, %159, %cst_47 [1] : vector<8x128xf32> to vector<8xf32>
    %161 = vector.shape_cast %160 : vector<8xf32> to vector<8x1xf32>
    %162 = arith.mulf %159, %159 : vector<8x128xf32>
    %cst_48 = arith.constant dense<0.000000e+00> : vector<8xf32>
    %163 = vector.multi_reduction <add>, %162, %cst_48 [1] : vector<8x128xf32> to vector<8xf32>
    %164 = vector.shape_cast %163 : vector<8xf32> to vector<8x1xf32>
    %cst_49 = arith.constant 6.400000e+01 : f32
    %165 = vector.broadcast %cst_49 : f32 to vector<8x1xf32>
    %166 = arith.divf %161, %165 : vector<8x1xf32>
    %cst_50 = arith.constant 6.400000e+01 : f32
    %167 = vector.broadcast %cst_50 : f32 to vector<8x1xf32>
    %168 = arith.divf %164, %167 : vector<8x1xf32>
    %169 = arith.mulf %166, %166 : vector<8x1xf32>
    %170 = arith.subf %168, %169 : vector<8x1xf32>
    %cst_51 = arith.constant 0.000000e+00 : f32
    %171 = vector.broadcast %cst_51 : f32 to vector<8x1xf32>
    %172 = arith.maximumf %170, %171 : vector<8x1xf32>
    %cst_52 = arith.constant 9.99999974E-6 : f32
    %173 = vector.broadcast %cst_52 : f32 to vector<8x1xf32>
    %174 = arith.addf %172, %173 : vector<8x1xf32>
    %175 = math.rsqrt %174 : vector<8x1xf32>
    %176 = vector.broadcast %166 : vector<8x1xf32> to vector<8x128xf32>
    %177 = arith.subf %159, %176 : vector<8x128xf32>
    %178 = vector.broadcast %175 : vector<8x1xf32> to vector<8x128xf32>
    %179 = arith.mulf %177, %178 : vector<8x128xf32>
    %180 = vector.broadcast %154 : vector<1x128xf32> to vector<8x128xf32>
    %181 = arith.mulf %179, %180 : vector<8x128xf32>
    %182 = vector.broadcast %155 : vector<1x128xf32> to vector<8x128xf32>
    %183 = arith.addf %181, %182 : vector<8x128xf32>
    %184 = arith.negf %183 : vector<8x128xf32>
    %185 = math.exp %184 : vector<8x128xf32>
    %cst_53 = arith.constant 1.000000e+00 : f32
    %186 = vector.broadcast %cst_53 : f32 to vector<8x128xf32>
    %187 = arith.addf %186, %185 : vector<8x128xf32>
    %188 = arith.divf %186, %187 : vector<8x128xf32>
    %189 = arith.mulf %183, %188 : vector<8x128xf32>
    %190 = arith.truncf %148 : vector<8x128xf32> to vector<8x128xbf16>
    %cst_54 = arith.constant dense<0.000000e+00> : vector<8x128xf32>
    %191 = tpu.matmul %190, %150, %cst_54 {dimension_numbers = #tpu.dot_dimension_numbers<[1], [0], [0], [1], [0, 0, 1, 1], [], []>} : vector<8x128xbf16>, vector<128x128xbf16>, vector<8x128xf32> -> vector<8x128xf32>
    %192 = vector.broadcast %153 : vector<1x128xf32> to vector<8x128xf32>
    %193 = arith.addf %191, %192 : vector<8x128xf32>
    %cst_55 = arith.constant dense<0.000000e+00> : vector<8xf32>
    %194 = vector.multi_reduction <add>, %193, %cst_55 [1] : vector<8x128xf32> to vector<8xf32>
    %195 = vector.shape_cast %194 : vector<8xf32> to vector<8x1xf32>
    %196 = arith.mulf %193, %193 : vector<8x128xf32>
    %cst_56 = arith.constant dense<0.000000e+00> : vector<8xf32>
    %197 = vector.multi_reduction <add>, %196, %cst_56 [1] : vector<8x128xf32> to vector<8xf32>
    %198 = vector.shape_cast %197 : vector<8xf32> to vector<8x1xf32>
    %cst_57 = arith.constant 6.400000e+01 : f32
    %199 = vector.broadcast %cst_57 : f32 to vector<8x1xf32>
    %200 = arith.divf %195, %199 : vector<8x1xf32>
    %cst_58 = arith.constant 6.400000e+01 : f32
    %201 = vector.broadcast %cst_58 : f32 to vector<8x1xf32>
    %202 = arith.divf %198, %201 : vector<8x1xf32>
    %203 = arith.mulf %200, %200 : vector<8x1xf32>
    %204 = arith.subf %202, %203 : vector<8x1xf32>
    %cst_59 = arith.constant 0.000000e+00 : f32
    %205 = vector.broadcast %cst_59 : f32 to vector<8x1xf32>
    %206 = arith.maximumf %204, %205 : vector<8x1xf32>
    %cst_60 = arith.constant 9.99999974E-6 : f32
    %207 = vector.broadcast %cst_60 : f32 to vector<8x1xf32>
    %208 = arith.addf %206, %207 : vector<8x1xf32>
    %209 = math.rsqrt %208 : vector<8x1xf32>
    %210 = vector.broadcast %200 : vector<8x1xf32> to vector<8x128xf32>
    %211 = arith.subf %193, %210 : vector<8x128xf32>
    %212 = vector.broadcast %209 : vector<8x1xf32> to vector<8x128xf32>
    %213 = arith.mulf %211, %212 : vector<8x128xf32>
    %214 = vector.broadcast %154 : vector<1x128xf32> to vector<8x128xf32>
    %215 = arith.mulf %213, %214 : vector<8x128xf32>
    %216 = vector.broadcast %155 : vector<1x128xf32> to vector<8x128xf32>
    %217 = arith.addf %215, %216 : vector<8x128xf32>
    %218 = arith.negf %217 : vector<8x128xf32>
    %219 = math.exp %218 : vector<8x128xf32>
    %cst_61 = arith.constant 1.000000e+00 : f32
    %220 = vector.broadcast %cst_61 : f32 to vector<8x128xf32>
    %221 = arith.addf %220, %219 : vector<8x128xf32>
    %222 = arith.divf %220, %221 : vector<8x128xf32>
    %223 = arith.mulf %217, %222 : vector<8x128xf32>
    %c1 = arith.constant 1 : index
    %c0_62 = arith.constant 0 : index
    %c0_63 = arith.constant 0 : index
    %224 = vector.load %arg6[%c1, %c0_62, %c0_63] : memref<3x128x128xbf16, #tpu.memory_space<vmem>>, vector<1x128x128xbf16>
    %225 = vector.shape_cast %224 : vector<1x128x128xbf16> to vector<128x128xbf16>
    %c1_64 = arith.constant 1 : index
    %c0_65 = arith.constant 0 : index
    %c0_66 = arith.constant 0 : index
    %226 = vector.load %arg7[%c1_64, %c0_65, %c0_66] : memref<3x8x128xf32, #tpu.memory_space<vmem>>, vector<1x8x128xf32>
    %227 = vector.shape_cast %226 : vector<1x8x128xf32> to vector<8x128xf32>
    %228 = vector.extract_strided_slice %227 {offsets = [0, 0], sizes = [1, 128], strides = [1, 1]} : vector<8x128xf32> to vector<1x128xf32>
    %229 = vector.extract_strided_slice %227 {offsets = [1, 0], sizes = [1, 128], strides = [1, 1]} : vector<8x128xf32> to vector<1x128xf32>
    %230 = vector.extract_strided_slice %227 {offsets = [2, 0], sizes = [1, 128], strides = [1, 1]} : vector<8x128xf32> to vector<1x128xf32>
    %231 = arith.truncf %189 : vector<8x128xf32> to vector<8x128xbf16>
    %cst_67 = arith.constant dense<0.000000e+00> : vector<8x128xf32>
    %232 = tpu.matmul %231, %225, %cst_67 {dimension_numbers = #tpu.dot_dimension_numbers<[1], [0], [0], [1], [0, 0, 1, 1], [], []>} : vector<8x128xbf16>, vector<128x128xbf16>, vector<8x128xf32> -> vector<8x128xf32>
    %233 = vector.broadcast %228 : vector<1x128xf32> to vector<8x128xf32>
    %234 = arith.addf %232, %233 : vector<8x128xf32>
    %cst_68 = arith.constant dense<0.000000e+00> : vector<8xf32>
    %235 = vector.multi_reduction <add>, %234, %cst_68 [1] : vector<8x128xf32> to vector<8xf32>
    %236 = vector.shape_cast %235 : vector<8xf32> to vector<8x1xf32>
    %237 = arith.mulf %234, %234 : vector<8x128xf32>
    %cst_69 = arith.constant dense<0.000000e+00> : vector<8xf32>
    %238 = vector.multi_reduction <add>, %237, %cst_69 [1] : vector<8x128xf32> to vector<8xf32>
    %239 = vector.shape_cast %238 : vector<8xf32> to vector<8x1xf32>
    %cst_70 = arith.constant 6.400000e+01 : f32
    %240 = vector.broadcast %cst_70 : f32 to vector<8x1xf32>
    %241 = arith.divf %236, %240 : vector<8x1xf32>
    %cst_71 = arith.constant 6.400000e+01 : f32
    %242 = vector.broadcast %cst_71 : f32 to vector<8x1xf32>
    %243 = arith.divf %239, %242 : vector<8x1xf32>
    %244 = arith.mulf %241, %241 : vector<8x1xf32>
    %245 = arith.subf %243, %244 : vector<8x1xf32>
    %cst_72 = arith.constant 0.000000e+00 : f32
    %246 = vector.broadcast %cst_72 : f32 to vector<8x1xf32>
    %247 = arith.maximumf %245, %246 : vector<8x1xf32>
    %cst_73 = arith.constant 9.99999974E-6 : f32
    %248 = vector.broadcast %cst_73 : f32 to vector<8x1xf32>
    %249 = arith.addf %247, %248 : vector<8x1xf32>
    %250 = math.rsqrt %249 : vector<8x1xf32>
    %251 = vector.broadcast %241 : vector<8x1xf32> to vector<8x128xf32>
    %252 = arith.subf %234, %251 : vector<8x128xf32>
    %253 = vector.broadcast %250 : vector<8x1xf32> to vector<8x128xf32>
    %254 = arith.mulf %252, %253 : vector<8x128xf32>
    %255 = vector.broadcast %229 : vector<1x128xf32> to vector<8x128xf32>
    %256 = arith.mulf %254, %255 : vector<8x128xf32>
    %257 = vector.broadcast %230 : vector<1x128xf32> to vector<8x128xf32>
    %258 = arith.addf %256, %257 : vector<8x128xf32>
    %259 = arith.negf %258 : vector<8x128xf32>
    %260 = math.exp %259 : vector<8x128xf32>
    %cst_74 = arith.constant 1.000000e+00 : f32
    %261 = vector.broadcast %cst_74 : f32 to vector<8x128xf32>
    %262 = arith.addf %261, %260 : vector<8x128xf32>
    %263 = arith.divf %261, %262 : vector<8x128xf32>
    %264 = arith.mulf %258, %263 : vector<8x128xf32>
    %265 = arith.truncf %223 : vector<8x128xf32> to vector<8x128xbf16>
    %cst_75 = arith.constant dense<0.000000e+00> : vector<8x128xf32>
    %266 = tpu.matmul %265, %225, %cst_75 {dimension_numbers = #tpu.dot_dimension_numbers<[1], [0], [0], [1], [0, 0, 1, 1], [], []>} : vector<8x128xbf16>, vector<128x128xbf16>, vector<8x128xf32> -> vector<8x128xf32>
    %267 = vector.broadcast %228 : vector<1x128xf32> to vector<8x128xf32>
    %268 = arith.addf %266, %267 : vector<8x128xf32>
    %cst_76 = arith.constant dense<0.000000e+00> : vector<8xf32>
    %269 = vector.multi_reduction <add>, %268, %cst_76 [1] : vector<8x128xf32> to vector<8xf32>
    %270 = vector.shape_cast %269 : vector<8xf32> to vector<8x1xf32>
    %271 = arith.mulf %268, %268 : vector<8x128xf32>
    %cst_77 = arith.constant dense<0.000000e+00> : vector<8xf32>
    %272 = vector.multi_reduction <add>, %271, %cst_77 [1] : vector<8x128xf32> to vector<8xf32>
    %273 = vector.shape_cast %272 : vector<8xf32> to vector<8x1xf32>
    %cst_78 = arith.constant 6.400000e+01 : f32
    %274 = vector.broadcast %cst_78 : f32 to vector<8x1xf32>
    %275 = arith.divf %270, %274 : vector<8x1xf32>
    %cst_79 = arith.constant 6.400000e+01 : f32
    %276 = vector.broadcast %cst_79 : f32 to vector<8x1xf32>
    %277 = arith.divf %273, %276 : vector<8x1xf32>
    %278 = arith.mulf %275, %275 : vector<8x1xf32>
    %279 = arith.subf %277, %278 : vector<8x1xf32>
    %cst_80 = arith.constant 0.000000e+00 : f32
    %280 = vector.broadcast %cst_80 : f32 to vector<8x1xf32>
    %281 = arith.maximumf %279, %280 : vector<8x1xf32>
    %cst_81 = arith.constant 9.99999974E-6 : f32
    %282 = vector.broadcast %cst_81 : f32 to vector<8x1xf32>
    %283 = arith.addf %281, %282 : vector<8x1xf32>
    %284 = math.rsqrt %283 : vector<8x1xf32>
    %285 = vector.broadcast %275 : vector<8x1xf32> to vector<8x128xf32>
    %286 = arith.subf %268, %285 : vector<8x128xf32>
    %287 = vector.broadcast %284 : vector<8x1xf32> to vector<8x128xf32>
    %288 = arith.mulf %286, %287 : vector<8x128xf32>
    %289 = vector.broadcast %229 : vector<1x128xf32> to vector<8x128xf32>
    %290 = arith.mulf %288, %289 : vector<8x128xf32>
    %291 = vector.broadcast %230 : vector<1x128xf32> to vector<8x128xf32>
    %292 = arith.addf %290, %291 : vector<8x128xf32>
    %293 = arith.negf %292 : vector<8x128xf32>
    %294 = math.exp %293 : vector<8x128xf32>
    %cst_82 = arith.constant 1.000000e+00 : f32
    %295 = vector.broadcast %cst_82 : f32 to vector<8x128xf32>
    %296 = arith.addf %295, %294 : vector<8x128xf32>
    %297 = arith.divf %295, %296 : vector<8x128xf32>
    %298 = arith.mulf %292, %297 : vector<8x128xf32>
    %c2 = arith.constant 2 : index
    %c0_83 = arith.constant 0 : index
    %c0_84 = arith.constant 0 : index
    %299 = vector.load %arg6[%c2, %c0_83, %c0_84] : memref<3x128x128xbf16, #tpu.memory_space<vmem>>, vector<1x128x128xbf16>
    %300 = vector.shape_cast %299 : vector<1x128x128xbf16> to vector<128x128xbf16>
    %c2_85 = arith.constant 2 : index
    %c0_86 = arith.constant 0 : index
    %c0_87 = arith.constant 0 : index
    %301 = vector.load %arg7[%c2_85, %c0_86, %c0_87] : memref<3x8x128xf32, #tpu.memory_space<vmem>>, vector<1x8x128xf32>
    %302 = vector.shape_cast %301 : vector<1x8x128xf32> to vector<8x128xf32>
    %303 = vector.extract_strided_slice %302 {offsets = [0, 0], sizes = [1, 128], strides = [1, 1]} : vector<8x128xf32> to vector<1x128xf32>
    %304 = vector.extract_strided_slice %302 {offsets = [1, 0], sizes = [1, 128], strides = [1, 1]} : vector<8x128xf32> to vector<1x128xf32>
    %305 = vector.extract_strided_slice %302 {offsets = [2, 0], sizes = [1, 128], strides = [1, 1]} : vector<8x128xf32> to vector<1x128xf32>
    %306 = arith.truncf %264 : vector<8x128xf32> to vector<8x128xbf16>
    %cst_88 = arith.constant dense<0.000000e+00> : vector<8x128xf32>
    %307 = tpu.matmul %306, %300, %cst_88 {dimension_numbers = #tpu.dot_dimension_numbers<[1], [0], [0], [1], [0, 0, 1, 1], [], []>} : vector<8x128xbf16>, vector<128x128xbf16>, vector<8x128xf32> -> vector<8x128xf32>
    %308 = vector.broadcast %303 : vector<1x128xf32> to vector<8x128xf32>
    %309 = arith.addf %307, %308 : vector<8x128xf32>
    %cst_89 = arith.constant dense<0.000000e+00> : vector<8xf32>
    %310 = vector.multi_reduction <add>, %309, %cst_89 [1] : vector<8x128xf32> to vector<8xf32>
    %311 = vector.shape_cast %310 : vector<8xf32> to vector<8x1xf32>
    %312 = arith.mulf %309, %309 : vector<8x128xf32>
    %cst_90 = arith.constant dense<0.000000e+00> : vector<8xf32>
    %313 = vector.multi_reduction <add>, %312, %cst_90 [1] : vector<8x128xf32> to vector<8xf32>
    %314 = vector.shape_cast %313 : vector<8xf32> to vector<8x1xf32>
    %cst_91 = arith.constant 6.400000e+01 : f32
    %315 = vector.broadcast %cst_91 : f32 to vector<8x1xf32>
    %316 = arith.divf %311, %315 : vector<8x1xf32>
    %cst_92 = arith.constant 6.400000e+01 : f32
    %317 = vector.broadcast %cst_92 : f32 to vector<8x1xf32>
    %318 = arith.divf %314, %317 : vector<8x1xf32>
    %319 = arith.mulf %316, %316 : vector<8x1xf32>
    %320 = arith.subf %318, %319 : vector<8x1xf32>
    %cst_93 = arith.constant 0.000000e+00 : f32
    %321 = vector.broadcast %cst_93 : f32 to vector<8x1xf32>
    %322 = arith.maximumf %320, %321 : vector<8x1xf32>
    %cst_94 = arith.constant 9.99999974E-6 : f32
    %323 = vector.broadcast %cst_94 : f32 to vector<8x1xf32>
    %324 = arith.addf %322, %323 : vector<8x1xf32>
    %325 = math.rsqrt %324 : vector<8x1xf32>
    %326 = vector.broadcast %316 : vector<8x1xf32> to vector<8x128xf32>
    %327 = arith.subf %309, %326 : vector<8x128xf32>
    %328 = vector.broadcast %325 : vector<8x1xf32> to vector<8x128xf32>
    %329 = arith.mulf %327, %328 : vector<8x128xf32>
    %330 = vector.broadcast %304 : vector<1x128xf32> to vector<8x128xf32>
    %331 = arith.mulf %329, %330 : vector<8x128xf32>
    %332 = vector.broadcast %305 : vector<1x128xf32> to vector<8x128xf32>
    %333 = arith.addf %331, %332 : vector<8x128xf32>
    %334 = arith.negf %333 : vector<8x128xf32>
    %335 = math.exp %334 : vector<8x128xf32>
    %cst_95 = arith.constant 1.000000e+00 : f32
    %336 = vector.broadcast %cst_95 : f32 to vector<8x128xf32>
    %337 = arith.addf %336, %335 : vector<8x128xf32>
    %338 = arith.divf %336, %337 : vector<8x128xf32>
    %339 = arith.mulf %333, %338 : vector<8x128xf32>
    %340 = arith.truncf %298 : vector<8x128xf32> to vector<8x128xbf16>
    %cst_96 = arith.constant dense<0.000000e+00> : vector<8x128xf32>
    %341 = tpu.matmul %340, %300, %cst_96 {dimension_numbers = #tpu.dot_dimension_numbers<[1], [0], [0], [1], [0, 0, 1, 1], [], []>} : vector<8x128xbf16>, vector<128x128xbf16>, vector<8x128xf32> -> vector<8x128xf32>
    %342 = vector.broadcast %303 : vector<1x128xf32> to vector<8x128xf32>
    %343 = arith.addf %341, %342 : vector<8x128xf32>
    %cst_97 = arith.constant dense<0.000000e+00> : vector<8xf32>
    %344 = vector.multi_reduction <add>, %343, %cst_97 [1] : vector<8x128xf32> to vector<8xf32>
    %345 = vector.shape_cast %344 : vector<8xf32> to vector<8x1xf32>
    %346 = arith.mulf %343, %343 : vector<8x128xf32>
    %cst_98 = arith.constant dense<0.000000e+00> : vector<8xf32>
    %347 = vector.multi_reduction <add>, %346, %cst_98 [1] : vector<8x128xf32> to vector<8xf32>
    %348 = vector.shape_cast %347 : vector<8xf32> to vector<8x1xf32>
    %cst_99 = arith.constant 6.400000e+01 : f32
    %349 = vector.broadcast %cst_99 : f32 to vector<8x1xf32>
    %350 = arith.divf %345, %349 : vector<8x1xf32>
    %cst_100 = arith.constant 6.400000e+01 : f32
    %351 = vector.broadcast %cst_100 : f32 to vector<8x1xf32>
    %352 = arith.divf %348, %351 : vector<8x1xf32>
    %353 = arith.mulf %350, %350 : vector<8x1xf32>
    %354 = arith.subf %352, %353 : vector<8x1xf32>
    %cst_101 = arith.constant 0.000000e+00 : f32
    %355 = vector.broadcast %cst_101 : f32 to vector<8x1xf32>
    %356 = arith.maximumf %354, %355 : vector<8x1xf32>
    %cst_102 = arith.constant 9.99999974E-6 : f32
    %357 = vector.broadcast %cst_102 : f32 to vector<8x1xf32>
    %358 = arith.addf %356, %357 : vector<8x1xf32>
    %359 = math.rsqrt %358 : vector<8x1xf32>
    %360 = vector.broadcast %350 : vector<8x1xf32> to vector<8x128xf32>
    %361 = arith.subf %343, %360 : vector<8x128xf32>
    %362 = vector.broadcast %359 : vector<8x1xf32> to vector<8x128xf32>
    %363 = arith.mulf %361, %362 : vector<8x128xf32>
    %364 = vector.broadcast %304 : vector<1x128xf32> to vector<8x128xf32>
    %365 = arith.mulf %363, %364 : vector<8x128xf32>
    %366 = vector.broadcast %305 : vector<1x128xf32> to vector<8x128xf32>
    %367 = arith.addf %365, %366 : vector<8x128xf32>
    %368 = arith.negf %367 : vector<8x128xf32>
    %369 = math.exp %368 : vector<8x128xf32>
    %cst_103 = arith.constant 1.000000e+00 : f32
    %370 = vector.broadcast %cst_103 : f32 to vector<8x128xf32>
    %371 = arith.addf %370, %369 : vector<8x128xf32>
    %372 = arith.divf %370, %371 : vector<8x128xf32>
    %373 = arith.mulf %367, %372 : vector<8x128xf32>
    %c0_104 = arith.constant 0 : index
    %c0_105 = arith.constant 0 : index
    %374 = vector.load %arg8[%c0_104, %c0_105] : memref<128x128xbf16, #tpu.memory_space<vmem>>, vector<128x128xbf16>
    %c0_106 = arith.constant 0 : index
    %c0_107 = arith.constant 0 : index
    %375 = vector.load %arg9[%c0_106, %c0_107] : memref<8x128xf32, #tpu.memory_space<vmem>>, vector<1x128xf32>
    %376 = arith.truncf %339 : vector<8x128xf32> to vector<8x128xbf16>
    %cst_108 = arith.constant dense<0.000000e+00> : vector<8x128xf32>
    %377 = tpu.matmul %376, %374, %cst_108 {dimension_numbers = #tpu.dot_dimension_numbers<[1], [0], [0], [1], [0, 0, 1, 1], [], []>} : vector<8x128xbf16>, vector<128x128xbf16>, vector<8x128xf32> -> vector<8x128xf32>
    %378 = vector.broadcast %375 : vector<1x128xf32> to vector<8x128xf32>
    %379 = arith.addf %377, %378 : vector<8x128xf32>
    %380 = math.tanh %379 : vector<8x128xf32>
    %c0_109 = arith.constant 0 : index
    %c0_110 = arith.constant 0 : index
    %381 = vector.load %arg10[%c0_109, %c0_110] : memref<16x128xf32, #tpu.memory_space<vmem>>, vector<8x128xf32>
    tpu.vector_store %arg10[%c0_109, %c0_110], %380 {strides = array<i32>} : memref<16x128xf32, #tpu.memory_space<vmem>>, vector<8x128xf32>,
    %382 = arith.truncf %373 : vector<8x128xf32> to vector<8x128xbf16>
    %cst_111 = arith.constant dense<0.000000e+00> : vector<8x128xf32>
    %383 = tpu.matmul %382, %374, %cst_111 {dimension_numbers = #tpu.dot_dimension_numbers<[1], [0], [0], [1], [0, 0, 1, 1], [], []>} : vector<8x128xbf16>, vector<128x128xbf16>, vector<8x128xf32> -> vector<8x128xf32>
    %384 = vector.broadcast %375 : vector<1x128xf32> to vector<8x128xf32>
    %385 = arith.addf %383, %384 : vector<8x128xf32>
    %386 = math.tanh %385 : vector<8x128xf32>
    %c8 = arith.constant 8 : index
    %c0_112 = arith.constant 0 : index
    %387 = vector.load %arg10[%c8, %c0_112] : memref<16x128xf32, #tpu.memory_space<vmem>>, vector<8x128xf32>
    tpu.vector_store %arg10[%c8, %c0_112], %386 {strides = array<i32>} : memref<16x128xf32, #tpu.memory_space<vmem>>, vector<8x128xf32>,
    return
  }
  func.func @transform_0(%arg0: i32) -> (i32, i32) {
    %c0_i32 = arith.constant 0 : i32
    %c0_i32_0 = arith.constant 0 : i32
    return %arg0, %c0_i32 : i32, i32
  }
  func.func @transform_1(%arg0: i32) -> (i32, i32) {
    %c0_i32 = arith.constant 0 : i32
    %c0_i32_0 = arith.constant 0 : i32
    %c0_i32_1 = arith.constant 0 : i32
    return %c0_i32, %c0_i32_0 : i32, i32
  }
  func.func @transform_2(%arg0: i32) -> (i32, i32) {
    %c0_i32 = arith.constant 0 : i32
    %c0_i32_0 = arith.constant 0 : i32
    %c0_i32_1 = arith.constant 0 : i32
    return %c0_i32, %c0_i32_0 : i32, i32
  }
  func.func @transform_3(%arg0: i32) -> (i32, i32) {
    %c0_i32 = arith.constant 0 : i32
    %c0_i32_0 = arith.constant 0 : i32
    %c0_i32_1 = arith.constant 0 : i32
    return %c0_i32, %c0_i32_0 : i32, i32
  }
  func.func @transform_4(%arg0: i32) -> (i32, i32) {
    %c0_i32 = arith.constant 0 : i32
    %c0_i32_0 = arith.constant 0 : i32
    %c0_i32_1 = arith.constant 0 : i32
    return %c0_i32, %c0_i32_0 : i32, i32
  }
  func.func @transform_5(%arg0: i32) -> (i32, i32, i32) {
    %c0_i32 = arith.constant 0 : i32
    %c0_i32_0 = arith.constant 0 : i32
    %c0_i32_1 = arith.constant 0 : i32
    %c0_i32_2 = arith.constant 0 : i32
    return %c0_i32, %c0_i32_0, %c0_i32_1 : i32, i32, i32
  }
  func.func @transform_6(%arg0: i32) -> (i32, i32, i32) {
    %c0_i32 = arith.constant 0 : i32
    %c0_i32_0 = arith.constant 0 : i32
    %c0_i32_1 = arith.constant 0 : i32
    %c0_i32_2 = arith.constant 0 : i32
    return %c0_i32, %c0_i32_0, %c0_i32_1 : i32, i32, i32
  }
  func.func @transform_7(%arg0: i32) -> (i32, i32) {
    %c0_i32 = arith.constant 0 : i32
    %c0_i32_0 = arith.constant 0 : i32
    %c0_i32_1 = arith.constant 0 : i32
    return %c0_i32, %c0_i32_0 : i32, i32
  }
  func.func @transform_8(%arg0: i32) -> (i32, i32) {
    %c0_i32 = arith.constant 0 : i32
    %c0_i32_0 = arith.constant 0 : i32
    %c0_i32_1 = arith.constant 0 : i32
    return %c0_i32, %c0_i32_0 : i32, i32
  }
  func.func @transform_9(%arg0: i32) -> (i32, i32) {
    %c0_i32 = arith.constant 0 : i32
    %c0_i32_0 = arith.constant 0 : i32
    return %arg0, %c0_i32 : i32, i32
  }
}

module attributes {stable_mosaic.version = 11 : i64} {
  func.func @_actor_kernel(%arg0: i32, %arg1: memref<16x32xf32, #tpu.memory_space<vmem>>, %arg2: memref<32x128xbf16, #tpu.memory_space<vmem>>, %arg3: memref<8x128xf32, #tpu.memory_space<vmem>>, %arg4: memref<128x128xbf16, #tpu.memory_space<vmem>>, %arg5: memref<8x128xf32, #tpu.memory_space<vmem>>, %arg6: memref<3x128x128xbf16, #tpu.memory_space<vmem>>, %arg7: memref<3x8x128xf32, #tpu.memory_space<vmem>>, %arg8: memref<128x128xbf16, #tpu.memory_space<vmem>>, %arg9: memref<8x128xf32, #tpu.memory_space<vmem>>, %arg10: memref<16x128xf32, #tpu.memory_space<vmem>>) attributes {dimension_semantics = [#tpu.dimension_semantics<parallel>], iteration_bounds = array<i64: 2>, scalar_prefetch = 0 : i64, scratch_operands = 0 : i64, tpu.core_type = #tpu.core_type<tc>, window_params = [{transform_indices = @transform_0, window_bounds = array<i64: 16, 32>}, {pipeline_mode = #tpu.pipeline_mode<synchronous>, transform_indices = @transform_1, window_bounds = array<i64: 32, 128>}, {pipeline_mode = #tpu.pipeline_mode<synchronous>, transform_indices = @transform_2, window_bounds = array<i64: 8, 128>}, {pipeline_mode = #tpu.pipeline_mode<synchronous>, transform_indices = @transform_3, window_bounds = array<i64: 128, 128>}, {pipeline_mode = #tpu.pipeline_mode<synchronous>, transform_indices = @transform_4, window_bounds = array<i64: 8, 128>}, {pipeline_mode = #tpu.pipeline_mode<synchronous>, transform_indices = @transform_5, window_bounds = array<i64: 3, 128, 128>}, {pipeline_mode = #tpu.pipeline_mode<synchronous>, transform_indices = @transform_6, window_bounds = array<i64: 3, 8, 128>}, {pipeline_mode = #tpu.pipeline_mode<synchronous>, transform_indices = @transform_7, window_bounds = array<i64: 128, 128>}, {pipeline_mode = #tpu.pipeline_mode<synchronous>, transform_indices = @transform_8, window_bounds = array<i64: 8, 128>}, {transform_indices = @transform_9, window_bounds = array<i64: 16, 128>}]} {
    %c0 = arith.constant 0 : index
    %c0_0 = arith.constant 0 : index
    %0 = vector.load %arg1[%c0, %c0_0] : memref<16x32xf32, #tpu.memory_space<vmem>>, vector<16x32xf32>
    %1 = vector.extract_strided_slice %0 {offsets = [0, 0], sizes = [8, 32], strides = [1, 1]} : vector<16x32xf32> to vector<8x32xf32>
    %2 = vector.extract_strided_slice %0 {offsets = [8, 0], sizes = [8, 32], strides = [1, 1]} : vector<16x32xf32> to vector<8x32xf32>
    %c0_1 = arith.constant 0 : index
    %c0_2 = arith.constant 0 : index
    %3 = vector.load %arg2[%c0_1, %c0_2] : memref<32x128xbf16, #tpu.memory_space<vmem>>, vector<32x128xbf16>
    %c0_3 = arith.constant 0 : index
    %c0_4 = arith.constant 0 : index
    %4 = vector.load %arg3[%c0_3, %c0_4] : memref<8x128xf32, #tpu.memory_space<vmem>>, vector<8x128xf32>
    %5 = vector.extract_strided_slice %4 {offsets = [0, 0], sizes = [1, 128], strides = [1, 1]} : vector<8x128xf32> to vector<1x128xf32>
    %6 = vector.extract_strided_slice %4 {offsets = [1, 0], sizes = [1, 128], strides = [1, 1]} : vector<8x128xf32> to vector<1x128xf32>
    %7 = vector.extract_strided_slice %4 {offsets = [2, 0], sizes = [1, 128], strides = [1, 1]} : vector<8x128xf32> to vector<1x128xf32>
    %8 = arith.truncf %1 : vector<8x32xf32> to vector<8x32xbf16>
    %cst = arith.constant dense<0.000000e+00> : vector<8x128xf32>
    %9 = tpu.matmul %8, %3, %cst {dimension_numbers = #tpu.dot_dimension_numbers<[1], [0], [0], [1], [0, 0, 1, 1], [], []>} : vector<8x32xbf16>, vector<32x128xbf16>, vector<8x128xf32> -> vector<8x128xf32>
    %10 = vector.broadcast %5 : vector<1x128xf32> to vector<8x128xf32>
    %11 = arith.addf %9, %10 : vector<8x128xf32>
    %cst_5 = arith.constant dense<0.000000e+00> : vector<8xf32>
    %12 = vector.multi_reduction <add>, %11, %cst_5 [1] : vector<8x128xf32> to vector<8xf32>
    %13 = vector.shape_cast %12 : vector<8xf32> to vector<8x1xf32>
    %14 = arith.mulf %11, %11 : vector<8x128xf32>
    %cst_6 = arith.constant dense<0.000000e+00> : vector<8xf32>
    %15 = vector.multi_reduction <add>, %14, %cst_6 [1] : vector<8x128xf32> to vector<8xf32>
    %16 = vector.shape_cast %15 : vector<8xf32> to vector<8x1xf32>
    %cst_7 = arith.constant 4.800000e+01 : f32
    %17 = vector.broadcast %cst_7 : f32 to vector<8x1xf32>
    %18 = arith.divf %13, %17 : vector<8x1xf32>
    %cst_8 = arith.constant 4.800000e+01 : f32
    %19 = vector.broadcast %cst_8 : f32 to vector<8x1xf32>
    %20 = arith.divf %16, %19 : vector<8x1xf32>
    %21 = arith.mulf %18, %18 : vector<8x1xf32>
    %22 = arith.subf %20, %21 : vector<8x1xf32>
    %cst_9 = arith.constant 0.000000e+00 : f32
    %23 = vector.broadcast %cst_9 : f32 to vector<8x1xf32>
    %24 = arith.maximumf %22, %23 : vector<8x1xf32>
    %cst_10 = arith.constant 9.99999974E-6 : f32
    %25 = vector.broadcast %cst_10 : f32 to vector<8x1xf32>
    %26 = arith.addf %24, %25 : vector<8x1xf32>
    %27 = math.rsqrt %26 : vector<8x1xf32>
    %28 = vector.broadcast %18 : vector<8x1xf32> to vector<8x128xf32>
    %29 = arith.subf %11, %28 : vector<8x128xf32>
    %30 = vector.broadcast %27 : vector<8x1xf32> to vector<8x128xf32>
    %31 = arith.mulf %29, %30 : vector<8x128xf32>
    %32 = vector.broadcast %6 : vector<1x128xf32> to vector<8x128xf32>
    %33 = arith.mulf %31, %32 : vector<8x128xf32>
    %34 = vector.broadcast %7 : vector<1x128xf32> to vector<8x128xf32>
    %35 = arith.addf %33, %34 : vector<8x128xf32>
    %36 = arith.negf %35 : vector<8x128xf32>
    %37 = math.exp %36 : vector<8x128xf32>
    %cst_11 = arith.constant 1.000000e+00 : f32
    %38 = vector.broadcast %cst_11 : f32 to vector<8x128xf32>
    %39 = arith.addf %38, %37 : vector<8x128xf32>
    %40 = arith.divf %38, %39 : vector<8x128xf32>
    %41 = arith.mulf %35, %40 : vector<8x128xf32>
    %42 = arith.truncf %2 : vector<8x32xf32> to vector<8x32xbf16>
    %cst_12 = arith.constant dense<0.000000e+00> : vector<8x128xf32>
    %43 = tpu.matmul %42, %3, %cst_12 {dimension_numbers = #tpu.dot_dimension_numbers<[1], [0], [0], [1], [0, 0, 1, 1], [], []>} : vector<8x32xbf16>, vector<32x128xbf16>, vector<8x128xf32> -> vector<8x128xf32>
    %44 = vector.broadcast %5 : vector<1x128xf32> to vector<8x128xf32>
    %45 = arith.addf %43, %44 : vector<8x128xf32>
    %cst_13 = arith.constant dense<0.000000e+00> : vector<8xf32>
    %46 = vector.multi_reduction <add>, %45, %cst_13 [1] : vector<8x128xf32> to vector<8xf32>
    %47 = vector.shape_cast %46 : vector<8xf32> to vector<8x1xf32>
    %48 = arith.mulf %45, %45 : vector<8x128xf32>
    %cst_14 = arith.constant dense<0.000000e+00> : vector<8xf32>
    %49 = vector.multi_reduction <add>, %48, %cst_14 [1] : vector<8x128xf32> to vector<8xf32>
    %50 = vector.shape_cast %49 : vector<8xf32> to vector<8x1xf32>
    %cst_15 = arith.constant 4.800000e+01 : f32
    %51 = vector.broadcast %cst_15 : f32 to vector<8x1xf32>
    %52 = arith.divf %47, %51 : vector<8x1xf32>
    %cst_16 = arith.constant 4.800000e+01 : f32
    %53 = vector.broadcast %cst_16 : f32 to vector<8x1xf32>
    %54 = arith.divf %50, %53 : vector<8x1xf32>
    %55 = arith.mulf %52, %52 : vector<8x1xf32>
    %56 = arith.subf %54, %55 : vector<8x1xf32>
    %cst_17 = arith.constant 0.000000e+00 : f32
    %57 = vector.broadcast %cst_17 : f32 to vector<8x1xf32>
    %58 = arith.maximumf %56, %57 : vector<8x1xf32>
    %cst_18 = arith.constant 9.99999974E-6 : f32
    %59 = vector.broadcast %cst_18 : f32 to vector<8x1xf32>
    %60 = arith.addf %58, %59 : vector<8x1xf32>
    %61 = math.rsqrt %60 : vector<8x1xf32>
    %62 = vector.broadcast %52 : vector<8x1xf32> to vector<8x128xf32>
    %63 = arith.subf %45, %62 : vector<8x128xf32>
    %64 = vector.broadcast %61 : vector<8x1xf32> to vector<8x128xf32>
    %65 = arith.mulf %63, %64 : vector<8x128xf32>
    %66 = vector.broadcast %6 : vector<1x128xf32> to vector<8x128xf32>
    %67 = arith.mulf %65, %66 : vector<8x128xf32>
    %68 = vector.broadcast %7 : vector<1x128xf32> to vector<8x128xf32>
    %69 = arith.addf %67, %68 : vector<8x128xf32>
    %70 = arith.negf %69 : vector<8x128xf32>
    %71 = math.exp %70 : vector<8x128xf32>
    %cst_19 = arith.constant 1.000000e+00 : f32
    %72 = vector.broadcast %cst_19 : f32 to vector<8x128xf32>
    %73 = arith.addf %72, %71 : vector<8x128xf32>
    %74 = arith.divf %72, %73 : vector<8x128xf32>
    %75 = arith.mulf %69, %74 : vector<8x128xf32>
    %c0_20 = arith.constant 0 : index
    %c0_21 = arith.constant 0 : index
    %76 = vector.load %arg4[%c0_20, %c0_21] : memref<128x128xbf16, #tpu.memory_space<vmem>>, vector<128x128xbf16>
    %c0_22 = arith.constant 0 : index
    %c0_23 = arith.constant 0 : index
    %77 = vector.load %arg5[%c0_22, %c0_23] : memref<8x128xf32, #tpu.memory_space<vmem>>, vector<8x128xf32>
    %78 = vector.extract_strided_slice %77 {offsets = [0, 0], sizes = [1, 128], strides = [1, 1]} : vector<8x128xf32> to vector<1x128xf32>
    %79 = vector.extract_strided_slice %77 {offsets = [1, 0], sizes = [1, 128], strides = [1, 1]} : vector<8x128xf32> to vector<1x128xf32>
    %80 = vector.extract_strided_slice %77 {offsets = [2, 0], sizes = [1, 128], strides = [1, 1]} : vector<8x128xf32> to vector<1x128xf32>
    %81 = arith.truncf %41 : vector<8x128xf32> to vector<8x128xbf16>
    %cst_24 = arith.constant dense<0.000000e+00> : vector<8x128xf32>
    %82 = tpu.matmul %81, %76, %cst_24 {dimension_numbers = #tpu.dot_dimension_numbers<[1], [0], [0], [1], [0, 0, 1, 1], [], []>} : vector<8x128xbf16>, vector<128x128xbf16>, vector<8x128xf32> -> vector<8x128xf32>
    %83 = vector.broadcast %78 : vector<1x128xf32> to vector<8x128xf32>
    %84 = arith.addf %82, %83 : vector<8x128xf32>
    %cst_25 = arith.constant dense<0.000000e+00> : vector<8xf32>
    %85 = vector.multi_reduction <add>, %84, %cst_25 [1] : vector<8x128xf32> to vector<8xf32>
    %86 = vector.shape_cast %85 : vector<8xf32> to vector<8x1xf32>
    %87 = arith.mulf %84, %84 : vector<8x128xf32>
    %cst_26 = arith.constant dense<0.000000e+00> : vector<8xf32>
    %88 = vector.multi_reduction <add>, %87, %cst_26 [1] : vector<8x128xf32> to vector<8xf32>
    %89 = vector.shape_cast %88 : vector<8xf32> to vector<8x1xf32>
    %cst_27 = arith.constant 6.400000e+01 : f32
    %90 = vector.broadcast %cst_27 : f32 to vector<8x1xf32>
    %91 = arith.divf %86, %90 : vector<8x1xf32>
    %cst_28 = arith.constant 6.400000e+01 : f32
    %92 = vector.broadcast %cst_28 : f32 to vector<8x1xf32>
    %93 = arith.divf %89, %92 : vector<8x1xf32>
    %94 = arith.mulf %91, %91 : vector<8x1xf32>
    %95 = arith.subf %93, %94 : vector<8x1xf32>
    %cst_29 = arith.constant 0.000000e+00 : f32
    %96 = vector.broadcast %cst_29 : f32 to vector<8x1xf32>
    %97 = arith.maximumf %95, %96 : vector<8x1xf32>
    %cst_30 = arith.constant 9.99999974E-6 : f32
    %98 = vector.broadcast %cst_30 : f32 to vector<8x1xf32>
    %99 = arith.addf %97, %98 : vector<8x1xf32>
    %100 = math.rsqrt %99 : vector<8x1xf32>
    %101 = vector.broadcast %91 : vector<8x1xf32> to vector<8x128xf32>
    %102 = arith.subf %84, %101 : vector<8x128xf32>
    %103 = vector.broadcast %100 : vector<8x1xf32> to vector<8x128xf32>
    %104 = arith.mulf %102, %103 : vector<8x128xf32>
    %105 = vector.broadcast %79 : vector<1x128xf32> to vector<8x128xf32>
    %106 = arith.mulf %104, %105 : vector<8x128xf32>
    %107 = vector.broadcast %80 : vector<1x128xf32> to vector<8x128xf32>
    %108 = arith.addf %106, %107 : vector<8x128xf32>
    %109 = arith.negf %108 : vector<8x128xf32>
    %110 = math.exp %109 : vector<8x128xf32>
    %cst_31 = arith.constant 1.000000e+00 : f32
    %111 = vector.broadcast %cst_31 : f32 to vector<8x128xf32>
    %112 = arith.addf %111, %110 : vector<8x128xf32>
    %113 = arith.divf %111, %112 : vector<8x128xf32>
    %114 = arith.mulf %108, %113 : vector<8x128xf32>
    %115 = arith.truncf %75 : vector<8x128xf32> to vector<8x128xbf16>
    %cst_32 = arith.constant dense<0.000000e+00> : vector<8x128xf32>
    %116 = tpu.matmul %115, %76, %cst_32 {dimension_numbers = #tpu.dot_dimension_numbers<[1], [0], [0], [1], [0, 0, 1, 1], [], []>} : vector<8x128xbf16>, vector<128x128xbf16>, vector<8x128xf32> -> vector<8x128xf32>
    %117 = vector.broadcast %78 : vector<1x128xf32> to vector<8x128xf32>
    %118 = arith.addf %116, %117 : vector<8x128xf32>
    %cst_33 = arith.constant dense<0.000000e+00> : vector<8xf32>
    %119 = vector.multi_reduction <add>, %118, %cst_33 [1] : vector<8x128xf32> to vector<8xf32>
    %120 = vector.shape_cast %119 : vector<8xf32> to vector<8x1xf32>
    %121 = arith.mulf %118, %118 : vector<8x128xf32>
    %cst_34 = arith.constant dense<0.000000e+00> : vector<8xf32>
    %122 = vector.multi_reduction <add>, %121, %cst_34 [1] : vector<8x128xf32> to vector<8xf32>
    %123 = vector.shape_cast %122 : vector<8xf32> to vector<8x1xf32>
    %cst_35 = arith.constant 6.400000e+01 : f32
    %124 = vector.broadcast %cst_35 : f32 to vector<8x1xf32>
    %125 = arith.divf %120, %124 : vector<8x1xf32>
    %cst_36 = arith.constant 6.400000e+01 : f32
    %126 = vector.broadcast %cst_36 : f32 to vector<8x1xf32>
    %127 = arith.divf %123, %126 : vector<8x1xf32>
    %128 = arith.mulf %125, %125 : vector<8x1xf32>
    %129 = arith.subf %127, %128 : vector<8x1xf32>
    %cst_37 = arith.constant 0.000000e+00 : f32
    %130 = vector.broadcast %cst_37 : f32 to vector<8x1xf32>
    %131 = arith.maximumf %129, %130 : vector<8x1xf32>
    %cst_38 = arith.constant 9.99999974E-6 : f32
    %132 = vector.broadcast %cst_38 : f32 to vector<8x1xf32>
    %133 = arith.addf %131, %132 : vector<8x1xf32>
    %134 = math.rsqrt %133 : vector<8x1xf32>
    %135 = vector.broadcast %125 : vector<8x1xf32> to vector<8x128xf32>
    %136 = arith.subf %118, %135 : vector<8x128xf32>
    %137 = vector.broadcast %134 : vector<8x1xf32> to vector<8x128xf32>
    %138 = arith.mulf %136, %137 : vector<8x128xf32>
    %139 = vector.broadcast %79 : vector<1x128xf32> to vector<8x128xf32>
    %140 = arith.mulf %138, %139 : vector<8x128xf32>
    %141 = vector.broadcast %80 : vector<1x128xf32> to vector<8x128xf32>
    %142 = arith.addf %140, %141 : vector<8x128xf32>
    %143 = arith.negf %142 : vector<8x128xf32>
    %144 = math.exp %143 : vector<8x128xf32>
    %cst_39 = arith.constant 1.000000e+00 : f32
    %145 = vector.broadcast %cst_39 : f32 to vector<8x128xf32>
    %146 = arith.addf %145, %144 : vector<8x128xf32>
    %147 = arith.divf %145, %146 : vector<8x128xf32>
    %148 = arith.mulf %142, %147 : vector<8x128xf32>
    %c0_40 = arith.constant 0 : index
    %c0_41 = arith.constant 0 : index
    %c0_42 = arith.constant 0 : index
    %149 = vector.load %arg6[%c0_40, %c0_41, %c0_42] : memref<3x128x128xbf16, #tpu.memory_space<vmem>>, vector<1x128x128xbf16>
    %150 = vector.shape_cast %149 : vector<1x128x128xbf16> to vector<128x128xbf16>
    %c0_43 = arith.constant 0 : index
    %c0_44 = arith.constant 0 : index
    %c0_45 = arith.constant 0 : index
    %151 = vector.load %arg7[%c0_43, %c0_44, %c0_45] : memref<3x8x128xf32, #tpu.memory_space<vmem>>, vector<1x8x128xf32>
    %152 = vector.shape_cast %151 : vector<1x8x128xf32> to vector<8x128xf32>
    %153 = vector.extract_strided_slice %152 {offsets = [0, 0], sizes = [1, 128], strides = [1, 1]} : vector<8x128xf32> to vector<1x128xf32>
    %154 = vector.extract_strided_slice %152 {offsets = [1, 0], sizes = [1, 128], strides = [1, 1]} : vector<8x128xf32> to vector<1x128xf32>
    %155 = vector.extract_strided_slice %152 {offsets = [2, 0], sizes = [1, 128], strides = [1, 1]} : vector<8x128xf32> to vector<1x128xf32>
    %156 = arith.truncf %114 : vector<8x128xf32> to vector<8x128xbf16>
    %cst_46 = arith.constant dense<0.000000e+00> : vector<8x128xf32>
    %157 = tpu.matmul %156, %150, %cst_46 {dimension_numbers = #tpu.dot_dimension_numbers<[1], [0], [0], [1], [0, 0, 1, 1], [], []>} : vector<8x128xbf16>, vector<128x128xbf16>, vector<8x128xf32> -> vector<8x128xf32>
    %158 = vector.broadcast %153 : vector<1x128xf32> to vector<8x128xf32>
    %159 = arith.addf %157, %158 : vector<8x128xf32>
    %cst_47 = arith.constant dense<0.000000e+00> : vector<8xf32>
    %160 = vector.multi_reduction <add>, %159, %cst_47 [1] : vector<8x128xf32> to vector<8xf32>
    %161 = vector.shape_cast %160 : vector<8xf32> to vector<8x1xf32>
    %162 = arith.mulf %159, %159 : vector<8x128xf32>
    %cst_48 = arith.constant dense<0.000000e+00> : vector<8xf32>
    %163 = vector.multi_reduction <add>, %162, %cst_48 [1] : vector<8x128xf32> to vector<8xf32>
    %164 = vector.shape_cast %163 : vector<8xf32> to vector<8x1xf32>
    %cst_49 = arith.constant 6.400000e+01 : f32
    %165 = vector.broadcast %cst_49 : f32 to vector<8x1xf32>
    %166 = arith.divf %161, %165 : vector<8x1xf32>
    %cst_50 = arith.constant 6.400000e+01 : f32
    %167 = vector.broadcast %cst_50 : f32 to vector<8x1xf32>
    %168 = arith.divf %164, %167 : vector<8x1xf32>
    %169 = arith.mulf %166, %166 : vector<8x1xf32>
    %170 = arith.subf %168, %169 : vector<8x1xf32>
    %cst_51 = arith.constant 0.000000e+00 : f32
    %171 = vector.broadcast %cst_51 : f32 to vector<8x1xf32>
    %172 = arith.maximumf %170, %171 : vector<8x1xf32>
    %cst_52 = arith.constant 9.99999974E-6 : f32
    %173 = vector.broadcast %cst_52 : f32 to vector<8x1xf32>
    %174 = arith.addf %172, %173 : vector<8x1xf32>
    %175 = math.rsqrt %174 : vector<8x1xf32>
    %176 = vector.broadcast %166 : vector<8x1xf32> to vector<8x128xf32>
    %177 = arith.subf %159, %176 : vector<8x128xf32>
    %178 = vector.broadcast %175 : vector<8x1xf32> to vector<8x128xf32>
    %179 = arith.mulf %177, %178 : vector<8x128xf32>
    %180 = vector.broadcast %154 : vector<1x128xf32> to vector<8x128xf32>
    %181 = arith.mulf %179, %180 : vector<8x128xf32>
    %182 = vector.broadcast %155 : vector<1x128xf32> to vector<8x128xf32>
    %183 = arith.addf %181, %182 : vector<8x128xf32>
    %184 = arith.negf %183 : vector<8x128xf32>
    %185 = math.exp %184 : vector<8x128xf32>
    %cst_53 = arith.constant 1.000000e+00 : f32
    %186 = vector.broadcast %cst_53 : f32 to vector<8x128xf32>
    %187 = arith.addf %186, %185 : vector<8x128xf32>
    %188 = arith.divf %186, %187 : vector<8x128xf32>
    %189 = arith.mulf %183, %188 : vector<8x128xf32>
    %190 = arith.truncf %148 : vector<8x128xf32> to vector<8x128xbf16>
    %cst_54 = arith.constant dense<0.000000e+00> : vector<8x128xf32>
    %191 = tpu.matmul %190, %150, %cst_54 {dimension_numbers = #tpu.dot_dimension_numbers<[1], [0], [0], [1], [0, 0, 1, 1], [], []>} : vector<8x128xbf16>, vector<128x128xbf16>, vector<8x128xf32> -> vector<8x128xf32>
    %192 = vector.broadcast %153 : vector<1x128xf32> to vector<8x128xf32>
    %193 = arith.addf %191, %192 : vector<8x128xf32>
    %cst_55 = arith.constant dense<0.000000e+00> : vector<8xf32>
    %194 = vector.multi_reduction <add>, %193, %cst_55 [1] : vector<8x128xf32> to vector<8xf32>
    %195 = vector.shape_cast %194 : vector<8xf32> to vector<8x1xf32>
    %196 = arith.mulf %193, %193 : vector<8x128xf32>
    %cst_56 = arith.constant dense<0.000000e+00> : vector<8xf32>
    %197 = vector.multi_reduction <add>, %196, %cst_56 [1] : vector<8x128xf32> to vector<8xf32>
    %198 = vector.shape_cast %197 : vector<8xf32> to vector<8x1xf32>
    %cst_57 = arith.constant 6.400000e+01 : f32
    %199 = vector.broadcast %cst_57 : f32 to vector<8x1xf32>
    %200 = arith.divf %195, %199 : vector<8x1xf32>
    %cst_58 = arith.constant 6.400000e+01 : f32
    %201 = vector.broadcast %cst_58 : f32 to vector<8x1xf32>
    %202 = arith.divf %198, %201 : vector<8x1xf32>
    %203 = arith.mulf %200, %200 : vector<8x1xf32>
    %204 = arith.subf %202, %203 : vector<8x1xf32>
    %cst_59 = arith.constant 0.000000e+00 : f32
    %205 = vector.broadcast %cst_59 : f32 to vector<8x1xf32>
    %206 = arith.maximumf %204, %205 : vector<8x1xf32>
    %cst_60 = arith.constant 9.99999974E-6 : f32
    %207 = vector.broadcast %cst_60 : f32 to vector<8x1xf32>
    %208 = arith.addf %206, %207 : vector<8x1xf32>
    %209 = math.rsqrt %208 : vector<8x1xf32>
    %210 = vector.broadcast %200 : vector<8x1xf32> to vector<8x128xf32>
    %211 = arith.subf %193, %210 : vector<8x128xf32>
    %212 = vector.broadcast %209 : vector<8x1xf32> to vector<8x128xf32>
    %213 = arith.mulf %211, %212 : vector<8x128xf32>
    %214 = vector.broadcast %154 : vector<1x128xf32> to vector<8x128xf32>
    %215 = arith.mulf %213, %214 : vector<8x128xf32>
    %216 = vector.broadcast %155 : vector<1x128xf32> to vector<8x128xf32>
    %217 = arith.addf %215, %216 : vector<8x128xf32>
    %218 = arith.negf %217 : vector<8x128xf32>
    %219 = math.exp %218 : vector<8x128xf32>
    %cst_61 = arith.constant 1.000000e+00 : f32
    %220 = vector.broadcast %cst_61 : f32 to vector<8x128xf32>
    %221 = arith.addf %220, %219 : vector<8x128xf32>
    %222 = arith.divf %220, %221 : vector<8x128xf32>
    %223 = arith.mulf %217, %222 : vector<8x128xf32>
    %c1 = arith.constant 1 : index
    %c0_62 = arith.constant 0 : index
    %c0_63 = arith.constant 0 : index
    %224 = vector.load %arg6[%c1, %c0_62, %c0_63] : memref<3x128x128xbf16, #tpu.memory_space<vmem>>, vector<1x128x128xbf16>
    %225 = vector.shape_cast %224 : vector<1x128x128xbf16> to vector<128x128xbf16>
    %c1_64 = arith.constant 1 : index
    %c0_65 = arith.constant 0 : index
    %c0_66 = arith.constant 0 : index
    %226 = vector.load %arg7[%c1_64, %c0_65, %c0_66] : memref<3x8x128xf32, #tpu.memory_space<vmem>>, vector<1x8x128xf32>
    %227 = vector.shape_cast %226 : vector<1x8x128xf32> to vector<8x128xf32>
    %228 = vector.extract_strided_slice %227 {offsets = [0, 0], sizes = [1, 128], strides = [1, 1]} : vector<8x128xf32> to vector<1x128xf32>
    %229 = vector.extract_strided_slice %227 {offsets = [1, 0], sizes = [1, 128], strides = [1, 1]} : vector<8x128xf32> to vector<1x128xf32>
    %230 = vector.extract_strided_slice %227 {offsets = [2, 0], sizes = [1, 128], strides = [1, 1]} : vector<8x128xf32> to vector<1x128xf32>
    %231 = arith.truncf %189 : vector<8x128xf32> to vector<8x128xbf16>
    %cst_67 = arith.constant dense<0.000000e+00> : vector<8x128xf32>
    %232 = tpu.matmul %231, %225, %cst_67 {dimension_numbers = #tpu.dot_dimension_numbers<[1], [0], [0], [1], [0, 0, 1, 1], [], []>} : vector<8x128xbf16>, vector<128x128xbf16>, vector<8x128xf32> -> vector<8x128xf32>
    %233 = vector.broadcast %228 : vector<1x128xf32> to vector<8x128xf32>
    %234 = arith.addf %232, %233 : vector<8x128xf32>
    %cst_68 = arith.constant dense<0.000000e+00> : vector<8xf32>
    %235 = vector.multi_reduction <add>, %234, %cst_68 [1] : vector<8x128xf32> to vector<8xf32>
    %236 = vector.shape_cast %235 : vector<8xf32> to vector<8x1xf32>
    %237 = arith.mulf %234, %234 : vector<8x128xf32>
    %cst_69 = arith.constant dense<0.000000e+00> : vector<8xf32>
    %238 = vector.multi_reduction <add>, %237, %cst_69 [1] : vector<8x128xf32> to vector<8xf32>
    %239 = vector.shape_cast %238 : vector<8xf32> to vector<8x1xf32>
    %cst_70 = arith.constant 6.400000e+01 : f32
    %240 = vector.broadcast %cst_70 : f32 to vector<8x1xf32>
    %241 = arith.divf %236, %240 : vector<8x1xf32>
    %cst_71 = arith.constant 6.400000e+01 : f32
    %242 = vector.broadcast %cst_71 : f32 to vector<8x1xf32>
    %243 = arith.divf %239, %242 : vector<8x1xf32>
    %244 = arith.mulf %241, %241 : vector<8x1xf32>
    %245 = arith.subf %243, %244 : vector<8x1xf32>
    %cst_72 = arith.constant 0.000000e+00 : f32
    %246 = vector.broadcast %cst_72 : f32 to vector<8x1xf32>
    %247 = arith.maximumf %245, %246 : vector<8x1xf32>
    %cst_73 = arith.constant 9.99999974E-6 : f32
    %248 = vector.broadcast %cst_73 : f32 to vector<8x1xf32>
    %249 = arith.addf %247, %248 : vector<8x1xf32>
    %250 = math.rsqrt %249 : vector<8x1xf32>
    %251 = vector.broadcast %241 : vector<8x1xf32> to vector<8x128xf32>
    %252 = arith.subf %234, %251 : vector<8x128xf32>
    %253 = vector.broadcast %250 : vector<8x1xf32> to vector<8x128xf32>
    %254 = arith.mulf %252, %253 : vector<8x128xf32>
    %255 = vector.broadcast %229 : vector<1x128xf32> to vector<8x128xf32>
    %256 = arith.mulf %254, %255 : vector<8x128xf32>
    %257 = vector.broadcast %230 : vector<1x128xf32> to vector<8x128xf32>
    %258 = arith.addf %256, %257 : vector<8x128xf32>
    %259 = arith.negf %258 : vector<8x128xf32>
    %260 = math.exp %259 : vector<8x128xf32>
    %cst_74 = arith.constant 1.000000e+00 : f32
    %261 = vector.broadcast %cst_74 : f32 to vector<8x128xf32>
    %262 = arith.addf %261, %260 : vector<8x128xf32>
    %263 = arith.divf %261, %262 : vector<8x128xf32>
    %264 = arith.mulf %258, %263 : vector<8x128xf32>
    %265 = arith.truncf %223 : vector<8x128xf32> to vector<8x128xbf16>
    %cst_75 = arith.constant dense<0.000000e+00> : vector<8x128xf32>
    %266 = tpu.matmul %265, %225, %cst_75 {dimension_numbers = #tpu.dot_dimension_numbers<[1], [0], [0], [1], [0, 0, 1, 1], [], []>} : vector<8x128xbf16>, vector<128x128xbf16>, vector<8x128xf32> -> vector<8x128xf32>
    %267 = vector.broadcast %228 : vector<1x128xf32> to vector<8x128xf32>
    %268 = arith.addf %266, %267 : vector<8x128xf32>
    %cst_76 = arith.constant dense<0.000000e+00> : vector<8xf32>
    %269 = vector.multi_reduction <add>, %268, %cst_76 [1] : vector<8x128xf32> to vector<8xf32>
    %270 = vector.shape_cast %269 : vector<8xf32> to vector<8x1xf32>
    %271 = arith.mulf %268, %268 : vector<8x128xf32>
    %cst_77 = arith.constant dense<0.000000e+00> : vector<8xf32>
    %272 = vector.multi_reduction <add>, %271, %cst_77 [1] : vector<8x128xf32> to vector<8xf32>
    %273 = vector.shape_cast %272 : vector<8xf32> to vector<8x1xf32>
    %cst_78 = arith.constant 6.400000e+01 : f32
    %274 = vector.broadcast %cst_78 : f32 to vector<8x1xf32>
    %275 = arith.divf %270, %274 : vector<8x1xf32>
    %cst_79 = arith.constant 6.400000e+01 : f32
    %276 = vector.broadcast %cst_79 : f32 to vector<8x1xf32>
    %277 = arith.divf %273, %276 : vector<8x1xf32>
    %278 = arith.mulf %275, %275 : vector<8x1xf32>
    %279 = arith.subf %277, %278 : vector<8x1xf32>
    %cst_80 = arith.constant 0.000000e+00 : f32
    %280 = vector.broadcast %cst_80 : f32 to vector<8x1xf32>
    %281 = arith.maximumf %279, %280 : vector<8x1xf32>
    %cst_81 = arith.constant 9.99999974E-6 : f32
    %282 = vector.broadcast %cst_81 : f32 to vector<8x1xf32>
    %283 = arith.addf %281, %282 : vector<8x1xf32>
    %284 = math.rsqrt %283 : vector<8x1xf32>
    %285 = vector.broadcast %275 : vector<8x1xf32> to vector<8x128xf32>
    %286 = arith.subf %268, %285 : vector<8x128xf32>
    %287 = vector.broadcast %284 : vector<8x1xf32> to vector<8x128xf32>
    %288 = arith.mulf %286, %287 : vector<8x128xf32>
    %289 = vector.broadcast %229 : vector<1x128xf32> to vector<8x128xf32>
    %290 = arith.mulf %288, %289 : vector<8x128xf32>
    %291 = vector.broadcast %230 : vector<1x128xf32> to vector<8x128xf32>
    %292 = arith.addf %290, %291 : vector<8x128xf32>
    %293 = arith.negf %292 : vector<8x128xf32>
    %294 = math.exp %293 : vector<8x128xf32>
    %cst_82 = arith.constant 1.000000e+00 : f32
    %295 = vector.broadcast %cst_82 : f32 to vector<8x128xf32>
    %296 = arith.addf %295, %294 : vector<8x128xf32>
    %297 = arith.divf %295, %296 : vector<8x128xf32>
    %298 = arith.mulf %292, %297 : vector<8x128xf32>
    %c2 = arith.constant 2 : index
    %c0_83 = arith.constant 0 : index
    %c0_84 = arith.constant 0 : index
    %299 = vector.load %arg6[%c2, %c0_83, %c0_84] : memref<3x128x128xbf16, #tpu.memory_space<vmem>>, vector<1x128x128xbf16>
    %300 = vector.shape_cast %299 : vector<1x128x128xbf16> to vector<128x128xbf16>
    %c2_85 = arith.constant 2 : index
    %c0_86 = arith.constant 0 : index
    %c0_87 = arith.constant 0 : index
    %301 = vector.load %arg7[%c2_85, %c0_86, %c0_87] : memref<3x8x128xf32, #tpu.memory_space<vmem>>, vector<1x8x128xf32>
    %302 = vector.shape_cast %301 : vector<1x8x128xf32> to vector<8x128xf32>
    %303 = vector.extract_strided_slice %302 {offsets = [0, 0], sizes = [1, 128], strides = [1, 1]} : vector<8x128xf32> to vector<1x128xf32>
    %304 = vector.extract_strided_slice %302 {offsets = [1, 0], sizes = [1, 128], strides = [1, 1]} : vector<8x128xf32> to vector<1x128xf32>
    %305 = vector.extract_strided_slice %302 {offsets = [2, 0], sizes = [1, 128], strides = [1, 1]} : vector<8x128xf32> to vector<1x128xf32>
    %306 = arith.truncf %264 : vector<8x128xf32> to vector<8x128xbf16>
    %cst_88 = arith.constant dense<0.000000e+00> : vector<8x128xf32>
    %307 = tpu.matmul %306, %300, %cst_88 {dimension_numbers = #tpu.dot_dimension_numbers<[1], [0], [0], [1], [0, 0, 1, 1], [], []>} : vector<8x128xbf16>, vector<128x128xbf16>, vector<8x128xf32> -> vector<8x128xf32>
    %308 = vector.broadcast %303 : vector<1x128xf32> to vector<8x128xf32>
    %309 = arith.addf %307, %308 : vector<8x128xf32>
    %cst_89 = arith.constant dense<0.000000e+00> : vector<8xf32>
    %310 = vector.multi_reduction <add>, %309, %cst_89 [1] : vector<8x128xf32> to vector<8xf32>
    %311 = vector.shape_cast %310 : vector<8xf32> to vector<8x1xf32>
    %312 = arith.mulf %309, %309 : vector<8x128xf32>
    %cst_90 = arith.constant dense<0.000000e+00> : vector<8xf32>
    %313 = vector.multi_reduction <add>, %312, %cst_90 [1] : vector<8x128xf32> to vector<8xf32>
    %314 = vector.shape_cast %313 : vector<8xf32> to vector<8x1xf32>
    %cst_91 = arith.constant 6.400000e+01 : f32
    %315 = vector.broadcast %cst_91 : f32 to vector<8x1xf32>
    %316 = arith.divf %311, %315 : vector<8x1xf32>
    %cst_92 = arith.constant 6.400000e+01 : f32
    %317 = vector.broadcast %cst_92 : f32 to vector<8x1xf32>
    %318 = arith.divf %314, %317 : vector<8x1xf32>
    %319 = arith.mulf %316, %316 : vector<8x1xf32>
    %320 = arith.subf %318, %319 : vector<8x1xf32>
    %cst_93 = arith.constant 0.000000e+00 : f32
    %321 = vector.broadcast %cst_93 : f32 to vector<8x1xf32>
    %322 = arith.maximumf %320, %321 : vector<8x1xf32>
    %cst_94 = arith.constant 9.99999974E-6 : f32
    %323 = vector.broadcast %cst_94 : f32 to vector<8x1xf32>
    %324 = arith.addf %322, %323 : vector<8x1xf32>
    %325 = math.rsqrt %324 : vector<8x1xf32>
    %326 = vector.broadcast %316 : vector<8x1xf32> to vector<8x128xf32>
    %327 = arith.subf %309, %326 : vector<8x128xf32>
    %328 = vector.broadcast %325 : vector<8x1xf32> to vector<8x128xf32>
    %329 = arith.mulf %327, %328 : vector<8x128xf32>
    %330 = vector.broadcast %304 : vector<1x128xf32> to vector<8x128xf32>
    %331 = arith.mulf %329, %330 : vector<8x128xf32>
    %332 = vector.broadcast %305 : vector<1x128xf32> to vector<8x128xf32>
    %333 = arith.addf %331, %332 : vector<8x128xf32>
    %334 = arith.negf %333 : vector<8x128xf32>
    %335 = math.exp %334 : vector<8x128xf32>
    %cst_95 = arith.constant 1.000000e+00 : f32
    %336 = vector.broadcast %cst_95 : f32 to vector<8x128xf32>
    %337 = arith.addf %336, %335 : vector<8x128xf32>
    %338 = arith.divf %336, %337 : vector<8x128xf32>
    %339 = arith.mulf %333, %338 : vector<8x128xf32>
    %340 = arith.truncf %298 : vector<8x128xf32> to vector<8x128xbf16>
    %cst_96 = arith.constant dense<0.000000e+00> : vector<8x128xf32>
    %341 = tpu.matmul %340, %300, %cst_96 {dimension_numbers = #tpu.dot_dimension_numbers<[1], [0], [0], [1], [0, 0, 1, 1], [], []>} : vector<8x128xbf16>, vector<128x128xbf16>, vector<8x128xf32> -> vector<8x128xf32>
    %342 = vector.broadcast %303 : vector<1x128xf32> to vector<8x128xf32>
    %343 = arith.addf %341, %342 : vector<8x128xf32>
    %cst_97 = arith.constant dense<0.000000e+00> : vector<8xf32>
    %344 = vector.multi_reduction <add>, %343, %cst_97 [1] : vector<8x128xf32> to vector<8xf32>
    %345 = vector.shape_cast %344 : vector<8xf32> to vector<8x1xf32>
    %346 = arith.mulf %343, %343 : vector<8x128xf32>
    %cst_98 = arith.constant dense<0.000000e+00> : vector<8xf32>
    %347 = vector.multi_reduction <add>, %346, %cst_98 [1] : vector<8x128xf32> to vector<8xf32>
    %348 = vector.shape_cast %347 : vector<8xf32> to vector<8x1xf32>
    %cst_99 = arith.constant 6.400000e+01 : f32
    %349 = vector.broadcast %cst_99 : f32 to vector<8x1xf32>
    %350 = arith.divf %345, %349 : vector<8x1xf32>
    %cst_100 = arith.constant 6.400000e+01 : f32
    %351 = vector.broadcast %cst_100 : f32 to vector<8x1xf32>
    %352 = arith.divf %348, %351 : vector<8x1xf32>
    %353 = arith.mulf %350, %350 : vector<8x1xf32>
    %354 = arith.subf %352, %353 : vector<8x1xf32>
    %cst_101 = arith.constant 0.000000e+00 : f32
    %355 = vector.broadcast %cst_101 : f32 to vector<8x1xf32>
    %356 = arith.maximumf %354, %355 : vector<8x1xf32>
    %cst_102 = arith.constant 9.99999974E-6 : f32
    %357 = vector.broadcast %cst_102 : f32 to vector<8x1xf32>
    %358 = arith.addf %356, %357 : vector<8x1xf32>
    %359 = math.rsqrt %358 : vector<8x1xf32>
    %360 = vector.broadcast %350 : vector<8x1xf32> to vector<8x128xf32>
    %361 = arith.subf %343, %360 : vector<8x128xf32>
    %362 = vector.broadcast %359 : vector<8x1xf32> to vector<8x128xf32>
    %363 = arith.mulf %361, %362 : vector<8x128xf32>
    %364 = vector.broadcast %304 : vector<1x128xf32> to vector<8x128xf32>
    %365 = arith.mulf %363, %364 : vector<8x128xf32>
    %366 = vector.broadcast %305 : vector<1x128xf32> to vector<8x128xf32>
    %367 = arith.addf %365, %366 : vector<8x128xf32>
    %368 = arith.negf %367 : vector<8x128xf32>
    %369 = math.exp %368 : vector<8x128xf32>
    %cst_103 = arith.constant 1.000000e+00 : f32
    %370 = vector.broadcast %cst_103 : f32 to vector<8x128xf32>
    %371 = arith.addf %370, %369 : vector<8x128xf32>
    %372 = arith.divf %370, %371 : vector<8x128xf32>
    %373 = arith.mulf %367, %372 : vector<8x128xf32>
    %c0_104 = arith.constant 0 : index
    %c0_105 = arith.constant 0 : index
    %374 = vector.load %arg8[%c0_104, %c0_105] : memref<128x128xbf16, #tpu.memory_space<vmem>>, vector<128x128xbf16>
    %c0_106 = arith.constant 0 : index
    %c0_107 = arith.constant 0 : index
    %375 = vector.load %arg9[%c0_106, %c0_107] : memref<8x128xf32, #tpu.memory_space<vmem>>, vector<1x128xf32>
    %376 = arith.truncf %339 : vector<8x128xf32> to vector<8x128xbf16>
    %cst_108 = arith.constant dense<0.000000e+00> : vector<8x128xf32>
    %377 = tpu.matmul %376, %374, %cst_108 {dimension_numbers = #tpu.dot_dimension_numbers<[1], [0], [0], [1], [0, 0, 1, 1], [], []>} : vector<8x128xbf16>, vector<128x128xbf16>, vector<8x128xf32> -> vector<8x128xf32>
    %378 = vector.broadcast %375 : vector<1x128xf32> to vector<8x128xf32>
    %379 = arith.addf %377, %378 : vector<8x128xf32>
    %380 = math.tanh %379 : vector<8x128xf32>
    %c0_109 = arith.constant 0 : index
    %c0_110 = arith.constant 0 : index
    %381 = vector.load %arg10[%c0_109, %c0_110] : memref<16x128xf32, #tpu.memory_space<vmem>>, vector<8x128xf32>
    tpu.vector_store %arg10[%c0_109, %c0_110], %380 {strides = array<i32>} : memref<16x128xf32, #tpu.memory_space<vmem>>, vector<8x128xf32>,
    %382 = arith.truncf %373 : vector<8x128xf32> to vector<8x128xbf16>
    %cst_111 = arith.constant dense<0.000000e+00> : vector<8x128xf32>
    %383 = tpu.matmul %382, %374, %cst_111 {dimension_numbers = #tpu.dot_dimension_numbers<[1], [0], [0], [1], [0, 0, 1, 1], [], []>} : vector<8x128xbf16>, vector<128x128xbf16>, vector<8x128xf32> -> vector<8x128xf32>
    %384 = vector.broadcast %375 : vector<1x128xf32> to vector<8x128xf32>
    %385 = arith.addf %383, %384 : vector<8x128xf32>
    %386 = math.tanh %385 : vector<8x128xf32>
    %c8 = arith.constant 8 : index
    %c0_112 = arith.constant 0 : index
    %387 = vector.load %arg10[%c8, %c0_112] : memref<16x128xf32, #tpu.memory_space<vmem>>, vector<8x128xf32>
    tpu.vector_store %arg10[%c8, %c0_112], %386 {strides = array<i32>} : memref<16x128xf32, #tpu.memory_space<vmem>>, vector<8x128xf32>,
    return
  }
  func.func @transform_0(%arg0: i32) -> (i32, i32) {
    %c0_i32 = arith.constant 0 : i32
    %c0_i32_0 = arith.constant 0 : i32
    return %arg0, %c0_i32 : i32, i32
  }
  func.func @transform_1(%arg0: i32) -> (i32, i32) {
    %c0_i32 = arith.constant 0 : i32
    %c0_i32_0 = arith.constant 0 : i32
    %c0_i32_1 = arith.constant 0 : i32
    return %c0_i32, %c0_i32_0 : i32, i32
  }
  func.func @transform_2(%arg0: i32) -> (i32, i32) {
    %c0_i32 = arith.constant 0 : i32
    %c0_i32_0 = arith.constant 0 : i32
    %c0_i32_1 = arith.constant 0 : i32
    return %c0_i32, %c0_i32_0 : i32, i32
  }
  func.func @transform_3(%arg0: i32) -> (i32, i32) {
    %c0_i32 = arith.constant 0 : i32
    %c0_i32_0 = arith.constant 0 : i32
    %c0_i32_1 = arith.constant 0 : i32
    return %c0_i32, %c0_i32_0 : i32, i32
  }
  func.func @transform_4(%arg0: i32) -> (i32, i32) {
    %c0_i32 = arith.constant 0 : i32
    %c0_i32_0 = arith.constant 0 : i32
    %c0_i32_1 = arith.constant 0 : i32
    return %c0_i32, %c0_i32_0 : i32, i32
  }
  func.func @transform_5(%arg0: i32) -> (i32, i32, i32) {
    %c0_i32 = arith.constant 0 : i32
    %c0_i32_0 = arith.constant 0 : i32
    %c0_i32_1 = arith.constant 0 : i32
    %c0_i32_2 = arith.constant 0 : i32
    return %c0_i32, %c0_i32_0, %c0_i32_1 : i32, i32, i32
  }
  func.func @transform_6(%arg0: i32) -> (i32, i32, i32) {
    %c0_i32 = arith.constant 0 : i32
    %c0_i32_0 = arith.constant 0 : i32
    %c0_i32_1 = arith.constant 0 : i32
    %c0_i32_2 = arith.constant 0 : i32
    return %c0_i32, %c0_i32_0, %c0_i32_1 : i32, i32, i32
  }
  func.func @transform_7(%arg0: i32) -> (i32, i32) {
    %c0_i32 = arith.constant 0 : i32
    %c0_i32_0 = arith.constant 0 : i32
    %c0_i32_1 = arith.constant 0 : i32
    return %c0_i32, %c0_i32_0 : i32, i32
  }
  func.func @transform_8(%arg0: i32) -> (i32, i32) {
    %c0_i32 = arith.constant 0 : i32
    %c0_i32_0 = arith.constant 0 : i32
    %c0_i32_1 = arith.constant 0 : i32
    return %c0_i32, %c0_i32_0 : i32, i32
  }
  func.func @transform_9(%arg0: i32) -> (i32, i32) {
    %c0_i32 = arith.constant 0 : i32
    %c0_i32_0 = arith.constant 0 : i32
    return %arg0, %c0_i32 : i32, i32
  }
}

</mosaic_0001>

<bundles_post_ra>
// kernel: tpu_custom_call.1
= control target key start
LH: loop header
LB: loop body
LE: loop exit
PB: predicated region body
PF: predicated region fallthrough
CT: control target
= control target key end

     0   :  { %s3233_s0 = inlined_call_operand.hbm [shape: f32[32,32], index: 0, kind: input, shape index: {}]   ;;  %s3234_s1 = inlined_call_operand.hbm [shape: bf16[32,128], index: 1, kind: input, shape index: {}]   ;;  %s3235_s2 = inlined_call_operand.hbm [shape: f32[8,128], index: 2, kind: input, shape index: {}]   ;;  %s3236_s3 = inlined_call_operand.hbm [shape: bf16[128,128], index: 3, kind: input, shape index: {}]   ;;  %s3237_s4 = inlined_call_operand.hbm [shape: f32[8,128], index: 4, kind: input, shape index: {}]   ;;  %s3238_s5 = inlined_call_operand.hbm [shape: bf16[3,128,128], index: 5, kind: input, shape index: {}]   ;;  %s3239_s6 = inlined_call_operand.hbm [shape: f32[3,8,128], index: 6, kind: input, shape index: {}]   ;;  %s3240_s7 = inlined_call_operand.hbm [shape: bf16[128,128], index: 7, kind: input, shape index: {}]   ;;  %s3241_s8 = inlined_call_operand.vmem [shape: f32[8,128], index: 8, kind: input, shape index: {}]   ;;  %s3242_s9 = inlined_call_operand.hbm [shape: f32[32,128], index: 9, kind: output, shape index: {}]  }
   0x1   :  { %3249 = sst [smem:[#allocation23_spill]] %s3234_s1 }
   0x2   :  { %3250 = sst [smem:[#allocation24_spill]] %s3235_s2 }
   0x3   :  { %3251 = sst [smem:[#allocation25_spill]] %s3236_s3 }
   0x4   :  { %14 = vsyncpa [#allocation3], 0 }
   0x5   :  { %16 = vsyncpa [#allocation3 + $0x1], 0 }
   0x6   :  { %17 = vsyncpa [#allocation6], 0 }
   0x7   :  { %18 = vsyncpa [#allocation9], 0 }
   0x8   :  { %19 = vsyncpa [#allocation12], 0 }
   0x9   :  { %20 = vsyncpa [#allocation15], 0 }
   0xa   :  { %21 = vsyncpa [#allocation4], 0 }
   0xb   :  { %23 = vsyncpa [#allocation4 + $0x1], 0  ;;  %s2740_s30 = smov 0   ;;  %s2742_s10 = smov 0  }
   0xc   :  { %s2744_s11 = smov 0   ;;  %s2746_s12 = smov 0  }
   0xd LB: > { %s2673_s13 = smov [#allocation5]   ;;  %s2761_s15 = sadd.s32 4294967295, %s2671_s12   ;;  %s2671_s12 = sphi %s2746_s12, %s3281_s12   ;;  %s2667_s11 = sphi %s2744_s11, %s3280_s11   ;;  %s2663_s10 = sphi %s2742_s10, %s3279_s10   ;;  %s2659_s30 = sphi %s2740_s30, %s3278_s30  }
   0xe   : > { %s266_s14 = sshll.u32 %s2673_s13, 4  ;;  %p1754_p0 = scmp.ge.s32.totalorder %s2671_s12, 1  ;;  %s267_s14 = int_to_ptr.vmem [resolvable:$true] %s266_s14 }
   0xf   : > { %p3243_p1 = scmp.eq.s32.totalorder %s2761_s15, 0  ;;  %p254_p2 = scmp.lt.s32.totalorder %s2671_s12, 3 }
  0x10   : > { %s2674_s17 = smov [#allocation8]   ;;  %s2675_s20 = smov [#allocation11]  }
  0x11   : > { %p2766_p3 = pnand %p1754_p0, %p254_p2  ;;  %s290_s18 = sshll.u32 %s2674_s17, 4  ;;  %s2779_s18 = int_to_ptr.vmem [resolvable:$true] %s290_s18 }
  0x12   : > { %s314_s21 = sshll.u32 %s2675_s20, 4  ;;  %s2392_s23 = scalar_lea.vmem %s267_s14, 256  ;;  %s2781_s21 = int_to_ptr.vmem [resolvable:$true] %s314_s21 }
  0x13   : > { %s3252_s16 = scalar_select %p2766_p3, 1, 0 }
  0x14   : > { %p2182_p5 = pneg %p2766_p3  ;;  %p2393_p8 = scmp.ne.s32.totalorder %s267_s14, %s2392_s23 }
  0x15   : > { %p2400_p11 = scmp.lt.s32.totalorder %s267_s14, %s267_s14  ;;  %p2401_p12 = scmp.lt.s32.totalorder %s2392_s23, %s2392_s23 }
  0x16   : > { %p2775_p6 = pnand %p2182_p5, %p3243_p1 }
  0x17   : > { %p2402_p13 = por %p2401_p12, %p2400_p11 }
  0x18   : > { %p2785_p7 = pneg %p2775_p6 }
  0x1a   : > { %p2395_p9 = pnand %p2393_p8, %p2785_p7 }
  0x1c   : > { %p2396_p10 = pneg %p2395_p9 }
  0x1e   : > { %p2403_p0 = pnand %p2402_p13, %p2396_p10 }
  0x20   : > { %2406 = shalt.err (!%p2403_p0)
}
  0x21   : > { %s2676_s24 = smov 64   ;;  %s2677_s25 = smov 4  }
  0x22   : > { %s3255_s1 = sld [smem:[#allocation23_spill]]  ;;  %s2418_s28 = scalar_lea.vmem %s2779_s18, 1024 }
  0x23   : > { %p2419_p2 = scmp.ne.s32.totalorder %s2779_s18, %s2418_s28  ;;  %p2426_p9 = scmp.lt.s32.totalorder %s2779_s18, %s2779_s18 }
  0x24   : > { %p2427_p10 = scmp.lt.s32.totalorder %s2418_s28, %s2418_s28 }
  0x25   : > { %p2421_p5 = pnand %p2419_p2, %p2785_p7 }
  0x26   : > { %p2428_p11 = por %p2427_p10, %p2426_p9 }
  0x27   : > { %p2422_p8 = pneg %p2421_p5 }
  0x28   : > { %2185 = dma.hbm_to_vmem [thread:$0]  (!%p2775_p6), %s3255_s1, 256, %s267_s14, [#allocation6], %s2676_s24, %s2676_s24, %s2677_s25  }
  0x29   : > { %p2429_p12 = pnand %p2428_p11, %p2422_p8 }
  0x2b   : > { %2432 = shalt.err (!%p2429_p12)
}
  0x2c   : > { %s3256_s3 = sld [smem:[#allocation25_spill]]  ;;  %s2444_s14 = scalar_lea.vmem %s2781_s21, 3072 }
  0x2d   : > { %p2445_p13 = scmp.ne.s32.totalorder %s2781_s21, %s2444_s14  ;;  %p2452_p5 = scmp.lt.s32.totalorder %s2781_s21, %s2781_s21 }
  0x2e   : > { %p2453_p8 = scmp.lt.s32.totalorder %s2444_s14, %s2444_s14 }
  0x2f   : > { %p2447_p0 = pnand %p2445_p13, %p2785_p7 }
  0x30   : > { %p2454_p9 = por %p2453_p8, %p2452_p5 }
  0x31   : > { %p2448_p2 = pneg %p2447_p0 }
  0x32   : > { %2191 = dma.hbm_to_vmem [thread:$0]  (!%p2775_p6), %s3256_s3, 1024, %s2779_s18, [#allocation9], %s2676_s24, %s2676_s24, %s2677_s25  }
  0x33   : > { %p2455_p10 = pnand %p2454_p9, %p2448_p2 }
  0x35   : > { %2458 = shalt.err (!%p2455_p10)
}
  0x36   : > { %2197 = dma.hbm_to_vmem [thread:$0]  (!%p2775_p6), %s3238_s5, 3072, %s2781_s21, [#allocation12], %s2676_s24, %s2676_s24, %s2677_s25  }
  0x37   : > { %s2678_s18 = smov [#allocation7]   ;;  %s2679_s26 = smov [#allocation10]  }
  0x38   : > { %s280_s23 = sshll.u32 %s2678_s18, 4  ;;  %s304_s27 = sshll.u32 %s2679_s26, 4  ;;  %s281_s23 = int_to_ptr.vmem [resolvable:$true] %s280_s23  ;;  %s305_s27 = int_to_ptr.vmem [resolvable:$true] %s304_s27 }
  0x39   : > { %s2470_s28 = scalar_lea.vmem %s281_s23, 128  ;;  %p2478_p0 = scmp.lt.s32.totalorder %s281_s23, %s281_s23 }
  0x3a   : > { %p2471_p11 = scmp.ne.s32.totalorder %s281_s23, %s2470_s28  ;;  %p2479_p2 = scmp.lt.s32.totalorder %s2470_s28, %s2470_s28 }
  0x3c   : > { %p2473_p12 = pnand %p2471_p11, %p2785_p7  ;;  %p2480_p5 = por %p2479_p2, %p2478_p0 }
  0x3e   : > { %p2474_p13 = pneg %p2473_p12 }
  0x40   : > { %p2481_p8 = pnand %p2480_p5, %p2474_p13 }
  0x42   : > { %2484 = shalt.err (!%p2481_p8)
}
  0x43   : > { %s3257_s2 = sld [smem:[#allocation24_spill]]  ;;  %s2496_s21 = scalar_lea.vmem %s305_s27, 128 }
  0x44   : > { %p2497_p9 = scmp.ne.s32.totalorder %s305_s27, %s2496_s21  ;;  %p2504_p11 = scmp.lt.s32.totalorder %s305_s27, %s305_s27 }
  0x45   : > { %p2505_p12 = scmp.lt.s32.totalorder %s2496_s21, %s2496_s21 }
  0x46   : > { %p2499_p10 = pnand %p2497_p9, %p2785_p7 }
  0x47   : > { %p2506_p1 = por %p2505_p12, %p2504_p11 }
  0x48   : > { %p2500_p4 = pneg %p2499_p10 }
  0x49   : > { %2188 = dma.hbm_to_vmem [thread:$0]  (!%p2775_p6), %s3257_s2, 128, %s281_s23, [#allocation6]  }
  0x4a   : > { %p2507_p3 = pnand %p2506_p1, %p2500_p4 }
  0x4c   : > { %2510 = shalt.err (!%p2507_p3)
}
  0x4d   : > { %2194 = dma.hbm_to_vmem [thread:$0]  (!%p2775_p6), %s3237_s4, 128, %s305_s27, [#allocation9]  }
  0x4e   : > { %s2680_s20 = smov [#allocation13]  }
  0x4f   : > { %s327_s18 = sshll.u32 %s2680_s20, 4  ;;  %s328_s18 = int_to_ptr.vmem [resolvable:$true] %s327_s18 }
  0x50   : > { %s2522_s23 = scalar_lea.vmem %s328_s18, 384  ;;  %p2530_p5 = scmp.lt.s32.totalorder %s328_s18, %s328_s18 }
  0x51   : > { %p2523_p13 = scmp.ne.s32.totalorder %s328_s18, %s2522_s23  ;;  %p2531_p8 = scmp.lt.s32.totalorder %s2522_s23, %s2522_s23 }
  0x53   : > { %p2525_p0 = pnand %p2523_p13, %p2785_p7  ;;  %p2532_p9 = por %p2531_p8, %p2530_p5 }
  0x55   : > { %p2526_p2 = pneg %p2525_p0 }
  0x57   : > { %p2533_p1 = pnand %p2532_p9, %p2526_p2 }
  0x59   : > { %2536 = shalt.err (!%p2533_p1)
}
  0x5a   : > { %s3245_s26 = smov 128   ;;  %s3246_s28 = smov 8  }
  0x5b   : > { %2200 = dma.hbm_to_vmem [thread:$0]  (!%p2775_p6), %s3239_s6, 384, %s328_s18, [#allocation12], %s3245_s26, %s3245_s26, %s3246_s28  }
  0x5c   : > { %s2683_s13 = smov [#allocation14]  }
  0x5d   : > { %s340_s21 = sshll.u32 %s2683_s13, 4  ;;  %s341_s21 = int_to_ptr.vmem [resolvable:$true] %s340_s21 }
  0x5e   : > { %s2548_s14 = scalar_lea.vmem %s341_s21, 1024  ;;  %p2556_p11 = scmp.lt.s32.totalorder %s341_s21, %s341_s21 }
  0x5f   : > { %p2549_p3 = scmp.ne.s32.totalorder %s341_s21, %s2548_s14  ;;  %p2557_p12 = scmp.lt.s32.totalorder %s2548_s14, %s2548_s14 }
  0x61   : > { %p2551_p4 = pnand %p2549_p3, %p2785_p7  ;;  %p2558_p13 = por %p2557_p12, %p2556_p11 }
  0x63   : > { %p2552_p10 = pneg %p2551_p4 }
  0x65   : > { %p2559_p0 = pnand %p2558_p13, %p2552_p10 }
  0x67   : > { %2562 = shalt.err (!%p2559_p0)
}
  0x68   : > { %2203 = dma.hbm_to_vmem [thread:$0]  (!%p2775_p6), %s3240_s7, 1024, %s341_s21, [#allocation15], %s2676_s24, %s2676_s24, %s2677_s25  }
  0x69   : > { %s1753_s19 = sadd.s32 4294967294, %s2671_s12   ;;  %s2865_s22 = sadd.s32 1, %s2671_s12  }
  0x6a   : > { %s36_s18 = sadd.s32 1, %s2667_s11  ;;  %s33_s23 = ssub.s32 %s2671_s12, %s2865_s22 }
  0x6b   : > { %p43_p7 = scmp.ne.s32.totalorder %s2667_s11, %s2663_s10  ;;  %p34_p2 = scmp.eq.s32.totalorder %s33_s23, 0 }
  0x6c   : > { %p44_p5 = scmp.eq.s32.totalorder %s2671_s12, 0  ;;  %p49_p8 = scmp.ne.s32.totalorder %s2663_s10, %s2659_s30 }
  0x6d   : > { %p241_p9 = scmp.eq.s32.totalorder %s2761_s15, 1  ;;  %p3258_p3 = scmp.eq.s32.totalorder %s2761_s15, 0 }
  0x6e   : > { %s2877_s27 = scalar_select %p34_p2, %s2667_s11, %s36_s18  }
  0x6f   : > { %p45_p1 = por %p44_p5, %p43_p7  ;;  %p2881_p4 = por %p3258_p3, %p49_p8 }
  0x70   : > { %p2885_p6 = por %p241_p9, %p43_p7  ;;  %p247_p10 = scmp.eq.s32.totalorder %s1753_s19, 1 }
  0x71   : > { %s3259_s29 = scalar_select %p2881_p4, 1, 0 }
  0x72   : > { %s3260_s24 = scalar_select %p2885_p6, 1, 0 }
  0x73   : > { %p2219_p11 = scmp.lt.s32.totalorder %s2671_s12, 2  ;;  %s357_s25 = sand.u32 1, %s2667_s11  }
  0x74   : > { %p2891_p12 = por %p247_p10, %p49_p8  ;;  %s1763_s21 = sshll.u32 %s357_s25, 4 }
  0x75   : > { %s1836_s14 = sshll.u32 %s2671_s12, 8  ;;  %s361_s23 = scalar_lea.vmem [#allocation2], %s1763_s21 }
  0x76   : > { %s3261_s13 = scalar_select %p2891_p12, 1, 0 }
  0x77   : > { %s2899_s18 = scalar_lea.hbm %s3233_s0, %s1836_s14  ;;  %s368_s26 = sshll.u32 %s361_s23, 4  ;;  %s2905_s26 = int_to_ptr.vmem [resolvable:$true] %s368_s26 }
  0x78   : > { %p2901_p13 = pnand %p2219_p11, %p45_p1  ;;  %s2907_s28 = scalar_lea.sflag [#allocation3], %s357_s25 }
  0x79   : > { %s2563_s1 = scalar_lea.hbm %s2899_s18, 256  ;;  %s2568_s21 = scalar_lea.hbm %s3233_s0, 512 }
  0x7a   : > { %p2564_p0 = scmp.ne.s32.totalorder %s2899_s18, %s2563_s1  ;;  %p2565_p7 = pneg %p2901_p13 }
  0x7b   : > { %p2569_p8 = scmp.lt.s32.totalorder %s2899_s18, %s3233_s0  ;;  %p2570_p9 = scmp.lt.s32.totalorder %s2568_s21, %s2563_s1 }
  0x7c   : > { %p2566_p2 = pnand %p2565_p7, %p2564_p0 }
  0x7d   : > { %p2571_p1 = por %p2570_p9, %p2569_p8 }
  0x7e   : > { %p2567_p5 = pneg %p2566_p2 }
  0x80   : > { %p2572_p3 = pnand %p2571_p1, %p2567_p5 }
  0x82   : > { %2575 = shalt.err (!%p2572_p3)
}
  0x83   : > { %s2576_s25 = scalar_lea.vmem %s2905_s26, 256  ;;  %s2684_s2 = smov [#allocation2]  }
  0x84   : > { %p2577_p10 = scmp.ne.s32.totalorder %s2905_s26, %s2576_s25  ;;  %s2581_s3 = sshll.u32 %s2684_s2, 4  ;;  %s2582_s3 = int_to_ptr.vmem [resolvable:$false] %s2581_s3 }
  0x85   : > { %s2583_s14 = scalar_lea.vmem %s2582_s3, 512  ;;  %p2584_p2 = scmp.lt.s32.totalorder %s2905_s26, %s2582_s3 }
  0x86   : > { %p2579_p11 = pnand %p2577_p10, %p2565_p7  ;;  %p2585_p12 = scmp.lt.s32.totalorder %s2583_s14, %s2576_s25 }
  0x88   : > { %p2580_p0 = pneg %p2579_p11  ;;  %p2586_p6 = por %p2585_p12, %p2584_p2 }
  0x8a   : > { %p2587_p4 = pnand %p2586_p6, %p2580_p0 }
  0x8c   : > { %2590 = shalt.err (!%p2587_p4)
}
  0x8d   : > { %s3263_s1 = smov 8   ;;  %s3264_s17 = smov 128  }
  0x8e   : > { %2207 = dma.hbm_to_vmem [thread:$0]  (!%p2901_p13), %s2899_s18, 256, %s2905_s26, %s2907_s28, %s3264_s17, %s3264_s17, %s3263_s1  }
  0x8f   : > { %p3265_p7 = scmp.ne.s32.totalorder %s3252_s16, 0 }
  0x90   : > { %s2934_s2 = sand.u32 (!%p3265_p7), 1, %s2663_s10   ;;  %p3266_p4 = scmp.ne.s32.totalorder (!%p3265_p7), %s3259_s29, 0 }
  0x91   : > { %380 = sbr.rel (%p3265_p7) target bundleno = 2404 (0x964), region = 56  ;;  %s1767_s3 = sshll.u32 (!%p3265_p7), %s2934_s2, 4 }
  0x92   : > { %s383_s21 = scalar_lea.sflag (!%p3265_p7), [#allocation3], %s2934_s2  ;;  %s386_s19 = scalar_lea.vmem (!%p3265_p7), [#allocation2], %s1767_s3 }
  0x96   : > { %2634 = dma.done.wait (%p3266_p4), %s383_s21, 256  }
  0x97   : > { %2636 = vsyncadd (%p3266_p4), %s383_s21, 4294967040  ;;  %p3267_p6 = scmp.eq.s32.totalorder %s2761_s15, 0 }
  0x99   : > { %2638 = dma.done.wait (%p3267_p6), [#allocation6], 384   ;;  %p3268_p12 = pmov %p3267_p6 }
  0x9a   : > { %p3269_p13 = pmov %p3267_p6 }
  0x9b   : > { %2640 = vsyncadd (%p3268_p12), [#allocation6], 4294966912 }
  0x9c   : > { %2642 = dma.done.wait (%p3269_p13), [#allocation9], 1152   ;;  %p3270_p5 = pmov %p3267_p6 }
  0x9e   : > { %2644 = vsyncadd (%p3270_p5), [#allocation9], 4294966144  ;;  %p3271_p8 = pmov %p3270_p5 }
  0x9f   : > { %p3272_p9 = pmov %p3270_p5 }
  0xa0   : > { %2646 = dma.done.wait (%p3271_p8), [#allocation12], 3456  }
  0xa1   : > { %2648 = vsyncadd (%p3272_p9), [#allocation12], 4294963840  ;;  %p3273_p1 = pmov %p3270_p5 }
  0xa3   : > { %2650 = dma.done.wait (%p3273_p1), [#allocation15], 1024   ;;  %p3274_p3 = pmov %p3273_p1 }
  0xa4   : > { %v2685_v0 = vmov 0.0   ;;  %vm2686_vm0 = vmmov 0   ;;  %v2275_v1 = vld [vmem:[#allocation5 + $0x8] sm:$0xff]   ;;  %v2276_v2 = vld [vmem:[#allocation5] sm:$0xff]   ;;  %vm476_vm1 = vcmask 261120   ;;  %v460_v7 = vlaneseq  ;;  %v2979_v10 = vld [vmem:[#allocation7] sm:$0xff] }
  0xa5   : > { %2652 = vsyncadd (%p3274_p3), [#allocation15], 4294966272  ;;  %1934 = vmatprep.subr.bf16.mxu0 %v2685_v0  ;;  %1942 = vmatprep.subr.bf16.mxu1 %v2685_v0  ;;  %v452_v3 = vld [vmem:[%s386_s19] sm:$0xff]  ;;  %v453_v4 = vld [vmem:[%s386_s19 + $0x8] sm:$0xff]  ;;  %s1837_s28 = sshll.u32 %s2761_s15, 8  ;;  %s448_s29 = scalar_lea.vmem [#allocation16], %s1767_s3 }
  0xa6   : > { %1938 = vmatprep.mubr.msk.bf16.mxu0 %vm2686_vm0, %v2685_v0  ;;  %1946 = vmatprep.mubr.msk.bf16.mxu1 %vm2686_vm0, %v2685_v0  ;;  %v459_v5 = vpack.c.bf16 %v452_v3, %v452_v3  ;;  %v552_v6 = vpack.c.bf16 %v453_v4, %v453_v4  ;;  %v2974_v8 = vshrl.u32 %v460_v7, 7  ;;  %v2277_v24 = vld [vmem:[#allocation8 + $0x38] sm:$0xff]   ;;  %v2278_v25 = vld [vmem:[#allocation8 + $0x30] sm:$0xff]   ;;  %v2279_v26 = vld [vmem:[#allocation8 + $0x28] sm:$0xff]   ;;  %s1613_s18 = sshll.u32 %s448_s29, 4  ;;  %s3188_s25 = scalar_lea.hbm %s3242_s9, %s1837_s28  ;;  %s3190_s18 = int_to_ptr.vmem [resolvable:$true] %s1613_s18 }
  0xa7   : > { %1935 = vmatpush3.bf16.msra.mxu0 %v2275_v1  ;;  %1943 = vmatpush3.bf16.msra.mxu1 %v2275_v1  ;;  %v2280_v27 = vld [vmem:[#allocation8 + $0x20] sm:$0xff]   ;;  %v2281_v28 = vld [vmem:[#allocation8 + $0x18] sm:$0xff]   ;;  %v2282_v29 = vld [vmem:[#allocation8 + $0x10] sm:$0xff]   ;;  %s1600_s14 = scalar_lea.sflag [#allocation4], %s2934_s2  ;;  %s2591_s1 = scalar_lea.vmem %s3190_s18, 256 }
  0xa8   : > { %1936 = vmatprep.subr.bf16.mxu0 %v2685_v0  ;;  %1944 = vmatprep.subr.bf16.mxu1 %v2685_v0  ;;  %v2977_v9 = vsub.s32 0, %v2974_v8  ;;  %v2283_v30 = vld [vmem:[#allocation8 + $0x8] sm:$0xff]   ;;  %v2284_v31 = vld [vmem:[#allocation8] sm:$0xff]   ;;  %v3010_v48 = vsub.s32 1, %v2974_v8  ;;  %v3013_v49 = vsub.s32 2, %v2974_v8  ;;  %p2592_p10 = scmp.ne.s32.totalorder %s3190_s18, %s2591_s1  ;;  %p3275_p11 = scmp.ne.s32.totalorder %s3260_s24, 0 }
  0xa9   : > { %s2687_s15 = smov [#allocation16]  }
  0xaa   : > { %v463_v11 = vrot.slane %v2979_v10, %v2977_v9  ;;  %v538_v50 = vrot.slane %v2979_v10, %v3010_v48  ;;  %v543_v53 = vrot.slane %v2979_v10, %v3013_v49  ;;  %p2593_p0 = pnand %p2592_p10, %p3275_p11  ;;  %s2595_s17 = sshll.u32 %s2687_s15, 4  ;;  %s2596_s17 = int_to_ptr.vmem [resolvable:$false] %s2595_s17 }
  0xab   : > { %1937 = vmatpush3.bf16.msra.mxu0 %v2276_v2  ;;  %1945 = vmatpush3.bf16.msra.mxu1 %v2276_v2  ;;  %s2597_s3 = scalar_lea.vmem %s2596_s17, 512  ;;  %p2598_p7 = scmp.lt.s32.totalorder %s3190_s18, %s2596_s17 }
  0xac   : > { %1950 = vmatprep.subr.bf16.mxu0 %v2685_v0  ;;  %1970 = vmatprep.subr.bf16.mxu1 %v2685_v0  ;;  %p2594_p2 = pneg %p2593_p0  ;;  %p2599_p4 = scmp.lt.s32.totalorder %s2597_s3, %s2591_s1 }
  0xae   : > { %1939 = vmatmul.mubr.msk.bf16.vlgmr.msra.gmra.mxu0 %vm476_vm1, %v459_v5  ;;  %1947 = vmatmul.mubr.msk.bf16.vlgmr.msra.gmra.mxu1 %vm476_vm1, %v552_v6  ;;  %p2600_p6 = por %p2599_p4, %p2598_p7 }
  0xaf   : > { %1966 = vmatprep.mubr.msk.bf16.mxu0 %vm2686_vm0, %v2685_v0  ;;  %1986 = vmatprep.mubr.msk.bf16.mxu1 %vm2686_vm0, %v2685_v0 }
  0xb0   : > { %1951 = vmatpush3.bf16.msra.mxu0 %v2277_v24  ;;  %1971 = vmatpush3.bf16.msra.mxu1 %v2277_v24  ;;  %p2601_p12 = pnand %p2600_p6, %p2594_p2 }
  0xb1   : > { %1952 = vmatprep.subr.bf16.mxu0 %v2685_v0  ;;  %1972 = vmatprep.subr.bf16.mxu1 %v2685_v0 }
  0xb4   : > { %1953 = vmatpush3.bf16.msra.mxu0 %v2278_v25  ;;  %1973 = vmatpush3.bf16.msra.mxu1 %v2278_v25 }
  0xb5   : > { %1954 = vmatprep.subr.bf16.mxu0 %v2685_v0  ;;  %1974 = vmatprep.subr.bf16.mxu1 %v2685_v0 }
  0xb8   : > { %1955 = vmatpush3.bf16.msra.mxu0 %v2279_v26  ;;  %1975 = vmatpush3.bf16.msra.mxu1 %v2279_v26  ;;  %v2285_v26 = vld [vmem:[#allocation11 + $0x38] sm:$0xff]  }
  0xb9   : > { %1956 = vmatprep.subr.bf16.mxu0 %v2685_v0  ;;  %1976 = vmatprep.subr.bf16.mxu1 %v2685_v0 }
  0xbc   : > { %1957 = vmatpush3.bf16.msra.mxu0 %v2280_v27  ;;  %1977 = vmatpush3.bf16.msra.mxu1 %v2280_v27  ;;  %v2286_v27 = vld [vmem:[#allocation11 + $0x30] sm:$0xff]  }
  0xbd   : > { %1958 = vmatprep.subr.bf16.mxu0 %v2685_v0  ;;  %1978 = vmatprep.subr.bf16.mxu1 %v2685_v0 }
  0xc0   : > { %1959 = vmatpush3.bf16.msra.mxu0 %v2281_v28  ;;  %1979 = vmatpush3.bf16.msra.mxu1 %v2281_v28  ;;  %v2287_v28 = vld [vmem:[#allocation11 + $0x28] sm:$0xff]  }
  0xc1   : > { %1960 = vmatprep.subr.bf16.mxu0 %v2685_v0  ;;  %1980 = vmatprep.subr.bf16.mxu1 %v2685_v0 }
  0xc4   : > { %1961 = vmatpush3.bf16.msra.mxu0 %v2282_v29  ;;  %1981 = vmatpush3.bf16.msra.mxu1 %v2282_v29  ;;  %v2288_v29 = vld [vmem:[#allocation11 + $0x20] sm:$0xff]  }
  0xc5   : > { %1962 = vmatprep.subr.bf16.mxu0 %v2685_v0  ;;  %1982 = vmatprep.subr.bf16.mxu1 %v2685_v0 }
  0xc8   : > { %1963 = vmatpush3.bf16.msra.mxu0 %v2283_v30  ;;  %1983 = vmatpush3.bf16.msra.mxu1 %v2283_v30  ;;  %v2289_v30 = vld [vmem:[#allocation11 + $0x18] sm:$0xff]  }
  0xc9   : > { %1964 = vmatprep.subr.bf16.mxu0 %v2685_v0  ;;  %1984 = vmatprep.subr.bf16.mxu1 %v2685_v0 }
  0xcc   : > { %1965 = vmatpush3.bf16.msra.mxu0 %v2284_v31  ;;  %1985 = vmatpush3.bf16.msra.mxu1 %v2284_v31  ;;  %v2290_v31 = vld [vmem:[#allocation11 + $0x10] sm:$0xff]  }
  0xcd   : > { %1990 = vmatprep.subr.bf16.mxu0 %v2685_v0  ;;  %2010 = vmatprep.subr.bf16.mxu1 %v2685_v0 }
 0x16e   : > { %v514_v12 = vpop.f32.mrf.mxu0  ;;  %v590_v13 = vpop.f32.mrf.mxu1 }
 0x16f   : > { %v2983_v14 = vadd.f32 %v514_v12, %v463_v11  ;;  %v2985_v15 = vadd.f32 %v590_v13, %v463_v11  ;;  %v3025_v12 = vld [vmem:[#allocation10] sm:$0xff] }
 0x170   : > { %v1940_v16 = vpop.f32.mrf.mxu0  ;;  %v1948_v17 = vpop.f32.mrf.mxu1  ;;  %v640_v13 = vrot.slane %v3025_v12, %v2977_v9 }
 0x171   : > { %520 = vadd.xlane.f32.xlu0 %v2983_v14  ;;  %v522_v18 = vmul.f32 %v2983_v14, %v2983_v14  ;;  %v598_v21 = vmul.f32 %v2985_v15, %v2985_v15 }
 0x172   : > { %v517_v19 = vpop.f32.mrf.mxu0  ;;  %v593_v20 = vpop.f32.mrf.mxu1 }
 0x173   : > { %523 = vadd.xlane.f32.xlu1 %v522_v18 }
 0x174   : > { %v1941_v22 = vpop.f32.mrf.mxu0  ;;  %v1949_v23 = vpop.f32.mrf.mxu1 }
 0x175   : > { %596 = vadd.xlane.f32.xlu0 %v2985_v15 }
 0x177   : > { %599 = vadd.xlane.f32.xlu1 %v598_v21 }
 0x1fa   : > { %v521_v32 = vpop.xlane.xlu0 %520 }
 0x1fb   : > { %v526_v33 = vmul.f32 0.020833334, %v521_v32  ;;  %v2291_v32 = vld [vmem:[#allocation11 + $0x8] sm:$0xff]  }
 0x1fc   : > { %v524_v34 = vpop.xlane.xlu1 %523 }
 0x1fd   : > { %v528_v35 = vmul.f32 %v526_v33, %v526_v33  ;;  %v527_v36 = vmul.f32 0.020833334, %v524_v34  ;;  %v533_v51 = vsub.f32 %v2983_v14, %v526_v33  ;;  %v2292_v33 = vld [vmem:[#allocation11] sm:$0xff]  }
 0x1fe   : > { %v597_v37 = vpop.xlane.xlu0 %596 }
 0x1ff   : > { %v529_v38 = vsub.f32 %v527_v36, %v528_v35  ;;  %v601_v39 = vmul.f32 0.020833334, %v597_v37 }
 0x200   : > { %v600_v40 = vpop.xlane.xlu1 %599 }
 0x201   : > { %v530_v41 = vmax.f32 %v529_v38, 0.0  ;;  %v603_v42 = vmul.f32 %v601_v39, %v601_v39  ;;  %v602_v43 = vmul.f32 0.020833334, %v600_v40  ;;  %v608_v55 = vsub.f32 %v2985_v15, %v601_v39 }
 0x203   : > { %v531_v44 = vadd.f32 1e-05, %v530_v41  ;;  %v604_v45 = vsub.f32 %v602_v43, %v603_v42 }
 0x205   : > { %2317 = vrsqrt.f32 %v531_v44  ;;  %v605_v46 = vmax.f32 %v604_v45, 0.0 }
 0x207   : > { %v606_v47 = vadd.f32 1e-05, %v605_v46 }
 0x209   : > { %2319 = vrsqrt.f32 %v606_v47 }
 0x212   : > { %v2318_v52 = vpop.eup %2317 }
 0x213   : > { %v534_v54 = vmul.f32 %v2318_v52, %v533_v51  ;;  %v747_v52 = vrot.slane %v3025_v12, %v3010_v48 }
 0x215   : > { %v539_v56 = vmul.f32 %v538_v50, %v534_v54 }
 0x216   : > { %v2320_v57 = vpop.eup %2319 }
 0x217   : > { %v544_v58 = vadd.f32 %v543_v53, %v539_v56  ;;  %v609_v59 = vmul.f32 %v2320_v57, %v608_v55  ;;  %v752_v55 = vrot.slane %v3025_v12, %v3013_v49 }
 0x219   : > { %v1779_v60 = vmul.f32 -1.442695, %v544_v58  ;;  %v610_v61 = vmul.f32 %v609_v59, %v538_v50 }
 0x21b   : > { %2321 = vpow2.f32 %v1779_v60  ;;  %v611_v62 = vadd.f32 %v610_v61, %v543_v53 }
 0x21d   : > { %v1781_v63 = vmul.f32 -1.442695, %v611_v62 }
 0x21f   : > { %2323 = vpow2.f32 %v1781_v63 }
 0x228   : > { %v2322_v1 = vpop.eup %2321 }
 0x229   : > { %v548_v2 = vadd.f32 1.0, %v2322_v1 }
 0x22b   : > { %2325 = vrcp.f32 %v548_v2 }
 0x22c   : > { %v2324_v3 = vpop.eup %2323 }
 0x22d   : > { %v615_v4 = vadd.f32 1.0, %v2324_v3 }
 0x22f   : > { %2327 = vrcp.f32 %v615_v4 }
 0x238   : > { %v2326_v5 = vpop.eup %2325 }
 0x239   : > { %v551_v6 = vmul.f32 %v2326_v5, %v544_v58 }
 0x23b   : > { %v636_v7 = vpack.c.bf16 %v551_v6, %v551_v6 }
 0x23c   : > { %v2328_v8 = vpop.eup %2327 }
 0x23d   : > { %1967 = vmatmul.mubr.bf16.vlgmr.msra.gmra.mxu0 %v636_v7  ;;  %v618_v10 = vmul.f32 %v2328_v8, %v611_v62 }
 0x23e   : > { %2006 = vmatprep.mubr.msk.bf16.mxu0 %vm2686_vm0, %v2685_v0  ;;  %1991 = vmatpush3.bf16.msra.mxu0 %v2285_v26 }
 0x23f   : > { %v761_v11 = vpack.c.bf16 %v618_v10, %v618_v10  ;;  %1992 = vmatprep.subr.bf16.mxu0 %v2685_v0 }
 0x241   : > { %1987 = vmatmul.mubr.bf16.vlgmr.msra.gmra.mxu1 %v761_v11 }
 0x242   : > { %2026 = vmatprep.mubr.msk.bf16.mxu1 %vm2686_vm0, %v2685_v0  ;;  %2011 = vmatpush3.bf16.msra.mxu1 %v2285_v26 }
 0x243   : > { %2012 = vmatprep.subr.bf16.mxu1 %v2685_v0  ;;  %1993 = vmatpush3.bf16.msra.mxu0 %v2286_v27 }
 0x244   : > { %1994 = vmatprep.subr.bf16.mxu0 %v2685_v0 }
 0x246   : > { %2013 = vmatpush3.bf16.msra.mxu1 %v2286_v27 }
 0x247   : > { %2014 = vmatprep.subr.bf16.mxu1 %v2685_v0  ;;  %1995 = vmatpush3.bf16.msra.mxu0 %v2287_v28 }
 0x248   : > { %1996 = vmatprep.subr.bf16.mxu0 %v2685_v0 }
 0x24a   : > { %2015 = vmatpush3.bf16.msra.mxu1 %v2287_v28  ;;  %v2293_v28 = vld [vmem:[#allocation11 + $0x78] sm:$0xff]  }
 0x24b   : > { %2016 = vmatprep.subr.bf16.mxu1 %v2685_v0  ;;  %1997 = vmatpush3.bf16.msra.mxu0 %v2288_v29 }
 0x24c   : > { %1998 = vmatprep.subr.bf16.mxu0 %v2685_v0 }
 0x24e   : > { %2017 = vmatpush3.bf16.msra.mxu1 %v2288_v29  ;;  %v2294_v29 = vld [vmem:[#allocation11 + $0x70] sm:$0xff]  }
 0x24f   : > { %2018 = vmatprep.subr.bf16.mxu1 %v2685_v0  ;;  %1999 = vmatpush3.bf16.msra.mxu0 %v2289_v30 }
 0x250   : > { %2000 = vmatprep.subr.bf16.mxu0 %v2685_v0 }
 0x252   : > { %2019 = vmatpush3.bf16.msra.mxu1 %v2289_v30  ;;  %v2295_v30 = vld [vmem:[#allocation11 + $0x68] sm:$0xff]  }
 0x253   : > { %2020 = vmatprep.subr.bf16.mxu1 %v2685_v0  ;;  %2001 = vmatpush3.bf16.msra.mxu0 %v2290_v31 }
 0x254   : > { %2002 = vmatprep.subr.bf16.mxu0 %v2685_v0 }
 0x256   : > { %2021 = vmatpush3.bf16.msra.mxu1 %v2290_v31  ;;  %v2296_v31 = vld [vmem:[#allocation11 + $0x60] sm:$0xff]  }
 0x257   : > { %2022 = vmatprep.subr.bf16.mxu1 %v2685_v0  ;;  %2003 = vmatpush3.bf16.msra.mxu0 %v2291_v32 }
 0x258   : > { %2004 = vmatprep.subr.bf16.mxu0 %v2685_v0 }
 0x25a   : > { %2023 = vmatpush3.bf16.msra.mxu1 %v2291_v32  ;;  %v2297_v32 = vld [vmem:[#allocation11 + $0x58] sm:$0xff]  }
 0x25b   : > { %2024 = vmatprep.subr.bf16.mxu1 %v2685_v0  ;;  %2005 = vmatpush3.bf16.msra.mxu0 %v2292_v33 }
 0x25c   : > { %2030 = vmatprep.subr.bf16.mxu0 %v2685_v0 }
 0x25e   : > { %2025 = vmatpush3.bf16.msra.mxu1 %v2292_v33  ;;  %v2298_v33 = vld [vmem:[#allocation11 + $0x50] sm:$0xff]  }
 0x25f   : > { %2050 = vmatprep.subr.bf16.mxu1 %v2685_v0 }
 0x2fd   : > { %v723_v14 = vpop.f32.mrf.mxu0 }
 0x2fe   : > { %v3029_v15 = vadd.f32 %v723_v14, %v640_v13  ;;  %v3065_v14 = vld [vmem:[#allocation13] sm:$0xff] }
 0x2ff   : > { %v1968_v16 = vpop.f32.mrf.mxu0 }
 0x300   : > { %729 = vadd.xlane.f32.xlu0 %v3029_v15  ;;  %v731_v20 = vmul.f32 %v3029_v15, %v3029_v15 }
 0x301   : > { %v726_v17 = vpop.f32.mrf.mxu0  ;;  %v796_v18 = vpop.f32.mrf.mxu1 }
 0x302   : > { %v3032_v19 = vadd.f32 %v796_v18, %v640_v13 }
 0x303   : > { %v1969_v21 = vpop.f32.mrf.mxu0  ;;  %v1988_v22 = vpop.f32.mrf.mxu1 }
 0x304   : > { %802 = vadd.xlane.f32.xlu1 %v3032_v19  ;;  %732 = vadd.xlane.f32.xlu0 %v731_v20  ;;  %v804_v24 = vmul.f32 %v3032_v19, %v3032_v19 }
 0x305   : > { %v799_v23 = vpop.f32.mrf.mxu1 }
 0x307   : > { %v1989_v25 = vpop.f32.mrf.mxu1 }
 0x308   : > { %805 = vadd.xlane.f32.xlu1 %v804_v24 }
 0x389   : > { %v730_v34 = vpop.xlane.xlu0 %729 }
 0x38a   : > { %v735_v35 = vmul.f32 0.015625, %v730_v34  ;;  %v2299_v34 = vld [vmem:[#allocation11 + $0x48] sm:$0xff]  }
 0x38c   : > { %v737_v38 = vmul.f32 %v735_v35, %v735_v35  ;;  %v742_v53 = vsub.f32 %v3029_v15, %v735_v35  ;;  %v846_v15 = vrot.slane %v3065_v14, %v2977_v9  ;;  %v2300_v35 = vld [vmem:[#allocation11 + $0x40] sm:$0xff]  }
 0x38d   : > { %v803_v36 = vpop.xlane.xlu1 %802  ;;  %v733_v37 = vpop.xlane.xlu0 %732 }
 0x38e   : > { %v807_v39 = vmul.f32 0.015625, %v803_v36  ;;  %v736_v40 = vmul.f32 0.015625, %v733_v37 }
 0x390   : > { %v738_v41 = vsub.f32 %v736_v40, %v737_v38  ;;  %v809_v43 = vmul.f32 %v807_v39, %v807_v39  ;;  %v814_v57 = vsub.f32 %v3032_v19, %v807_v39 }
 0x391   : > { %v806_v42 = vpop.xlane.xlu1 %805 }
 0x392   : > { %v739_v44 = vmax.f32 %v738_v41, 0.0  ;;  %v808_v45 = vmul.f32 0.015625, %v806_v42 }
 0x394   : > { %v740_v46 = vadd.f32 1e-05, %v739_v44  ;;  %v810_v47 = vsub.f32 %v808_v45, %v809_v43 }
 0x396   : > { %2329 = vrsqrt.f32 %v740_v46  ;;  %v811_v50 = vmax.f32 %v810_v47, 0.0 }
 0x398   : > { %v812_v51 = vadd.f32 1e-05, %v811_v50 }
 0x39a   : > { %2331 = vrsqrt.f32 %v812_v51 }
 0x3a3   : > { %v2330_v54 = vpop.eup %2329 }
 0x3a4   : > { %v743_v56 = vmul.f32 %v2330_v54, %v742_v53  ;;  %v952_v54 = vrot.slane %v3065_v14, %v3010_v48 }
 0x3a6   : > { %v748_v58 = vmul.f32 %v747_v52, %v743_v56 }
 0x3a7   : > { %v2332_v59 = vpop.eup %2331 }
 0x3a8   : > { %v753_v60 = vadd.f32 %v752_v55, %v748_v58  ;;  %v815_v61 = vmul.f32 %v2332_v59, %v814_v57  ;;  %v957_v57 = vrot.slane %v3065_v14, %v3013_v49 }
 0x3aa   : > { %v1790_v62 = vmul.f32 -1.442695, %v753_v60  ;;  %v816_v63 = vmul.f32 %v815_v61, %v747_v52 }
 0x3ac   : > { %2333 = vpow2.f32 %v1790_v62  ;;  %v817_v1 = vadd.f32 %v816_v63, %v752_v55 }
 0x3ae   : > { %v1791_v2 = vmul.f32 -1.442695, %v817_v1 }
 0x3b0   : > { %2335 = vpow2.f32 %v1791_v2 }
 0x3b9   : > { %v2334_v3 = vpop.eup %2333 }
 0x3ba   : > { %v757_v4 = vadd.f32 1.0, %v2334_v3 }
 0x3bc   : > { %2337 = vrcp.f32 %v757_v4 }
 0x3bd   : > { %v2336_v5 = vpop.eup %2335 }
 0x3be   : > { %v821_v6 = vadd.f32 1.0, %v2336_v5 }
 0x3c0   : > { %2339 = vrcp.f32 %v821_v6 }
 0x3c9   : > { %v2338_v7 = vpop.eup %2337 }
 0x3ca   : > { %v760_v8 = vmul.f32 %v2338_v7, %v753_v60 }
 0x3cc   : > { %v842_v10 = vpack.c.bf16 %v760_v8, %v760_v8 }
 0x3cd   : > { %v2340_v11 = vpop.eup %2339 }
 0x3ce   : > { %2007 = vmatmul.mubr.bf16.vlgmr.msra.gmra.mxu0 %v842_v10  ;;  %v824_v12 = vmul.f32 %v2340_v11, %v817_v1 }
 0x3cf   : > { %2046 = vmatprep.mubr.msk.bf16.mxu0 %vm2686_vm0, %v2685_v0  ;;  %2031 = vmatpush3.bf16.msra.mxu0 %v2293_v28 }
 0x3d0   : > { %v966_v13 = vpack.c.bf16 %v824_v12, %v824_v12  ;;  %2032 = vmatprep.subr.bf16.mxu0 %v2685_v0 }
 0x3d2   : > { %2027 = vmatmul.mubr.bf16.vlgmr.msra.gmra.mxu1 %v966_v13 }
 0x3d3   : > { %2066 = vmatprep.mubr.msk.bf16.mxu1 %vm2686_vm0, %v2685_v0  ;;  %2051 = vmatpush3.bf16.msra.mxu1 %v2293_v28 }
 0x3d4   : > { %2052 = vmatprep.subr.bf16.mxu1 %v2685_v0  ;;  %2033 = vmatpush3.bf16.msra.mxu0 %v2294_v29 }
 0x3d5   : > { %2034 = vmatprep.subr.bf16.mxu0 %v2685_v0 }
 0x3d7   : > { %2053 = vmatpush3.bf16.msra.mxu1 %v2294_v29 }
 0x3d8   : > { %2054 = vmatprep.subr.bf16.mxu1 %v2685_v0  ;;  %2035 = vmatpush3.bf16.msra.mxu0 %v2295_v30 }
 0x3d9   : > { %2036 = vmatprep.subr.bf16.mxu0 %v2685_v0 }
 0x3db   : > { %2055 = vmatpush3.bf16.msra.mxu1 %v2295_v30  ;;  %v2301_v30 = vld [vmem:[#allocation11 + $0xb8] sm:$0xff]  }
 0x3dc   : > { %2056 = vmatprep.subr.bf16.mxu1 %v2685_v0  ;;  %2037 = vmatpush3.bf16.msra.mxu0 %v2296_v31 }
 0x3dd   : > { %2038 = vmatprep.subr.bf16.mxu0 %v2685_v0 }
 0x3df   : > { %2057 = vmatpush3.bf16.msra.mxu1 %v2296_v31  ;;  %v2302_v31 = vld [vmem:[#allocation11 + $0xb0] sm:$0xff]  }
 0x3e0   : > { %2058 = vmatprep.subr.bf16.mxu1 %v2685_v0  ;;  %2039 = vmatpush3.bf16.msra.mxu0 %v2297_v32 }
 0x3e1   : > { %2040 = vmatprep.subr.bf16.mxu0 %v2685_v0 }
 0x3e3   : > { %2059 = vmatpush3.bf16.msra.mxu1 %v2297_v32  ;;  %v2303_v32 = vld [vmem:[#allocation11 + $0xa8] sm:$0xff]  }
 0x3e4   : > { %2060 = vmatprep.subr.bf16.mxu1 %v2685_v0  ;;  %2041 = vmatpush3.bf16.msra.mxu0 %v2298_v33 }
 0x3e5   : > { %2042 = vmatprep.subr.bf16.mxu0 %v2685_v0 }
 0x3e7   : > { %2061 = vmatpush3.bf16.msra.mxu1 %v2298_v33  ;;  %v2304_v33 = vld [vmem:[#allocation11 + $0xa0] sm:$0xff]  }
 0x3e8   : > { %2062 = vmatprep.subr.bf16.mxu1 %v2685_v0  ;;  %2043 = vmatpush3.bf16.msra.mxu0 %v2299_v34 }
 0x3e9   : > { %2044 = vmatprep.subr.bf16.mxu0 %v2685_v0 }
 0x3eb   : > { %2063 = vmatpush3.bf16.msra.mxu1 %v2299_v34  ;;  %v2305_v34 = vld [vmem:[#allocation11 + $0x98] sm:$0xff]  }
 0x3ec   : > { %2064 = vmatprep.subr.bf16.mxu1 %v2685_v0  ;;  %2045 = vmatpush3.bf16.msra.mxu0 %v2300_v35 }
 0x3ed   : > { %2070 = vmatprep.subr.bf16.mxu0 %v2685_v0 }
 0x3ef   : > { %2065 = vmatpush3.bf16.msra.mxu1 %v2300_v35  ;;  %v2306_v35 = vld [vmem:[#allocation11 + $0x90] sm:$0xff]  }
 0x3f0   : > { %2090 = vmatprep.subr.bf16.mxu1 %v2685_v0 }
 0x48e   : > { %v929_v16 = vpop.f32.mrf.mxu0 }
 0x48f   : > { %v3069_v17 = vadd.f32 %v929_v16, %v846_v15  ;;  %v3105_v16 = vld [vmem:[#allocation13 + $0x8] sm:$0xff] }
 0x490   : > { %v2008_v18 = vpop.f32.mrf.mxu0 }
 0x491   : > { %935 = vadd.xlane.f32.xlu0 %v3069_v17  ;;  %v937_v22 = vmul.f32 %v3069_v17, %v3069_v17 }
 0x492   : > { %v932_v19 = vpop.f32.mrf.mxu0  ;;  %v1001_v20 = vpop.f32.mrf.mxu1 }
 0x493   : > { %v3072_v21 = vadd.f32 %v1001_v20, %v846_v15 }
 0x494   : > { %v2009_v23 = vpop.f32.mrf.mxu0  ;;  %v2028_v24 = vpop.f32.mrf.mxu1 }
 0x495   : > { %1007 = vadd.xlane.f32.xlu1 %v3072_v21  ;;  %938 = vadd.xlane.f32.xlu0 %v937_v22  ;;  %v1009_v26 = vmul.f32 %v3072_v21, %v3072_v21 }
 0x496   : > { %v1004_v25 = vpop.f32.mrf.mxu1 }
 0x498   : > { %v2029_v27 = vpop.f32.mrf.mxu1 }
 0x499   : > { %1010 = vadd.xlane.f32.xlu1 %v1009_v26 }
 0x51a   : > { %v936_v36 = vpop.xlane.xlu0 %935 }
 0x51b   : > { %v940_v37 = vmul.f32 0.015625, %v936_v36  ;;  %v2307_v36 = vld [vmem:[#allocation11 + $0x88] sm:$0xff]  }
 0x51d   : > { %v942_v40 = vmul.f32 %v940_v37, %v940_v37  ;;  %v947_v55 = vsub.f32 %v3069_v17, %v940_v37  ;;  %v1053_v17 = vrot.slane %v3105_v16, %v2977_v9  ;;  %v2308_v37 = vld [vmem:[#allocation11 + $0x80] sm:$0xff]  }
 0x51e   : > { %v1008_v38 = vpop.xlane.xlu1 %1007  ;;  %v939_v39 = vpop.xlane.xlu0 %938 }
 0x51f   : > { %v1012_v41 = vmul.f32 0.015625, %v1008_v38  ;;  %v941_v42 = vmul.f32 0.015625, %v939_v39 }
 0x521   : > { %v943_v43 = vsub.f32 %v941_v42, %v942_v40  ;;  %v1014_v45 = vmul.f32 %v1012_v41, %v1012_v41  ;;  %v1019_v59 = vsub.f32 %v3072_v21, %v1012_v41 }
 0x522   : > { %v1011_v44 = vpop.xlane.xlu1 %1010 }
 0x523   : > { %v944_v46 = vmax.f32 %v943_v43, 0.0  ;;  %v1013_v47 = vmul.f32 0.015625, %v1011_v44 }
 0x525   : > { %v945_v50 = vadd.f32 1e-05, %v944_v46  ;;  %v1015_v51 = vsub.f32 %v1013_v47, %v1014_v45 }
 0x527   : > { %2341 = vrsqrt.f32 %v945_v50  ;;  %v1016_v52 = vmax.f32 %v1015_v51, 0.0 }
 0x529   : > { %v1017_v53 = vadd.f32 1e-05, %v1016_v52 }
 0x52b   : > { %2343 = vrsqrt.f32 %v1017_v53 }
 0x534   : > { %v2342_v56 = vpop.eup %2341 }
 0x535   : > { %v948_v58 = vmul.f32 %v2342_v56, %v947_v55  ;;  %v1159_v56 = vrot.slane %v3105_v16, %v3010_v48 }
 0x537   : > { %v953_v60 = vmul.f32 %v952_v54, %v948_v58 }
 0x538   : > { %v2344_v61 = vpop.eup %2343 }
 0x539   : > { %v958_v62 = vadd.f32 %v957_v57, %v953_v60  ;;  %v1020_v63 = vmul.f32 %v2344_v61, %v1019_v59  ;;  %v1164_v59 = vrot.slane %v3105_v16, %v3013_v49 }
 0x53b   : > { %v1800_v1 = vmul.f32 -1.442695, %v958_v62  ;;  %v1021_v2 = vmul.f32 %v1020_v63, %v952_v54 }
 0x53d   : > { %2345 = vpow2.f32 %v1800_v1  ;;  %v1022_v3 = vadd.f32 %v1021_v2, %v957_v57 }
 0x53f   : > { %v1801_v4 = vmul.f32 -1.442695, %v1022_v3 }
 0x541   : > { %2347 = vpow2.f32 %v1801_v4 }
 0x54a   : > { %v2346_v5 = vpop.eup %2345 }
 0x54b   : > { %v962_v6 = vadd.f32 1.0, %v2346_v5 }
 0x54d   : > { %2349 = vrcp.f32 %v962_v6 }
 0x54e   : > { %v2348_v7 = vpop.eup %2347 }
 0x54f   : > { %v1026_v8 = vadd.f32 1.0, %v2348_v7 }
 0x551   : > { %2351 = vrcp.f32 %v1026_v8 }
 0x55a   : > { %v2350_v10 = vpop.eup %2349 }
 0x55b   : > { %v965_v11 = vmul.f32 %v2350_v10, %v958_v62 }
 0x55d   : > { %v1049_v12 = vpack.c.bf16 %v965_v11, %v965_v11 }
 0x55e   : > { %v2352_v13 = vpop.eup %2351 }
 0x55f   : > { %2047 = vmatmul.mubr.bf16.vlgmr.msra.gmra.mxu0 %v1049_v12  ;;  %v1029_v14 = vmul.f32 %v2352_v13, %v1022_v3 }
 0x560   : > { %2086 = vmatprep.mubr.msk.bf16.mxu0 %vm2686_vm0, %v2685_v0  ;;  %2071 = vmatpush3.bf16.msra.mxu0 %v2301_v30 }
 0x561   : > { %v1173_v15 = vpack.c.bf16 %v1029_v14, %v1029_v14  ;;  %2072 = vmatprep.subr.bf16.mxu0 %v2685_v0 }
 0x563   : > { %2067 = vmatmul.mubr.bf16.vlgmr.msra.gmra.mxu1 %v1173_v15 }
 0x564   : > { %2106 = vmatprep.mubr.msk.bf16.mxu1 %vm2686_vm0, %v2685_v0  ;;  %2091 = vmatpush3.bf16.msra.mxu1 %v2301_v30 }
 0x565   : > { %2092 = vmatprep.subr.bf16.mxu1 %v2685_v0  ;;  %2073 = vmatpush3.bf16.msra.mxu0 %v2302_v31 }
 0x566   : > { %2074 = vmatprep.subr.bf16.mxu0 %v2685_v0 }
 0x568   : > { %2093 = vmatpush3.bf16.msra.mxu1 %v2302_v31  ;;  %v2309_v31 = vld [vmem:[#allocation14 + $0x38] sm:$0xff]  }
 0x569   : > { %2094 = vmatprep.subr.bf16.mxu1 %v2685_v0  ;;  %2075 = vmatpush3.bf16.msra.mxu0 %v2303_v32 }
 0x56a   : > { %2076 = vmatprep.subr.bf16.mxu0 %v2685_v0 }
 0x56c   : > { %2095 = vmatpush3.bf16.msra.mxu1 %v2303_v32  ;;  %v2310_v32 = vld [vmem:[#allocation14 + $0x30] sm:$0xff]  }
 0x56d   : > { %2096 = vmatprep.subr.bf16.mxu1 %v2685_v0  ;;  %2077 = vmatpush3.bf16.msra.mxu0 %v2304_v33 }
 0x56e   : > { %2078 = vmatprep.subr.bf16.mxu0 %v2685_v0 }
 0x570   : > { %2097 = vmatpush3.bf16.msra.mxu1 %v2304_v33  ;;  %v2311_v33 = vld [vmem:[#allocation14 + $0x28] sm:$0xff]  }
 0x571   : > { %2098 = vmatprep.subr.bf16.mxu1 %v2685_v0  ;;  %2079 = vmatpush3.bf16.msra.mxu0 %v2305_v34 }
 0x572   : > { %2080 = vmatprep.subr.bf16.mxu0 %v2685_v0 }
 0x574   : > { %2099 = vmatpush3.bf16.msra.mxu1 %v2305_v34  ;;  %v2312_v34 = vld [vmem:[#allocation14 + $0x20] sm:$0xff]  }
 0x575   : > { %2100 = vmatprep.subr.bf16.mxu1 %v2685_v0  ;;  %2081 = vmatpush3.bf16.msra.mxu0 %v2306_v35 }
 0x576   : > { %2082 = vmatprep.subr.bf16.mxu0 %v2685_v0 }
 0x578   : > { %2101 = vmatpush3.bf16.msra.mxu1 %v2306_v35  ;;  %v2313_v35 = vld [vmem:[#allocation14 + $0x18] sm:$0xff]  }
 0x579   : > { %2102 = vmatprep.subr.bf16.mxu1 %v2685_v0  ;;  %2083 = vmatpush3.bf16.msra.mxu0 %v2307_v36 }
 0x57a   : > { %2084 = vmatprep.subr.bf16.mxu0 %v2685_v0 }
 0x57c   : > { %2103 = vmatpush3.bf16.msra.mxu1 %v2307_v36  ;;  %v2314_v36 = vld [vmem:[#allocation14 + $0x10] sm:$0xff]  }
 0x57d   : > { %2104 = vmatprep.subr.bf16.mxu1 %v2685_v0  ;;  %2085 = vmatpush3.bf16.msra.mxu0 %v2308_v37 }
 0x57e   : > { %2110 = vmatprep.subr.bf16.mxu0 %v2685_v0 }
 0x580   : > { %2105 = vmatpush3.bf16.msra.mxu1 %v2308_v37  ;;  %v2315_v37 = vld [vmem:[#allocation14 + $0x8] sm:$0xff]  }
 0x581   : > { %2130 = vmatprep.subr.bf16.mxu1 %v2685_v0 }
 0x61f   : > { %v1136_v18 = vpop.f32.mrf.mxu0 }
 0x620   : > { %v3109_v19 = vadd.f32 %v1136_v18, %v1053_v17  ;;  %v3145_v18 = vld [vmem:[#allocation13 + $0x10] sm:$0xff] }
 0x621   : > { %v2048_v20 = vpop.f32.mrf.mxu0 }
 0x622   : > { %1142 = vadd.xlane.f32.xlu0 %v3109_v19  ;;  %v1144_v24 = vmul.f32 %v3109_v19, %v3109_v19 }
 0x623   : > { %v1139_v21 = vpop.f32.mrf.mxu0  ;;  %v1208_v22 = vpop.f32.mrf.mxu1 }
 0x624   : > { %v3112_v23 = vadd.f32 %v1208_v22, %v1053_v17 }
 0x625   : > { %v2049_v25 = vpop.f32.mrf.mxu0  ;;  %v2068_v26 = vpop.f32.mrf.mxu1 }
 0x626   : > { %1214 = vadd.xlane.f32.xlu1 %v3112_v23  ;;  %1145 = vadd.xlane.f32.xlu0 %v1144_v24  ;;  %v1216_v28 = vmul.f32 %v3112_v23, %v3112_v23 }
 0x627   : > { %v1211_v27 = vpop.f32.mrf.mxu1 }
 0x629   : > { %v2069_v29 = vpop.f32.mrf.mxu1 }
 0x62a   : > { %1217 = vadd.xlane.f32.xlu1 %v1216_v28 }
 0x6ab   : > { %v1143_v38 = vpop.xlane.xlu0 %1142 }
 0x6ac   : > { %v1147_v39 = vmul.f32 0.015625, %v1143_v38  ;;  %v2316_v38 = vld [vmem:[#allocation14] sm:$0xff]  }
 0x6ae   : > { %v1149_v42 = vmul.f32 %v1147_v39, %v1147_v39  ;;  %v1154_v57 = vsub.f32 %v3109_v19, %v1147_v39  ;;  %v1260_v19 = vrot.slane %v3145_v18, %v2977_v9 }
 0x6af   : > { %v1215_v40 = vpop.xlane.xlu1 %1214  ;;  %v1146_v41 = vpop.xlane.xlu0 %1145 }
 0x6b0   : > { %v1219_v43 = vmul.f32 0.015625, %v1215_v40  ;;  %v1148_v44 = vmul.f32 0.015625, %v1146_v41 }
 0x6b2   : > { %v1150_v45 = vsub.f32 %v1148_v44, %v1149_v42  ;;  %v1221_v47 = vmul.f32 %v1219_v43, %v1219_v43  ;;  %v1226_v61 = vsub.f32 %v3112_v23, %v1219_v43 }
 0x6b3   : > { %v1218_v46 = vpop.xlane.xlu1 %1217 }
 0x6b4   : > { %v1151_v50 = vmax.f32 %v1150_v45, 0.0  ;;  %v1220_v51 = vmul.f32 0.015625, %v1218_v46 }
 0x6b6   : > { %v1152_v52 = vadd.f32 1e-05, %v1151_v50  ;;  %v1222_v53 = vsub.f32 %v1220_v51, %v1221_v47 }
 0x6b8   : > { %2353 = vrsqrt.f32 %v1152_v52  ;;  %v1223_v54 = vmax.f32 %v1222_v53, 0.0 }
 0x6ba   : > { %v1224_v55 = vadd.f32 1e-05, %v1223_v54 }
 0x6bc   : > { %2355 = vrsqrt.f32 %v1224_v55 }
 0x6c5   : > { %v2354_v58 = vpop.eup %2353 }
 0x6c6   : > { %v1155_v60 = vmul.f32 %v2354_v58, %v1154_v57 }
 0x6c8   : > { %v1160_v62 = vmul.f32 %v1159_v56, %v1155_v60 }
 0x6c9   : > { %v2356_v63 = vpop.eup %2355 }
 0x6ca   : > { %v1165_v1 = vadd.f32 %v1164_v59, %v1160_v62  ;;  %v1227_v2 = vmul.f32 %v2356_v63, %v1226_v61 }
 0x6cc   : > { %v1810_v3 = vmul.f32 -1.442695, %v1165_v1  ;;  %v1228_v4 = vmul.f32 %v1227_v2, %v1159_v56 }
 0x6ce   : > { %2357 = vpow2.f32 %v1810_v3  ;;  %v1229_v5 = vadd.f32 %v1228_v4, %v1164_v59  ;;  %v1371_v59 = vrot.slane %v3145_v18, %v3013_v49 }
 0x6d0   : > { %v1811_v6 = vmul.f32 -1.442695, %v1229_v5 }
 0x6d2   : > { %2359 = vpow2.f32 %v1811_v6 }
 0x6db   : > { %v2358_v7 = vpop.eup %2357 }
 0x6dc   : > { %v1169_v8 = vadd.f32 1.0, %v2358_v7 }
 0x6de   : > { %2361 = vrcp.f32 %v1169_v8 }
 0x6df   : > { %v2360_v10 = vpop.eup %2359 }
 0x6e0   : > { %v1233_v11 = vadd.f32 1.0, %v2360_v10 }
 0x6e2   : > { %2363 = vrcp.f32 %v1233_v11 }
 0x6eb   : > { %v2362_v12 = vpop.eup %2361 }
 0x6ec   : > { %v1172_v13 = vmul.f32 %v2362_v12, %v1165_v1 }
 0x6ee   : > { %v1256_v14 = vpack.c.bf16 %v1172_v13, %v1172_v13 }
 0x6ef   : > { %v2364_v15 = vpop.eup %2363 }
 0x6f0   : > { %2087 = vmatmul.mubr.bf16.vlgmr.msra.gmra.mxu0 %v1256_v14  ;;  %v1236_v16 = vmul.f32 %v2364_v15, %v1229_v5 }
 0x6f1   : > { %2126 = vmatprep.mubr.msk.bf16.mxu0 %vm2686_vm0, %v2685_v0  ;;  %2111 = vmatpush3.bf16.msra.mxu0 %v2309_v31 }
 0x6f2   : > { %v1380_v17 = vpack.c.bf16 %v1236_v16, %v1236_v16  ;;  %2112 = vmatprep.subr.bf16.mxu0 %v2685_v0  ;;  %v1822_v16 = vld [vmem:[%s3241_s8] ss:$0 sm:$0xff] }
 0x6f4   : > { %2107 = vmatmul.mubr.bf16.vlgmr.msra.gmra.mxu1 %v1380_v17 }
 0x6f5   : > { %2146 = vmatprep.mubr.msk.bf16.mxu1 %vm2686_vm0, %v2685_v0  ;;  %2131 = vmatpush3.bf16.msra.mxu1 %v2309_v31 }
 0x6f6   : > { %2132 = vmatprep.subr.bf16.mxu1 %v2685_v0  ;;  %2113 = vmatpush3.bf16.msra.mxu0 %v2310_v32 }
 0x6f7   : > { %2114 = vmatprep.subr.bf16.mxu0 %v2685_v0 }
 0x6f9   : > { %2133 = vmatpush3.bf16.msra.mxu1 %v2310_v32 }
 0x6fa   : > { %2134 = vmatprep.subr.bf16.mxu1 %v2685_v0  ;;  %2115 = vmatpush3.bf16.msra.mxu0 %v2311_v33 }
 0x6fb   : > { %2116 = vmatprep.subr.bf16.mxu0 %v2685_v0 }
 0x6fd   : > { %2135 = vmatpush3.bf16.msra.mxu1 %v2311_v33 }
 0x6fe   : > { %2136 = vmatprep.subr.bf16.mxu1 %v2685_v0  ;;  %2117 = vmatpush3.bf16.msra.mxu0 %v2312_v34 }
 0x6ff   : > { %2118 = vmatprep.subr.bf16.mxu0 %v2685_v0 }
 0x701   : > { %2137 = vmatpush3.bf16.msra.mxu1 %v2312_v34 }
 0x702   : > { %2138 = vmatprep.subr.bf16.mxu1 %v2685_v0  ;;  %2119 = vmatpush3.bf16.msra.mxu0 %v2313_v35 }
 0x703   : > { %2120 = vmatprep.subr.bf16.mxu0 %v2685_v0 }
 0x705   : > { %2139 = vmatpush3.bf16.msra.mxu1 %v2313_v35 }
 0x706   : > { %2140 = vmatprep.subr.bf16.mxu1 %v2685_v0  ;;  %2121 = vmatpush3.bf16.msra.mxu0 %v2314_v36 }
 0x707   : > { %2122 = vmatprep.subr.bf16.mxu0 %v2685_v0 }
 0x709   : > { %2141 = vmatpush3.bf16.msra.mxu1 %v2314_v36 }
 0x70a   : > { %2142 = vmatprep.subr.bf16.mxu1 %v2685_v0  ;;  %2123 = vmatpush3.bf16.msra.mxu0 %v2315_v37 }
 0x70b   : > { %2124 = vmatprep.subr.bf16.mxu0 %v2685_v0 }
 0x70d   : > { %2143 = vmatpush3.bf16.msra.mxu1 %v2315_v37 }
 0x70e   : > { %2144 = vmatprep.subr.bf16.mxu1 %v2685_v0  ;;  %2125 = vmatpush3.bf16.msra.mxu0 %v2316_v38  ;;  %v1366_v0 = vrot.slane %v3145_v18, %v3010_v48 }
 0x711   : > { %2145 = vmatpush3.bf16.msra.mxu1 %v2316_v38 }
 0x7b0   : > { %v1343_v20 = vpop.f32.mrf.mxu0 }
 0x7b1   : > { %v3149_v21 = vadd.f32 %v1343_v20, %v1260_v19 }
 0x7b2   : > { %v2088_v22 = vpop.f32.mrf.mxu0 }
 0x7b3   : > { %1349 = vadd.xlane.f32.xlu0 %v3149_v21  ;;  %v1351_v26 = vmul.f32 %v3149_v21, %v3149_v21 }
 0x7b4   : > { %v1346_v23 = vpop.f32.mrf.mxu0  ;;  %v1415_v24 = vpop.f32.mrf.mxu1 }
 0x7b5   : > { %v3152_v25 = vadd.f32 %v1415_v24, %v1260_v19 }
 0x7b6   : > { %v2089_v27 = vpop.f32.mrf.mxu0  ;;  %v2108_v28 = vpop.f32.mrf.mxu1 }
 0x7b7   : > { %1421 = vadd.xlane.f32.xlu1 %v3152_v25  ;;  %1352 = vadd.xlane.f32.xlu0 %v1351_v26  ;;  %v1423_v9 = vmul.f32 %v3152_v25, %v3152_v25 }
 0x7b8   : > { %v1418_v29 = vpop.f32.mrf.mxu1 }
 0x7ba   : > { %v2109_v30 = vpop.f32.mrf.mxu1 }
 0x7bb   : > { %1424 = vadd.xlane.f32.xlu1 %v1423_v9 }
 0x83c   : > { %v1350_v39 = vpop.xlane.xlu0 %1349 }
 0x83d   : > { %v1354_v40 = vmul.f32 0.015625, %v1350_v39 }
 0x83f   : > { %v1356_v43 = vmul.f32 %v1354_v40, %v1354_v40  ;;  %v1361_v57 = vsub.f32 %v3149_v21, %v1354_v40 }
 0x840   : > { %v1422_v41 = vpop.xlane.xlu1 %1421  ;;  %v1353_v42 = vpop.xlane.xlu0 %1352 }
 0x841   : > { %v1426_v44 = vmul.f32 0.015625, %v1422_v41  ;;  %v1355_v45 = vmul.f32 0.015625, %v1353_v42 }
 0x843   : > { %v1357_v46 = vsub.f32 %v1355_v45, %v1356_v43  ;;  %v1428_v50 = vmul.f32 %v1426_v44, %v1426_v44  ;;  %v1433_v61 = vsub.f32 %v3152_v25, %v1426_v44 }
 0x844   : > { %v1425_v47 = vpop.xlane.xlu1 %1424 }
 0x845   : > { %v1358_v51 = vmax.f32 %v1357_v46, 0.0  ;;  %v1427_v52 = vmul.f32 0.015625, %v1425_v47 }
 0x847   : > { %v1359_v53 = vadd.f32 1e-05, %v1358_v51  ;;  %v1429_v54 = vsub.f32 %v1427_v52, %v1428_v50 }
 0x849   : > { %2365 = vrsqrt.f32 %v1359_v53  ;;  %v1430_v55 = vmax.f32 %v1429_v54, 0.0 }
 0x84b   : > { %v1431_v56 = vadd.f32 1e-05, %v1430_v55 }
 0x84d   : > { %2367 = vrsqrt.f32 %v1431_v56 }
 0x856   : > { %v2366_v58 = vpop.eup %2365 }
 0x857   : > { %v1362_v60 = vmul.f32 %v2366_v58, %v1361_v57 }
 0x859   : > { %v1367_v62 = vmul.f32 %v1366_v0, %v1362_v60 }
 0x85a   : > { %v2368_v63 = vpop.eup %2367 }
 0x85b   : > { %v1372_v1 = vadd.f32 %v1371_v59, %v1367_v62  ;;  %v1434_v2 = vmul.f32 %v2368_v63, %v1433_v61 }
 0x85d   : > { %v1820_v3 = vmul.f32 -1.442695, %v1372_v1  ;;  %v1435_v4 = vmul.f32 %v1434_v2, %v1366_v0 }
 0x85f   : > { %2369 = vpow2.f32 %v1820_v3  ;;  %v1436_v5 = vadd.f32 %v1435_v4, %v1371_v59 }
 0x861   : > { %v1821_v6 = vmul.f32 -1.442695, %v1436_v5 }
 0x863   : > { %2371 = vpow2.f32 %v1821_v6 }
 0x86c   : > { %v2370_v48 = vpop.eup %2369 }
 0x86d   : > { %v1376_v7 = vadd.f32 1.0, %v2370_v48 }
 0x86f   : > { %2373 = vrcp.f32 %v1376_v7 }
 0x870   : > { %v2372_v8 = vpop.eup %2371 }
 0x871   : > { %v1440_v10 = vadd.f32 1.0, %v2372_v8 }
 0x873   : > { %2375 = vrcp.f32 %v1440_v10 }
 0x87c   : > { %v2374_v49 = vpop.eup %2373 }
 0x87d   : > { %v1379_v11 = vmul.f32 %v2374_v49, %v1372_v1 }
 0x87f   : > { %v1461_v12 = vpack.c.bf16 %v1379_v11, %v1379_v11 }
 0x880   : > { %v2376_v13 = vpop.eup %2375 }
 0x881   : > { %2127 = vmatmul.mubr.bf16.vlgmr.msra.gmra.mxu0 %v1461_v12  ;;  %v1443_v14 = vmul.f32 %v2376_v13, %v1436_v5 }
 0x883   : > { %v1556_v15 = vpack.c.bf16 %v1443_v14, %v1443_v14 }
 0x885   : > { %2147 = vmatmul.mubr.bf16.vlgmr.msra.gmra.mxu1 %v1556_v15 }
 0x941   : > { %v1548_v17 = vpop.f32.mrf.mxu0 }
 0x942   : > { %v1549_v18 = vadd.f32 %v1822_v16, %v1548_v17 }
 0x943   : > { %v2128_v19 = vpop.f32.mrf.mxu0 }
 0x944   : > { %2377 = vtanh.f32 %v1549_v18 }
 0x945   : > { %v1551_v20 = vpop.f32.mrf.mxu0  ;;  %v1591_v21 = vpop.f32.mrf.mxu1 }
 0x946   : > { %v1592_v22 = vadd.f32 %v1822_v16, %v1591_v21 }
 0x947   : > { %v2129_v23 = vpop.f32.mrf.mxu0  ;;  %v2148_v24 = vpop.f32.mrf.mxu1 }
 0x948   : > { %2379 = vtanh.f32 %v1592_v22 }
 0x949   : > { %v1594_v25 = vpop.f32.mrf.mxu1 }
 0x94b   : > { %v2149_v26 = vpop.f32.mrf.mxu1 }
 0x951   : > { %v2378_v27 = vpop.eup %2377 }
 0x952   : > { %1555 = vst [vmem:[%s448_s29] sm:$0xff] %v2378_v27 }
 0x955   : > { %v2380_v28 = vpop.eup %2379 }
 0x956   : > { %1598 = vst [vmem:[%s448_s29 + $0x8] sm:$0xff] %v2380_v28 }
 0x957   : > { %2604 = shalt.err (!%p2601_p12)
}
 0x958   : > { %s2605_s21 = scalar_lea.hbm %s3188_s25, 256  ;;  %s2609_s26 = scalar_lea.hbm %s3242_s9, 512 }
 0x959   : > { %p2606_p13 = scmp.ne.s32.totalorder %s3188_s25, %s2605_s21  ;;  %p2610_p9 = scmp.lt.s32.totalorder %s3188_s25, %s3242_s9 }
 0x95a   : > { %p2611_p1 = scmp.lt.s32.totalorder %s2609_s26, %s2605_s21 }
 0x95b   : > { %p2607_p5 = pnand %p2606_p13, %p3275_p11 }
 0x95c   : > { %p2612_p3 = por %p2611_p1, %p2610_p9 }
 0x95d   : > { %p2608_p8 = pneg %p2607_p5 }
 0x95f   : > { %p2613_p10 = pnand %p2612_p3, %p2608_p8 }
 0x961   : > { %2616 = shalt.err (!%p2613_p10)
}
 0x962   : > { %s2688_s20 = smov 128   ;;  %s2689_s23 = smov 8  }
 0x963   : > { %2180 = dma.vmem_to_hbm [thread:$0]  (%p3275_p11), %s3190_s18, 256, %s3188_s25, %s1600_s14, %s2688_s20, %s2688_s20, %s2689_s23  }
 0x964 PF: > { %s1628_s1 = sand.u32 1, %s2659_s30   ;;  %p3276_p0 = scmp.ne.s32.totalorder %s3261_s13, 0 }
 0x965   : > { %p3277_p2 = scmp.ge.s32.totalorder %s2671_s12, 2  ;;  %s1629_s15 = scalar_lea.sflag [#allocation4], %s1628_s1 }
 0x967   : > { %p2209_p7 = pnand %p3277_p2, %p3276_p0 }
 0x969   : > { %p2210_p4 = pneg %p2209_p7 }
 0x96b   : > { %2654 = dma.done.wait (%p2210_p4), %s1629_s15, 256  }
 0x96c   : > { %2656 = vsyncadd (%p2210_p4), %s1629_s15, 4294967040  ;;  %p26_p6 = scmp.ge.s32.totalorder %s2865_s22, 4   ;;  %s3278_s30 = smov %s2663_s10 }
 0x96d   : > { %s3279_s10 = smov %s2667_s11  ;;  %s3280_s11 = smov %s2877_s27 }
 0x96e   : > { %s3281_s12 = smov %s2865_s22  ;;  %28 = sbr.rel (!%p26_p6) target bundleno = 13 (0xd), region = 133 }
 0x973   :  { %1634 = vsyncpa [#allocation3], 1 }
 0x974   :  { %1636 = vsyncpa [#allocation3 + $0x1], 1 }
 0x975   :  { %1637 = vsyncpa [#allocation6], 1 }
 0x976   :  { %1638 = vsyncpa [#allocation9], 1 }
 0x977   :  { %1639 = vsyncpa [#allocation12], 1 }
 0x978   :  { %1640 = vsyncpa [#allocation15], 1 }
 0x979   :  { %1641 = vsyncpa [#allocation4], 1 }
 0x97a   :  { %1643 = vsyncpa [#allocation4 + $0x1], 1 }

// kernel: tpu_custom_call.1
= control target key start
LH: loop header
LB: loop body
LE: loop exit
PB: predicated region body
PF: predicated region fallthrough
CT: control target
= control target key end

     0   :  { %s3233_s0 = inlined_call_operand.hbm [shape: f32[32,32], index: 0, kind: input, shape index: {}]   ;;  %s3234_s1 = inlined_call_operand.hbm [shape: bf16[32,128], index: 1, kind: input, shape index: {}]   ;;  %s3235_s2 = inlined_call_operand.hbm [shape: f32[8,128], index: 2, kind: input, shape index: {}]   ;;  %s3236_s3 = inlined_call_operand.hbm [shape: bf16[128,128], index: 3, kind: input, shape index: {}]   ;;  %s3237_s4 = inlined_call_operand.hbm [shape: f32[8,128], index: 4, kind: input, shape index: {}]   ;;  %s3238_s5 = inlined_call_operand.hbm [shape: bf16[3,128,128], index: 5, kind: input, shape index: {}]   ;;  %s3239_s6 = inlined_call_operand.hbm [shape: f32[3,8,128], index: 6, kind: input, shape index: {}]   ;;  %s3240_s7 = inlined_call_operand.hbm [shape: bf16[128,128], index: 7, kind: input, shape index: {}]   ;;  %s3241_s8 = inlined_call_operand.vmem [shape: f32[8,128], index: 8, kind: input, shape index: {}]   ;;  %s3242_s9 = inlined_call_operand.hbm [shape: f32[32,128], index: 9, kind: output, shape index: {}]  }
   0x1   :  { %3249 = sst [smem:[#allocation23_spill]] %s3234_s1 }
   0x2   :  { %3250 = sst [smem:[#allocation24_spill]] %s3235_s2 }
   0x3   :  { %3251 = sst [smem:[#allocation25_spill]] %s3236_s3 }
   0x4   :  { %14 = vsyncpa [#allocation3], 0 }
   0x5   :  { %16 = vsyncpa [#allocation3 + $0x1], 0 }
   0x6   :  { %17 = vsyncpa [#allocation6], 0 }
   0x7   :  { %18 = vsyncpa [#allocation9], 0 }
   0x8   :  { %19 = vsyncpa [#allocation12], 0 }
   0x9   :  { %20 = vsyncpa [#allocation15], 0 }
   0xa   :  { %21 = vsyncpa [#allocation4], 0 }
   0xb   :  { %23 = vsyncpa [#allocation4 + $0x1], 0  ;;  %s2740_s30 = smov 0   ;;  %s2742_s10 = smov 0  }
   0xc   :  { %s2744_s11 = smov 0   ;;  %s2746_s12 = smov 0  }
   0xd LB: > { %s2673_s13 = smov [#allocation5]   ;;  %s2761_s15 = sadd.s32 4294967295, %s2671_s12   ;;  %s2671_s12 = sphi %s2746_s12, %s3281_s12   ;;  %s2667_s11 = sphi %s2744_s11, %s3280_s11   ;;  %s2663_s10 = sphi %s2742_s10, %s3279_s10   ;;  %s2659_s30 = sphi %s2740_s30, %s3278_s30  }
   0xe   : > { %s266_s14 = sshll.u32 %s2673_s13, 4  ;;  %p1754_p0 = scmp.ge.s32.totalorder %s2671_s12, 1  ;;  %s267_s14 = int_to_ptr.vmem [resolvable:$true] %s266_s14 }
   0xf   : > { %p3243_p1 = scmp.eq.s32.totalorder %s2761_s15, 0  ;;  %p254_p2 = scmp.lt.s32.totalorder %s2671_s12, 3 }
  0x10   : > { %s2674_s17 = smov [#allocation8]   ;;  %s2675_s20 = smov [#allocation11]  }
  0x11   : > { %p2766_p3 = pnand %p1754_p0, %p254_p2  ;;  %s290_s18 = sshll.u32 %s2674_s17, 4  ;;  %s2779_s18 = int_to_ptr.vmem [resolvable:$true] %s290_s18 }
  0x12   : > { %s314_s21 = sshll.u32 %s2675_s20, 4  ;;  %s2392_s23 = scalar_lea.vmem %s267_s14, 256  ;;  %s2781_s21 = int_to_ptr.vmem [resolvable:$true] %s314_s21 }
  0x13   : > { %s3252_s16 = scalar_select %p2766_p3, 1, 0 }
  0x14   : > { %p2182_p5 = pneg %p2766_p3  ;;  %p2393_p8 = scmp.ne.s32.totalorder %s267_s14, %s2392_s23 }
  0x15   : > { %p2400_p11 = scmp.lt.s32.totalorder %s267_s14, %s267_s14  ;;  %p2401_p12 = scmp.lt.s32.totalorder %s2392_s23, %s2392_s23 }
  0x16   : > { %p2775_p6 = pnand %p2182_p5, %p3243_p1 }
  0x17   : > { %p2402_p13 = por %p2401_p12, %p2400_p11 }
  0x18   : > { %p2785_p7 = pneg %p2775_p6 }
  0x1a   : > { %p2395_p9 = pnand %p2393_p8, %p2785_p7 }
  0x1c   : > { %p2396_p10 = pneg %p2395_p9 }
  0x1e   : > { %p2403_p0 = pnand %p2402_p13, %p2396_p10 }
  0x20   : > { %2406 = shalt.err (!%p2403_p0)
}
  0x21   : > { %s2676_s24 = smov 64   ;;  %s2677_s25 = smov 4  }
  0x22   : > { %s3255_s1 = sld [smem:[#allocation23_spill]]  ;;  %s2418_s28 = scalar_lea.vmem %s2779_s18, 1024 }
  0x23   : > { %p2419_p2 = scmp.ne.s32.totalorder %s2779_s18, %s2418_s28  ;;  %p2426_p9 = scmp.lt.s32.totalorder %s2779_s18, %s2779_s18 }
  0x24   : > { %p2427_p10 = scmp.lt.s32.totalorder %s2418_s28, %s2418_s28 }
  0x25   : > { %p2421_p5 = pnand %p2419_p2, %p2785_p7 }
  0x26   : > { %p2428_p11 = por %p2427_p10, %p2426_p9 }
  0x27   : > { %p2422_p8 = pneg %p2421_p5 }
  0x28   : > { %2185 = dma.hbm_to_vmem [thread:$0]  (!%p2775_p6), %s3255_s1, 256, %s267_s14, [#allocation6], %s2676_s24, %s2676_s24, %s2677_s25  }
  0x29   : > { %p2429_p12 = pnand %p2428_p11, %p2422_p8 }
  0x2b   : > { %2432 = shalt.err (!%p2429_p12)
}
  0x2c   : > { %s3256_s3 = sld [smem:[#allocation25_spill]]  ;;  %s2444_s14 = scalar_lea.vmem %s2781_s21, 3072 }
  0x2d   : > { %p2445_p13 = scmp.ne.s32.totalorder %s2781_s21, %s2444_s14  ;;  %p2452_p5 = scmp.lt.s32.totalorder %s2781_s21, %s2781_s21 }
  0x2e   : > { %p2453_p8 = scmp.lt.s32.totalorder %s2444_s14, %s2444_s14 }
  0x2f   : > { %p2447_p0 = pnand %p2445_p13, %p2785_p7 }
  0x30   : > { %p2454_p9 = por %p2453_p8, %p2452_p5 }
  0x31   : > { %p2448_p2 = pneg %p2447_p0 }
  0x32   : > { %2191 = dma.hbm_to_vmem [thread:$0]  (!%p2775_p6), %s3256_s3, 1024, %s2779_s18, [#allocation9], %s2676_s24, %s2676_s24, %s2677_s25  }
  0x33   : > { %p2455_p10 = pnand %p2454_p9, %p2448_p2 }
  0x35   : > { %2458 = shalt.err (!%p2455_p10)
}
  0x36   : > { %2197 = dma.hbm_to_vmem [thread:$0]  (!%p2775_p6), %s3238_s5, 3072, %s2781_s21, [#allocation12], %s2676_s24, %s2676_s24, %s2677_s25  }
  0x37   : > { %s2678_s18 = smov [#allocation7]   ;;  %s2679_s26 = smov [#allocation10]  }
  0x38   : > { %s280_s23 = sshll.u32 %s2678_s18, 4  ;;  %s304_s27 = sshll.u32 %s2679_s26, 4  ;;  %s281_s23 = int_to_ptr.vmem [resolvable:$true] %s280_s23  ;;  %s305_s27 = int_to_ptr.vmem [resolvable:$true] %s304_s27 }
  0x39   : > { %s2470_s28 = scalar_lea.vmem %s281_s23, 128  ;;  %p2478_p0 = scmp.lt.s32.totalorder %s281_s23, %s281_s23 }
  0x3a   : > { %p2471_p11 = scmp.ne.s32.totalorder %s281_s23, %s2470_s28  ;;  %p2479_p2 = scmp.lt.s32.totalorder %s2470_s28, %s2470_s28 }
  0x3c   : > { %p2473_p12 = pnand %p2471_p11, %p2785_p7  ;;  %p2480_p5 = por %p2479_p2, %p2478_p0 }
  0x3e   : > { %p2474_p13 = pneg %p2473_p12 }
  0x40   : > { %p2481_p8 = pnand %p2480_p5, %p2474_p13 }
  0x42   : > { %2484 = shalt.err (!%p2481_p8)
}
  0x43   : > { %s3257_s2 = sld [smem:[#allocation24_spill]]  ;;  %s2496_s21 = scalar_lea.vmem %s305_s27, 128 }
  0x44   : > { %p2497_p9 = scmp.ne.s32.totalorder %s305_s27, %s2496_s21  ;;  %p2504_p11 = scmp.lt.s32.totalorder %s305_s27, %s305_s27 }
  0x45   : > { %p2505_p12 = scmp.lt.s32.totalorder %s2496_s21, %s2496_s21 }
  0x46   : > { %p2499_p10 = pnand %p2497_p9, %p2785_p7 }
  0x47   : > { %p2506_p1 = por %p2505_p12, %p2504_p11 }
  0x48   : > { %p2500_p4 = pneg %p2499_p10 }
  0x49   : > { %2188 = dma.hbm_to_vmem [thread:$0]  (!%p2775_p6), %s3257_s2, 128, %s281_s23, [#allocation6]  }
  0x4a   : > { %p2507_p3 = pnand %p2506_p1, %p2500_p4 }
  0x4c   : > { %2510 = shalt.err (!%p2507_p3)
}
  0x4d   : > { %2194 = dma.hbm_to_vmem [thread:$0]  (!%p2775_p6), %s3237_s4, 128, %s305_s27, [#allocation9]  }
  0x4e   : > { %s2680_s20 = smov [#allocation13]  }
  0x4f   : > { %s327_s18 = sshll.u32 %s2680_s20, 4  ;;  %s328_s18 = int_to_ptr.vmem [resolvable:$true] %s327_s18 }
  0x50   : > { %s2522_s23 = scalar_lea.vmem %s328_s18, 384  ;;  %p2530_p5 = scmp.lt.s32.totalorder %s328_s18, %s328_s18 }
  0x51   : > { %p2523_p13 = scmp.ne.s32.totalorder %s328_s18, %s2522_s23  ;;  %p2531_p8 = scmp.lt.s32.totalorder %s2522_s23, %s2522_s23 }
  0x53   : > { %p2525_p0 = pnand %p2523_p13, %p2785_p7  ;;  %p2532_p9 = por %p2531_p8, %p2530_p5 }
  0x55   : > { %p2526_p2 = pneg %p2525_p0 }
  0x57   : > { %p2533_p1 = pnand %p2532_p9, %p2526_p2 }
  0x59   : > { %2536 = shalt.err (!%p2533_p1)
}
  0x5a   : > { %s3245_s26 = smov 128   ;;  %s3246_s28 = smov 8  }
  0x5b   : > { %2200 = dma.hbm_to_vmem [thread:$0]  (!%p2775_p6), %s3239_s6, 384, %s328_s18, [#allocation12], %s3245_s26, %s3245_s26, %s3246_s28  }
  0x5c   : > { %s2683_s13 = smov [#allocation14]  }
  0x5d   : > { %s340_s21 = sshll.u32 %s2683_s13, 4  ;;  %s341_s21 = int_to_ptr.vmem [resolvable:$true] %s340_s21 }
  0x5e   : > { %s2548_s14 = scalar_lea.vmem %s341_s21, 1024  ;;  %p2556_p11 = scmp.lt.s32.totalorder %s341_s21, %s341_s21 }
  0x5f   : > { %p2549_p3 = scmp.ne.s32.totalorder %s341_s21, %s2548_s14  ;;  %p2557_p12 = scmp.lt.s32.totalorder %s2548_s14, %s2548_s14 }
  0x61   : > { %p2551_p4 = pnand %p2549_p3, %p2785_p7  ;;  %p2558_p13 = por %p2557_p12, %p2556_p11 }
  0x63   : > { %p2552_p10 = pneg %p2551_p4 }
  0x65   : > { %p2559_p0 = pnand %p2558_p13, %p2552_p10 }
  0x67   : > { %2562 = shalt.err (!%p2559_p0)
}
  0x68   : > { %2203 = dma.hbm_to_vmem [thread:$0]  (!%p2775_p6), %s3240_s7, 1024, %s341_s21, [#allocation15], %s2676_s24, %s2676_s24, %s2677_s25  }
  0x69   : > { %s1753_s19 = sadd.s32 4294967294, %s2671_s12   ;;  %s2865_s22 = sadd.s32 1, %s2671_s12  }
  0x6a   : > { %s36_s18 = sadd.s32 1, %s2667_s11  ;;  %s33_s23 = ssub.s32 %s2671_s12, %s2865_s22 }
  0x6b   : > { %p43_p7 = scmp.ne.s32.totalorder %s2667_s11, %s2663_s10  ;;  %p34_p2 = scmp.eq.s32.totalorder %s33_s23, 0 }
  0x6c   : > { %p44_p5 = scmp.eq.s32.totalorder %s2671_s12, 0  ;;  %p49_p8 = scmp.ne.s32.totalorder %s2663_s10, %s2659_s30 }
  0x6d   : > { %p241_p9 = scmp.eq.s32.totalorder %s2761_s15, 1  ;;  %p3258_p3 = scmp.eq.s32.totalorder %s2761_s15, 0 }
  0x6e   : > { %s2877_s27 = scalar_select %p34_p2, %s2667_s11, %s36_s18  }
  0x6f   : > { %p45_p1 = por %p44_p5, %p43_p7  ;;  %p2881_p4 = por %p3258_p3, %p49_p8 }
  0x70   : > { %p2885_p6 = por %p241_p9, %p43_p7  ;;  %p247_p10 = scmp.eq.s32.totalorder %s1753_s19, 1 }
  0x71   : > { %s3259_s29 = scalar_select %p2881_p4, 1, 0 }
  0x72   : > { %s3260_s24 = scalar_select %p2885_p6, 1, 0 }
  0x73   : > { %p2219_p11 = scmp.lt.s32.totalorder %s2671_s12, 2  ;;  %s357_s25 = sand.u32 1, %s2667_s11  }
  0x74   : > { %p2891_p12 = por %p247_p10, %p49_p8  ;;  %s1763_s21 = sshll.u32 %s357_s25, 4 }
  0x75   : > { %s1836_s14 = sshll.u32 %s2671_s12, 8  ;;  %s361_s23 = scalar_lea.vmem [#allocation2], %s1763_s21 }
  0x76   : > { %s3261_s13 = scalar_select %p2891_p12, 1, 0 }
  0x77   : > { %s2899_s18 = scalar_lea.hbm %s3233_s0, %s1836_s14  ;;  %s368_s26 = sshll.u32 %s361_s23, 4  ;;  %s2905_s26 = int_to_ptr.vmem [resolvable:$true] %s368_s26 }
  0x78   : > { %p2901_p13 = pnand %p2219_p11, %p45_p1  ;;  %s2907_s28 = scalar_lea.sflag [#allocation3], %s357_s25 }
  0x79   : > { %s2563_s1 = scalar_lea.hbm %s2899_s18, 256  ;;  %s2568_s21 = scalar_lea.hbm %s3233_s0, 512 }
  0x7a   : > { %p2564_p0 = scmp.ne.s32.totalorder %s2899_s18, %s2563_s1  ;;  %p2565_p7 = pneg %p2901_p13 }
  0x7b   : > { %p2569_p8 = scmp.lt.s32.totalorder %s2899_s18, %s3233_s0  ;;  %p2570_p9 = scmp.lt.s32.totalorder %s2568_s21, %s2563_s1 }
  0x7c   : > { %p2566_p2 = pnand %p2565_p7, %p2564_p0 }
  0x7d   : > { %p2571_p1 = por %p2570_p9, %p2569_p8 }
  0x7e   : > { %p2567_p5 = pneg %p2566_p2 }
  0x80   : > { %p2572_p3 = pnand %p2571_p1, %p2567_p5 }
  0x82   : > { %2575 = shalt.err (!%p2572_p3)
}
  0x83   : > { %s2576_s25 = scalar_lea.vmem %s2905_s26, 256  ;;  %s2684_s2 = smov [#allocation2]  }
  0x84   : > { %p2577_p10 = scmp.ne.s32.totalorder %s2905_s26, %s2576_s25  ;;  %s2581_s3 = sshll.u32 %s2684_s2, 4  ;;  %s2582_s3 = int_to_ptr.vmem [resolvable:$false] %s2581_s3 }
  0x85   : > { %s2583_s14 = scalar_lea.vmem %s2582_s3, 512  ;;  %p2584_p2 = scmp.lt.s32.totalorder %s2905_s26, %s2582_s3 }
  0x86   : > { %p2579_p11 = pnand %p2577_p10, %p2565_p7  ;;  %p2585_p12 = scmp.lt.s32.totalorder %s2583_s14, %s2576_s25 }
  0x88   : > { %p2580_p0 = pneg %p2579_p11  ;;  %p2586_p6 = por %p2585_p12, %p2584_p2 }
  0x8a   : > { %p2587_p4 = pnand %p2586_p6, %p2580_p0 }
  0x8c   : > { %2590 = shalt.err (!%p2587_p4)
}
  0x8d   : > { %s3263_s1 = smov 8   ;;  %s3264_s17 = smov 128  }
  0x8e   : > { %2207 = dma.hbm_to_vmem [thread:$0]  (!%p2901_p13), %s2899_s18, 256, %s2905_s26, %s2907_s28, %s3264_s17, %s3264_s17, %s3263_s1  }
  0x8f   : > { %p3265_p7 = scmp.ne.s32.totalorder %s3252_s16, 0 }
  0x90   : > { %s2934_s2 = sand.u32 (!%p3265_p7), 1, %s2663_s10   ;;  %p3266_p4 = scmp.ne.s32.totalorder (!%p3265_p7), %s3259_s29, 0 }
  0x91   : > { %380 = sbr.rel (%p3265_p7) target bundleno = 2404 (0x964), region = 56  ;;  %s1767_s3 = sshll.u32 (!%p3265_p7), %s2934_s2, 4 }
  0x92   : > { %s383_s21 = scalar_lea.sflag (!%p3265_p7), [#allocation3], %s2934_s2  ;;  %s386_s19 = scalar_lea.vmem (!%p3265_p7), [#allocation2], %s1767_s3 }
  0x96   : > { %2634 = dma.done.wait (%p3266_p4), %s383_s21, 256  }
  0x97   : > { %2636 = vsyncadd (%p3266_p4), %s383_s21, 4294967040  ;;  %p3267_p6 = scmp.eq.s32.totalorder %s2761_s15, 0 }
  0x99   : > { %2638 = dma.done.wait (%p3267_p6), [#allocation6], 384   ;;  %p3268_p12 = pmov %p3267_p6 }
  0x9a   : > { %p3269_p13 = pmov %p3267_p6 }
  0x9b   : > { %2640 = vsyncadd (%p3268_p12), [#allocation6], 4294966912 }
  0x9c   : > { %2642 = dma.done.wait (%p3269_p13), [#allocation9], 1152   ;;  %p3270_p5 = pmov %p3267_p6 }
  0x9e   : > { %2644 = vsyncadd (%p3270_p5), [#allocation9], 4294966144  ;;  %p3271_p8 = pmov %p3270_p5 }
  0x9f   : > { %p3272_p9 = pmov %p3270_p5 }
  0xa0   : > { %2646 = dma.done.wait (%p3271_p8), [#allocation12], 3456  }
  0xa1   : > { %2648 = vsyncadd (%p3272_p9), [#allocation12], 4294963840  ;;  %p3273_p1 = pmov %p3270_p5 }
  0xa3   : > { %2650 = dma.done.wait (%p3273_p1), [#allocation15], 1024   ;;  %p3274_p3 = pmov %p3273_p1 }
  0xa4   : > { %v2685_v0 = vmov 0.0   ;;  %vm2686_vm0 = vmmov 0   ;;  %v2275_v1 = vld [vmem:[#allocation5 + $0x8] sm:$0xff]   ;;  %v2276_v2 = vld [vmem:[#allocation5] sm:$0xff]   ;;  %vm476_vm1 = vcmask 261120   ;;  %v460_v7 = vlaneseq  ;;  %v2979_v10 = vld [vmem:[#allocation7] sm:$0xff] }
  0xa5   : > { %2652 = vsyncadd (%p3274_p3), [#allocation15], 4294966272  ;;  %1934 = vmatprep.subr.bf16.mxu0 %v2685_v0  ;;  %1942 = vmatprep.subr.bf16.mxu1 %v2685_v0  ;;  %v452_v3 = vld [vmem:[%s386_s19] sm:$0xff]  ;;  %v453_v4 = vld [vmem:[%s386_s19 + $0x8] sm:$0xff]  ;;  %s1837_s28 = sshll.u32 %s2761_s15, 8  ;;  %s448_s29 = scalar_lea.vmem [#allocation16], %s1767_s3 }
  0xa6   : > { %1938 = vmatprep.mubr.msk.bf16.mxu0 %vm2686_vm0, %v2685_v0  ;;  %1946 = vmatprep.mubr.msk.bf16.mxu1 %vm2686_vm0, %v2685_v0  ;;  %v459_v5 = vpack.c.bf16 %v452_v3, %v452_v3  ;;  %v552_v6 = vpack.c.bf16 %v453_v4, %v453_v4  ;;  %v2974_v8 = vshrl.u32 %v460_v7, 7  ;;  %v2277_v24 = vld [vmem:[#allocation8 + $0x38] sm:$0xff]   ;;  %v2278_v25 = vld [vmem:[#allocation8 + $0x30] sm:$0xff]   ;;  %v2279_v26 = vld [vmem:[#allocation8 + $0x28] sm:$0xff]   ;;  %s1613_s18 = sshll.u32 %s448_s29, 4  ;;  %s3188_s25 = scalar_lea.hbm %s3242_s9, %s1837_s28  ;;  %s3190_s18 = int_to_ptr.vmem [resolvable:$true] %s1613_s18 }
  0xa7   : > { %1935 = vmatpush3.bf16.msra.mxu0 %v2275_v1  ;;  %1943 = vmatpush3.bf16.msra.mxu1 %v2275_v1  ;;  %v2280_v27 = vld [vmem:[#allocation8 + $0x20] sm:$0xff]   ;;  %v2281_v28 = vld [vmem:[#allocation8 + $0x18] sm:$0xff]   ;;  %v2282_v29 = vld [vmem:[#allocation8 + $0x10] sm:$0xff]   ;;  %s1600_s14 = scalar_lea.sflag [#allocation4], %s2934_s2  ;;  %s2591_s1 = scalar_lea.vmem %s3190_s18, 256 }
  0xa8   : > { %1936 = vmatprep.subr.bf16.mxu0 %v2685_v0  ;;  %1944 = vmatprep.subr.bf16.mxu1 %v2685_v0  ;;  %v2977_v9 = vsub.s32 0, %v2974_v8  ;;  %v2283_v30 = vld [vmem:[#allocation8 + $0x8] sm:$0xff]   ;;  %v2284_v31 = vld [vmem:[#allocation8] sm:$0xff]   ;;  %v3010_v48 = vsub.s32 1, %v2974_v8  ;;  %v3013_v49 = vsub.s32 2, %v2974_v8  ;;  %p2592_p10 = scmp.ne.s32.totalorder %s3190_s18, %s2591_s1  ;;  %p3275_p11 = scmp.ne.s32.totalorder %s3260_s24, 0 }
  0xa9   : > { %s2687_s15 = smov [#allocation16]  }
  0xaa   : > { %v463_v11 = vrot.slane %v2979_v10, %v2977_v9  ;;  %v538_v50 = vrot.slane %v2979_v10, %v3010_v48  ;;  %v543_v53 = vrot.slane %v2979_v10, %v3013_v49  ;;  %p2593_p0 = pnand %p2592_p10, %p3275_p11  ;;  %s2595_s17 = sshll.u32 %s2687_s15, 4  ;;  %s2596_s17 = int_to_ptr.vmem [resolvable:$false] %s2595_s17 }
  0xab   : > { %1937 = vmatpush3.bf16.msra.mxu0 %v2276_v2  ;;  %1945 = vmatpush3.bf16.msra.mxu1 %v2276_v2  ;;  %s2597_s3 = scalar_lea.vmem %s2596_s17, 512  ;;  %p2598_p7 = scmp.lt.s32.totalorder %s3190_s18, %s2596_s17 }
  0xac   : > { %1950 = vmatprep.subr.bf16.mxu0 %v2685_v0  ;;  %1970 = vmatprep.subr.bf16.mxu1 %v2685_v0  ;;  %p2594_p2 = pneg %p2593_p0  ;;  %p2599_p4 = scmp.lt.s32.totalorder %s2597_s3, %s2591_s1 }
  0xae   : > { %1939 = vmatmul.mubr.msk.bf16.vlgmr.msra.gmra.mxu0 %vm476_vm1, %v459_v5  ;;  %1947 = vmatmul.mubr.msk.bf16.vlgmr.msra.gmra.mxu1 %vm476_vm1, %v552_v6  ;;  %p2600_p6 = por %p2599_p4, %p2598_p7 }
  0xaf   : > { %1966 = vmatprep.mubr.msk.bf16.mxu0 %vm2686_vm0, %v2685_v0  ;;  %1986 = vmatprep.mubr.msk.bf16.mxu1 %vm2686_vm0, %v2685_v0 }
  0xb0   : > { %1951 = vmatpush3.bf16.msra.mxu0 %v2277_v24  ;;  %1971 = vmatpush3.bf16.msra.mxu1 %v2277_v24  ;;  %p2601_p12 = pnand %p2600_p6, %p2594_p2 }
  0xb1   : > { %1952 = vmatprep.subr.bf16.mxu0 %v2685_v0  ;;  %1972 = vmatprep.subr.bf16.mxu1 %v2685_v0 }
  0xb4   : > { %1953 = vmatpush3.bf16.msra.mxu0 %v2278_v25  ;;  %1973 = vmatpush3.bf16.msra.mxu1 %v2278_v25 }
  0xb5   : > { %1954 = vmatprep.subr.bf16.mxu0 %v2685_v0  ;;  %1974 = vmatprep.subr.bf16.mxu1 %v2685_v0 }
  0xb8   : > { %1955 = vmatpush3.bf16.msra.mxu0 %v2279_v26  ;;  %1975 = vmatpush3.bf16.msra.mxu1 %v2279_v26  ;;  %v2285_v26 = vld [vmem:[#allocation11 + $0x38] sm:$0xff]  }
  0xb9   : > { %1956 = vmatprep.subr.bf16.mxu0 %v2685_v0  ;;  %1976 = vmatprep.subr.bf16.mxu1 %v2685_v0 }
  0xbc   : > { %1957 = vmatpush3.bf16.msra.mxu0 %v2280_v27  ;;  %1977 = vmatpush3.bf16.msra.mxu1 %v2280_v27  ;;  %v2286_v27 = vld [vmem:[#allocation11 + $0x30] sm:$0xff]  }
  0xbd   : > { %1958 = vmatprep.subr.bf16.mxu0 %v2685_v0  ;;  %1978 = vmatprep.subr.bf16.mxu1 %v2685_v0 }
  0xc0   : > { %1959 = vmatpush3.bf16.msra.mxu0 %v2281_v28  ;;  %1979 = vmatpush3.bf16.msra.mxu1 %v2281_v28  ;;  %v2287_v28 = vld [vmem:[#allocation11 + $0x28] sm:$0xff]  }
  0xc1   : > { %1960 = vmatprep.subr.bf16.mxu0 %v2685_v0  ;;  %1980 = vmatprep.subr.bf16.mxu1 %v2685_v0 }
  0xc4   : > { %1961 = vmatpush3.bf16.msra.mxu0 %v2282_v29  ;;  %1981 = vmatpush3.bf16.msra.mxu1 %v2282_v29  ;;  %v2288_v29 = vld [vmem:[#allocation11 + $0x20] sm:$0xff]  }
  0xc5   : > { %1962 = vmatprep.subr.bf16.mxu0 %v2685_v0  ;;  %1982 = vmatprep.subr.bf16.mxu1 %v2685_v0 }
  0xc8   : > { %1963 = vmatpush3.bf16.msra.mxu0 %v2283_v30  ;;  %1983 = vmatpush3.bf16.msra.mxu1 %v2283_v30  ;;  %v2289_v30 = vld [vmem:[#allocation11 + $0x18] sm:$0xff]  }
  0xc9   : > { %1964 = vmatprep.subr.bf16.mxu0 %v2685_v0  ;;  %1984 = vmatprep.subr.bf16.mxu1 %v2685_v0 }
  0xcc   : > { %1965 = vmatpush3.bf16.msra.mxu0 %v2284_v31  ;;  %1985 = vmatpush3.bf16.msra.mxu1 %v2284_v31  ;;  %v2290_v31 = vld [vmem:[#allocation11 + $0x10] sm:$0xff]  }
  0xcd   : > { %1990 = vmatprep.subr.bf16.mxu0 %v2685_v0  ;;  %2010 = vmatprep.subr.bf16.mxu1 %v2685_v0 }
 0x16e   : > { %v514_v12 = vpop.f32.mrf.mxu0  ;;  %v590_v13 = vpop.f32.mrf.mxu1 }
 0x16f   : > { %v2983_v14 = vadd.f32 %v514_v12, %v463_v11  ;;  %v2985_v15 = vadd.f32 %v590_v13, %v463_v11  ;;  %v3025_v12 = vld [vmem:[#allocation10] sm:$0xff] }
 0x170   : > { %v1940_v16 = vpop.f32.mrf.mxu0  ;;  %v1948_v17 = vpop.f32.mrf.mxu1  ;;  %v640_v13 = vrot.slane %v3025_v12, %v2977_v9 }
 0x171   : > { %520 = vadd.xlane.f32.xlu0 %v2983_v14  ;;  %v522_v18 = vmul.f32 %v2983_v14, %v2983_v14  ;;  %v598_v21 = vmul.f32 %v2985_v15, %v2985_v15 }
 0x172   : > { %v517_v19 = vpop.f32.mrf.mxu0  ;;  %v593_v20 = vpop.f32.mrf.mxu1 }
 0x173   : > { %523 = vadd.xlane.f32.xlu1 %v522_v18 }
 0x174   : > { %v1941_v22 = vpop.f32.mrf.mxu0  ;;  %v1949_v23 = vpop.f32.mrf.mxu1 }
 0x175   : > { %596 = vadd.xlane.f32.xlu0 %v2985_v15 }
 0x177   : > { %599 = vadd.xlane.f32.xlu1 %v598_v21 }
 0x1fa   : > { %v521_v32 = vpop.xlane.xlu0 %520 }
 0x1fb   : > { %v526_v33 = vmul.f32 0.020833334, %v521_v32  ;;  %v2291_v32 = vld [vmem:[#allocation11 + $0x8] sm:$0xff]  }
 0x1fc   : > { %v524_v34 = vpop.xlane.xlu1 %523 }
 0x1fd   : > { %v528_v35 = vmul.f32 %v526_v33, %v526_v33  ;;  %v527_v36 = vmul.f32 0.020833334, %v524_v34  ;;  %v533_v51 = vsub.f32 %v2983_v14, %v526_v33  ;;  %v2292_v33 = vld [vmem:[#allocation11] sm:$0xff]  }
 0x1fe   : > { %v597_v37 = vpop.xlane.xlu0 %596 }
 0x1ff   : > { %v529_v38 = vsub.f32 %v527_v36, %v528_v35  ;;  %v601_v39 = vmul.f32 0.020833334, %v597_v37 }
 0x200   : > { %v600_v40 = vpop.xlane.xlu1 %599 }
 0x201   : > { %v530_v41 = vmax.f32 %v529_v38, 0.0  ;;  %v603_v42 = vmul.f32 %v601_v39, %v601_v39  ;;  %v602_v43 = vmul.f32 0.020833334, %v600_v40  ;;  %v608_v55 = vsub.f32 %v2985_v15, %v601_v39 }
 0x203   : > { %v531_v44 = vadd.f32 1e-05, %v530_v41  ;;  %v604_v45 = vsub.f32 %v602_v43, %v603_v42 }
 0x205   : > { %2317 = vrsqrt.f32 %v531_v44  ;;  %v605_v46 = vmax.f32 %v604_v45, 0.0 }
 0x207   : > { %v606_v47 = vadd.f32 1e-05, %v605_v46 }
 0x209   : > { %2319 = vrsqrt.f32 %v606_v47 }
 0x212   : > { %v2318_v52 = vpop.eup %2317 }
 0x213   : > { %v534_v54 = vmul.f32 %v2318_v52, %v533_v51  ;;  %v747_v52 = vrot.slane %v3025_v12, %v3010_v48 }
 0x215   : > { %v539_v56 = vmul.f32 %v538_v50, %v534_v54 }
 0x216   : > { %v2320_v57 = vpop.eup %2319 }
 0x217   : > { %v544_v58 = vadd.f32 %v543_v53, %v539_v56  ;;  %v609_v59 = vmul.f32 %v2320_v57, %v608_v55  ;;  %v752_v55 = vrot.slane %v3025_v12, %v3013_v49 }
 0x219   : > { %v1779_v60 = vmul.f32 -1.442695, %v544_v58  ;;  %v610_v61 = vmul.f32 %v609_v59, %v538_v50 }
 0x21b   : > { %2321 = vpow2.f32 %v1779_v60  ;;  %v611_v62 = vadd.f32 %v610_v61, %v543_v53 }
 0x21d   : > { %v1781_v63 = vmul.f32 -1.442695, %v611_v62 }
 0x21f   : > { %2323 = vpow2.f32 %v1781_v63 }
 0x228   : > { %v2322_v1 = vpop.eup %2321 }
 0x229   : > { %v548_v2 = vadd.f32 1.0, %v2322_v1 }
 0x22b   : > { %2325 = vrcp.f32 %v548_v2 }
 0x22c   : > { %v2324_v3 = vpop.eup %2323 }
 0x22d   : > { %v615_v4 = vadd.f32 1.0, %v2324_v3 }
 0x22f   : > { %2327 = vrcp.f32 %v615_v4 }
 0x238   : > { %v2326_v5 = vpop.eup %2325 }
 0x239   : > { %v551_v6 = vmul.f32 %v2326_v5, %v544_v58 }
 0x23b   : > { %v636_v7 = vpack.c.bf16 %v551_v6, %v551_v6 }
 0x23c   : > { %v2328_v8 = vpop.eup %2327 }
 0x23d   : > { %1967 = vmatmul.mubr.bf16.vlgmr.msra.gmra.mxu0 %v636_v7  ;;  %v618_v10 = vmul.f32 %v2328_v8, %v611_v62 }
 0x23e   : > { %2006 = vmatprep.mubr.msk.bf16.mxu0 %vm2686_vm0, %v2685_v0  ;;  %1991 = vmatpush3.bf16.msra.mxu0 %v2285_v26 }
 0x23f   : > { %v761_v11 = vpack.c.bf16 %v618_v10, %v618_v10  ;;  %1992 = vmatprep.subr.bf16.mxu0 %v2685_v0 }
 0x241   : > { %1987 = vmatmul.mubr.bf16.vlgmr.msra.gmra.mxu1 %v761_v11 }
 0x242   : > { %2026 = vmatprep.mubr.msk.bf16.mxu1 %vm2686_vm0, %v2685_v0  ;;  %2011 = vmatpush3.bf16.msra.mxu1 %v2285_v26 }
 0x243   : > { %2012 = vmatprep.subr.bf16.mxu1 %v2685_v0  ;;  %1993 = vmatpush3.bf16.msra.mxu0 %v2286_v27 }
 0x244   : > { %1994 = vmatprep.subr.bf16.mxu0 %v2685_v0 }
 0x246   : > { %2013 = vmatpush3.bf16.msra.mxu1 %v2286_v27 }
 0x247   : > { %2014 = vmatprep.subr.bf16.mxu1 %v2685_v0  ;;  %1995 = vmatpush3.bf16.msra.mxu0 %v2287_v28 }
 0x248   : > { %1996 = vmatprep.subr.bf16.mxu0 %v2685_v0 }
 0x24a   : > { %2015 = vmatpush3.bf16.msra.mxu1 %v2287_v28  ;;  %v2293_v28 = vld [vmem:[#allocation11 + $0x78] sm:$0xff]  }
 0x24b   : > { %2016 = vmatprep.subr.bf16.mxu1 %v2685_v0  ;;  %1997 = vmatpush3.bf16.msra.mxu0 %v2288_v29 }
 0x24c   : > { %1998 = vmatprep.subr.bf16.mxu0 %v2685_v0 }
 0x24e   : > { %2017 = vmatpush3.bf16.msra.mxu1 %v2288_v29  ;;  %v2294_v29 = vld [vmem:[#allocation11 + $0x70] sm:$0xff]  }
 0x24f   : > { %2018 = vmatprep.subr.bf16.mxu1 %v2685_v0  ;;  %1999 = vmatpush3.bf16.msra.mxu0 %v2289_v30 }
 0x250   : > { %2000 = vmatprep.subr.bf16.mxu0 %v2685_v0 }
 0x252   : > { %2019 = vmatpush3.bf16.msra.mxu1 %v2289_v30  ;;  %v2295_v30 = vld [vmem:[#allocation11 + $0x68] sm:$0xff]  }
 0x253   : > { %2020 = vmatprep.subr.bf16.mxu1 %v2685_v0  ;;  %2001 = vmatpush3.bf16.msra.mxu0 %v2290_v31 }
 0x254   : > { %2002 = vmatprep.subr.bf16.mxu0 %v2685_v0 }
 0x256   : > { %2021 = vmatpush3.bf16.msra.mxu1 %v2290_v31  ;;  %v2296_v31 = vld [vmem:[#allocation11 + $0x60] sm:$0xff]  }
 0x257   : > { %2022 = vmatprep.subr.bf16.mxu1 %v2685_v0  ;;  %2003 = vmatpush3.bf16.msra.mxu0 %v2291_v32 }
 0x258   : > { %2004 = vmatprep.subr.bf16.mxu0 %v2685_v0 }
 0x25a   : > { %2023 = vmatpush3.bf16.msra.mxu1 %v2291_v32  ;;  %v2297_v32 = vld [vmem:[#allocation11 + $0x58] sm:$0xff]  }
 0x25b   : > { %2024 = vmatprep.subr.bf16.mxu1 %v2685_v0  ;;  %2005 = vmatpush3.bf16.msra.mxu0 %v2292_v33 }
 0x25c   : > { %2030 = vmatprep.subr.bf16.mxu0 %v2685_v0 }
 0x25e   : > { %2025 = vmatpush3.bf16.msra.mxu1 %v2292_v33  ;;  %v2298_v33 = vld [vmem:[#allocation11 + $0x50] sm:$0xff]  }
 0x25f   : > { %2050 = vmatprep.subr.bf16.mxu1 %v2685_v0 }
 0x2fd   : > { %v723_v14 = vpop.f32.mrf.mxu0 }
 0x2fe   : > { %v3029_v15 = vadd.f32 %v723_v14, %v640_v13  ;;  %v3065_v14 = vld [vmem:[#allocation13] sm:$0xff] }
 0x2ff   : > { %v1968_v16 = vpop.f32.mrf.mxu0 }
 0x300   : > { %729 = vadd.xlane.f32.xlu0 %v3029_v15  ;;  %v731_v20 = vmul.f32 %v3029_v15, %v3029_v15 }
 0x301   : > { %v726_v17 = vpop.f32.mrf.mxu0  ;;  %v796_v18 = vpop.f32.mrf.mxu1 }
 0x302   : > { %v3032_v19 = vadd.f32 %v796_v18, %v640_v13 }
 0x303   : > { %v1969_v21 = vpop.f32.mrf.mxu0  ;;  %v1988_v22 = vpop.f32.mrf.mxu1 }
 0x304   : > { %802 = vadd.xlane.f32.xlu1 %v3032_v19  ;;  %732 = vadd.xlane.f32.xlu0 %v731_v20  ;;  %v804_v24 = vmul.f32 %v3032_v19, %v3032_v19 }
 0x305   : > { %v799_v23 = vpop.f32.mrf.mxu1 }
 0x307   : > { %v1989_v25 = vpop.f32.mrf.mxu1 }
 0x308   : > { %805 = vadd.xlane.f32.xlu1 %v804_v24 }
 0x389   : > { %v730_v34 = vpop.xlane.xlu0 %729 }
 0x38a   : > { %v735_v35 = vmul.f32 0.015625, %v730_v34  ;;  %v2299_v34 = vld [vmem:[#allocation11 + $0x48] sm:$0xff]  }
 0x38c   : > { %v737_v38 = vmul.f32 %v735_v35, %v735_v35  ;;  %v742_v53 = vsub.f32 %v3029_v15, %v735_v35  ;;  %v846_v15 = vrot.slane %v3065_v14, %v2977_v9  ;;  %v2300_v35 = vld [vmem:[#allocation11 + $0x40] sm:$0xff]  }
 0x38d   : > { %v803_v36 = vpop.xlane.xlu1 %802  ;;  %v733_v37 = vpop.xlane.xlu0 %732 }
 0x38e   : > { %v807_v39 = vmul.f32 0.015625, %v803_v36  ;;  %v736_v40 = vmul.f32 0.015625, %v733_v37 }
 0x390   : > { %v738_v41 = vsub.f32 %v736_v40, %v737_v38  ;;  %v809_v43 = vmul.f32 %v807_v39, %v807_v39  ;;  %v814_v57 = vsub.f32 %v3032_v19, %v807_v39 }
 0x391   : > { %v806_v42 = vpop.xlane.xlu1 %805 }
 0x392   : > { %v739_v44 = vmax.f32 %v738_v41, 0.0  ;;  %v808_v45 = vmul.f32 0.015625, %v806_v42 }
 0x394   : > { %v740_v46 = vadd.f32 1e-05, %v739_v44  ;;  %v810_v47 = vsub.f32 %v808_v45, %v809_v43 }
 0x396   : > { %2329 = vrsqrt.f32 %v740_v46  ;;  %v811_v50 = vmax.f32 %v810_v47, 0.0 }
 0x398   : > { %v812_v51 = vadd.f32 1e-05, %v811_v50 }
 0x39a   : > { %2331 = vrsqrt.f32 %v812_v51 }
 0x3a3   : > { %v2330_v54 = vpop.eup %2329 }
 0x3a4   : > { %v743_v56 = vmul.f32 %v2330_v54, %v742_v53  ;;  %v952_v54 = vrot.slane %v3065_v14, %v3010_v48 }
 0x3a6   : > { %v748_v58 = vmul.f32 %v747_v52, %v743_v56 }
 0x3a7   : > { %v2332_v59 = vpop.eup %2331 }
 0x3a8   : > { %v753_v60 = vadd.f32 %v752_v55, %v748_v58  ;;  %v815_v61 = vmul.f32 %v2332_v59, %v814_v57  ;;  %v957_v57 = vrot.slane %v3065_v14, %v3013_v49 }
 0x3aa   : > { %v1790_v62 = vmul.f32 -1.442695, %v753_v60  ;;  %v816_v63 = vmul.f32 %v815_v61, %v747_v52 }
 0x3ac   : > { %2333 = vpow2.f32 %v1790_v62  ;;  %v817_v1 = vadd.f32 %v816_v63, %v752_v55 }
 0x3ae   : > { %v1791_v2 = vmul.f32 -1.442695, %v817_v1 }
 0x3b0   : > { %2335 = vpow2.f32 %v1791_v2 }
 0x3b9   : > { %v2334_v3 = vpop.eup %2333 }
 0x3ba   : > { %v757_v4 = vadd.f32 1.0, %v2334_v3 }
 0x3bc   : > { %2337 = vrcp.f32 %v757_v4 }
 0x3bd   : > { %v2336_v5 = vpop.eup %2335 }
 0x3be   : > { %v821_v6 = vadd.f32 1.0, %v2336_v5 }
 0x3c0   : > { %2339 = vrcp.f32 %v821_v6 }
 0x3c9   : > { %v2338_v7 = vpop.eup %2337 }
 0x3ca   : > { %v760_v8 = vmul.f32 %v2338_v7, %v753_v60 }
 0x3cc   : > { %v842_v10 = vpack.c.bf16 %v760_v8, %v760_v8 }
 0x3cd   : > { %v2340_v11 = vpop.eup %2339 }
 0x3ce   : > { %2007 = vmatmul.mubr.bf16.vlgmr.msra.gmra.mxu0 %v842_v10  ;;  %v824_v12 = vmul.f32 %v2340_v11, %v817_v1 }
 0x3cf   : > { %2046 = vmatprep.mubr.msk.bf16.mxu0 %vm2686_vm0, %v2685_v0  ;;  %2031 = vmatpush3.bf16.msra.mxu0 %v2293_v28 }
 0x3d0   : > { %v966_v13 = vpack.c.bf16 %v824_v12, %v824_v12  ;;  %2032 = vmatprep.subr.bf16.mxu0 %v2685_v0 }
 0x3d2   : > { %2027 = vmatmul.mubr.bf16.vlgmr.msra.gmra.mxu1 %v966_v13 }
 0x3d3   : > { %2066 = vmatprep.mubr.msk.bf16.mxu1 %vm2686_vm0, %v2685_v0  ;;  %2051 = vmatpush3.bf16.msra.mxu1 %v2293_v28 }
 0x3d4   : > { %2052 = vmatprep.subr.bf16.mxu1 %v2685_v0  ;;  %2033 = vmatpush3.bf16.msra.mxu0 %v2294_v29 }
 0x3d5   : > { %2034 = vmatprep.subr.bf16.mxu0 %v2685_v0 }
 0x3d7   : > { %2053 = vmatpush3.bf16.msra.mxu1 %v2294_v29 }
 0x3d8   : > { %2054 = vmatprep.subr.bf16.mxu1 %v2685_v0  ;;  %2035 = vmatpush3.bf16.msra.mxu0 %v2295_v30 }
 0x3d9   : > { %2036 = vmatprep.subr.bf16.mxu0 %v2685_v0 }
 0x3db   : > { %2055 = vmatpush3.bf16.msra.mxu1 %v2295_v30  ;;  %v2301_v30 = vld [vmem:[#allocation11 + $0xb8] sm:$0xff]  }
 0x3dc   : > { %2056 = vmatprep.subr.bf16.mxu1 %v2685_v0  ;;  %2037 = vmatpush3.bf16.msra.mxu0 %v2296_v31 }
 0x3dd   : > { %2038 = vmatprep.subr.bf16.mxu0 %v2685_v0 }
 0x3df   : > { %2057 = vmatpush3.bf16.msra.mxu1 %v2296_v31  ;;  %v2302_v31 = vld [vmem:[#allocation11 + $0xb0] sm:$0xff]  }
 0x3e0   : > { %2058 = vmatprep.subr.bf16.mxu1 %v2685_v0  ;;  %2039 = vmatpush3.bf16.msra.mxu0 %v2297_v32 }
 0x3e1   : > { %2040 = vmatprep.subr.bf16.mxu0 %v2685_v0 }
 0x3e3   : > { %2059 = vmatpush3.bf16.msra.mxu1 %v2297_v32  ;;  %v2303_v32 = vld [vmem:[#allocation11 + $0xa8] sm:$0xff]  }
 0x3e4   : > { %2060 = vmatprep.subr.bf16.mxu1 %v2685_v0  ;;  %2041 = vmatpush3.bf16.msra.mxu0 %v2298_v33 }
 0x3e5   : > { %2042 = vmatprep.subr.bf16.mxu0 %v2685_v0 }
 0x3e7   : > { %2061 = vmatpush3.bf16.msra.mxu1 %v2298_v33  ;;  %v2304_v33 = vld [vmem:[#allocation11 + $0xa0] sm:$0xff]  }
 0x3e8   : > { %2062 = vmatprep.subr.bf16.mxu1 %v2685_v0  ;;  %2043 = vmatpush3.bf16.msra.mxu0 %v2299_v34 }
 0x3e9   : > { %2044 = vmatprep.subr.bf16.mxu0 %v2685_v0 }
 0x3eb   : > { %2063 = vmatpush3.bf16.msra.mxu1 %v2299_v34  ;;  %v2305_v34 = vld [vmem:[#allocation11 + $0x98] sm:$0xff]  }
 0x3ec   : > { %2064 = vmatprep.subr.bf16.mxu1 %v2685_v0  ;;  %2045 = vmatpush3.bf16.msra.mxu0 %v2300_v35 }
 0x3ed   : > { %2070 = vmatprep.subr.bf16.mxu0 %v2685_v0 }
 0x3ef   : > { %2065 = vmatpush3.bf16.msra.mxu1 %v2300_v35  ;;  %v2306_v35 = vld [vmem:[#allocation11 + $0x90] sm:$0xff]  }
 0x3f0   : > { %2090 = vmatprep.subr.bf16.mxu1 %v2685_v0 }
 0x48e   : > { %v929_v16 = vpop.f32.mrf.mxu0 }
 0x48f   : > { %v3069_v17 = vadd.f32 %v929_v16, %v846_v15  ;;  %v3105_v16 = vld [vmem:[#allocation13 + $0x8] sm:$0xff] }
 0x490   : > { %v2008_v18 = vpop.f32.mrf.mxu0 }
 0x491   : > { %935 = vadd.xlane.f32.xlu0 %v3069_v17  ;;  %v937_v22 = vmul.f32 %v3069_v17, %v3069_v17 }
 0x492   : > { %v932_v19 = vpop.f32.mrf.mxu0  ;;  %v1001_v20 = vpop.f32.mrf.mxu1 }
 0x493   : > { %v3072_v21 = vadd.f32 %v1001_v20, %v846_v15 }
 0x494   : > { %v2009_v23 = vpop.f32.mrf.mxu0  ;;  %v2028_v24 = vpop.f32.mrf.mxu1 }
 0x495   : > { %1007 = vadd.xlane.f32.xlu1 %v3072_v21  ;;  %938 = vadd.xlane.f32.xlu0 %v937_v22  ;;  %v1009_v26 = vmul.f32 %v3072_v21, %v3072_v21 }
 0x496   : > { %v1004_v25 = vpop.f32.mrf.mxu1 }
 0x498   : > { %v2029_v27 = vpop.f32.mrf.mxu1 }
 0x499   : > { %1010 = vadd.xlane.f32.xlu1 %v1009_v26 }
 0x51a   : > { %v936_v36 = vpop.xlane.xlu0 %935 }
 0x51b   : > { %v940_v37 = vmul.f32 0.015625, %v936_v36  ;;  %v2307_v36 = vld [vmem:[#allocation11 + $0x88] sm:$0xff]  }
 0x51d   : > { %v942_v40 = vmul.f32 %v940_v37, %v940_v37  ;;  %v947_v55 = vsub.f32 %v3069_v17, %v940_v37  ;;  %v1053_v17 = vrot.slane %v3105_v16, %v2977_v9  ;;  %v2308_v37 = vld [vmem:[#allocation11 + $0x80] sm:$0xff]  }
 0x51e   : > { %v1008_v38 = vpop.xlane.xlu1 %1007  ;;  %v939_v39 = vpop.xlane.xlu0 %938 }
 0x51f   : > { %v1012_v41 = vmul.f32 0.015625, %v1008_v38  ;;  %v941_v42 = vmul.f32 0.015625, %v939_v39 }
 0x521   : > { %v943_v43 = vsub.f32 %v941_v42, %v942_v40  ;;  %v1014_v45 = vmul.f32 %v1012_v41, %v1012_v41  ;;  %v1019_v59 = vsub.f32 %v3072_v21, %v1012_v41 }
 0x522   : > { %v1011_v44 = vpop.xlane.xlu1 %1010 }
 0x523   : > { %v944_v46 = vmax.f32 %v943_v43, 0.0  ;;  %v1013_v47 = vmul.f32 0.015625, %v1011_v44 }
 0x525   : > { %v945_v50 = vadd.f32 1e-05, %v944_v46  ;;  %v1015_v51 = vsub.f32 %v1013_v47, %v1014_v45 }
 0x527   : > { %2341 = vrsqrt.f32 %v945_v50  ;;  %v1016_v52 = vmax.f32 %v1015_v51, 0.0 }
 0x529   : > { %v1017_v53 = vadd.f32 1e-05, %v1016_v52 }
 0x52b   : > { %2343 = vrsqrt.f32 %v1017_v53 }
 0x534   : > { %v2342_v56 = vpop.eup %2341 }
 0x535   : > { %v948_v58 = vmul.f32 %v2342_v56, %v947_v55  ;;  %v1159_v56 = vrot.slane %v3105_v16, %v3010_v48 }
 0x537   : > { %v953_v60 = vmul.f32 %v952_v54, %v948_v58 }
 0x538   : > { %v2344_v61 = vpop.eup %2343 }
 0x539   : > { %v958_v62 = vadd.f32 %v957_v57, %v953_v60  ;;  %v1020_v63 = vmul.f32 %v2344_v61, %v1019_v59  ;;  %v1164_v59 = vrot.slane %v3105_v16, %v3013_v49 }
 0x53b   : > { %v1800_v1 = vmul.f32 -1.442695, %v958_v62  ;;  %v1021_v2 = vmul.f32 %v1020_v63, %v952_v54 }
 0x53d   : > { %2345 = vpow2.f32 %v1800_v1  ;;  %v1022_v3 = vadd.f32 %v1021_v2, %v957_v57 }
 0x53f   : > { %v1801_v4 = vmul.f32 -1.442695, %v1022_v3 }
 0x541   : > { %2347 = vpow2.f32 %v1801_v4 }
 0x54a   : > { %v2346_v5 = vpop.eup %2345 }
 0x54b   : > { %v962_v6 = vadd.f32 1.0, %v2346_v5 }
 0x54d   : > { %2349 = vrcp.f32 %v962_v6 }
 0x54e   : > { %v2348_v7 = vpop.eup %2347 }
 0x54f   : > { %v1026_v8 = vadd.f32 1.0, %v2348_v7 }
 0x551   : > { %2351 = vrcp.f32 %v1026_v8 }
 0x55a   : > { %v2350_v10 = vpop.eup %2349 }
 0x55b   : > { %v965_v11 = vmul.f32 %v2350_v10, %v958_v62 }
 0x55d   : > { %v1049_v12 = vpack.c.bf16 %v965_v11, %v965_v11 }
 0x55e   : > { %v2352_v13 = vpop.eup %2351 }
 0x55f   : > { %2047 = vmatmul.mubr.bf16.vlgmr.msra.gmra.mxu0 %v1049_v12  ;;  %v1029_v14 = vmul.f32 %v2352_v13, %v1022_v3 }
 0x560   : > { %2086 = vmatprep.mubr.msk.bf16.mxu0 %vm2686_vm0, %v2685_v0  ;;  %2071 = vmatpush3.bf16.msra.mxu0 %v2301_v30 }
 0x561   : > { %v1173_v15 = vpack.c.bf16 %v1029_v14, %v1029_v14  ;;  %2072 = vmatprep.subr.bf16.mxu0 %v2685_v0 }
 0x563   : > { %2067 = vmatmul.mubr.bf16.vlgmr.msra.gmra.mxu1 %v1173_v15 }
 0x564   : > { %2106 = vmatprep.mubr.msk.bf16.mxu1 %vm2686_vm0, %v2685_v0  ;;  %2091 = vmatpush3.bf16.msra.mxu1 %v2301_v30 }
 0x565   : > { %2092 = vmatprep.subr.bf16.mxu1 %v2685_v0  ;;  %2073 = vmatpush3.bf16.msra.mxu0 %v2302_v31 }
 0x566   : > { %2074 = vmatprep.subr.bf16.mxu0 %v2685_v0 }
 0x568   : > { %2093 = vmatpush3.bf16.msra.mxu1 %v2302_v31  ;;  %v2309_v31 = vld [vmem:[#allocation14 + $0x38] sm:$0xff]  }
 0x569   : > { %2094 = vmatprep.subr.bf16.mxu1 %v2685_v0  ;;  %2075 = vmatpush3.bf16.msra.mxu0 %v2303_v32 }
 0x56a   : > { %2076 = vmatprep.subr.bf16.mxu0 %v2685_v0 }
 0x56c   : > { %2095 = vmatpush3.bf16.msra.mxu1 %v2303_v32  ;;  %v2310_v32 = vld [vmem:[#allocation14 + $0x30] sm:$0xff]  }
 0x56d   : > { %2096 = vmatprep.subr.bf16.mxu1 %v2685_v0  ;;  %2077 = vmatpush3.bf16.msra.mxu0 %v2304_v33 }
 0x56e   : > { %2078 = vmatprep.subr.bf16.mxu0 %v2685_v0 }
 0x570   : > { %2097 = vmatpush3.bf16.msra.mxu1 %v2304_v33  ;;  %v2311_v33 = vld [vmem:[#allocation14 + $0x28] sm:$0xff]  }
 0x571   : > { %2098 = vmatprep.subr.bf16.mxu1 %v2685_v0  ;;  %2079 = vmatpush3.bf16.msra.mxu0 %v2305_v34 }
 0x572   : > { %2080 = vmatprep.subr.bf16.mxu0 %v2685_v0 }
 0x574   : > { %2099 = vmatpush3.bf16.msra.mxu1 %v2305_v34  ;;  %v2312_v34 = vld [vmem:[#allocation14 + $0x20] sm:$0xff]  }
 0x575   : > { %2100 = vmatprep.subr.bf16.mxu1 %v2685_v0  ;;  %2081 = vmatpush3.bf16.msra.mxu0 %v2306_v35 }
 0x576   : > { %2082 = vmatprep.subr.bf16.mxu0 %v2685_v0 }
 0x578   : > { %2101 = vmatpush3.bf16.msra.mxu1 %v2306_v35  ;;  %v2313_v35 = vld [vmem:[#allocation14 + $0x18] sm:$0xff]  }
 0x579   : > { %2102 = vmatprep.subr.bf16.mxu1 %v2685_v0  ;;  %2083 = vmatpush3.bf16.msra.mxu0 %v2307_v36 }
 0x57a   : > { %2084 = vmatprep.subr.bf16.mxu0 %v2685_v0 }
 0x57c   : > { %2103 = vmatpush3.bf16.msra.mxu1 %v2307_v36  ;;  %v2314_v36 = vld [vmem:[#allocation14 + $0x10] sm:$0xff]  }
 0x57d   : > { %2104 = vmatprep.subr.bf16.mxu1 %v2685_v0  ;;  %2085 = vmatpush3.bf16.msra.mxu0 %v2308_v37 }
 0x57e   : > { %2110 = vmatprep.subr.bf16.mxu0 %v2685_v0 }
 0x580   : > { %2105 = vmatpush3.bf16.msra.mxu1 %v2308_v37  ;;  %v2315_v37 = vld [vmem:[#allocation14 + $0x8] sm:$0xff]  }
 0x581   : > { %2130 = vmatprep.subr.bf16.mxu1 %v2685_v0 }
 0x61f   : > { %v1136_v18 = vpop.f32.mrf.mxu0 }
 0x620   : > { %v3109_v19 = vadd.f32 %v1136_v18, %v1053_v17  ;;  %v3145_v18 = vld [vmem:[#allocation13 + $0x10] sm:$0xff] }
 0x621   : > { %v2048_v20 = vpop.f32.mrf.mxu0 }
 0x622   : > { %1142 = vadd.xlane.f32.xlu0 %v3109_v19  ;;  %v1144_v24 = vmul.f32 %v3109_v19, %v3109_v19 }
 0x623   : > { %v1139_v21 = vpop.f32.mrf.mxu0  ;;  %v1208_v22 = vpop.f32.mrf.mxu1 }
 0x624   : > { %v3112_v23 = vadd.f32 %v1208_v22, %v1053_v17 }
 0x625   : > { %v2049_v25 = vpop.f32.mrf.mxu0  ;;  %v2068_v26 = vpop.f32.mrf.mxu1 }
 0x626   : > { %1214 = vadd.xlane.f32.xlu1 %v3112_v23  ;;  %1145 = vadd.xlane.f32.xlu0 %v1144_v24  ;;  %v1216_v28 = vmul.f32 %v3112_v23, %v3112_v23 }
 0x627   : > { %v1211_v27 = vpop.f32.mrf.mxu1 }
 0x629   : > { %v2069_v29 = vpop.f32.mrf.mxu1 }
 0x62a   : > { %1217 = vadd.xlane.f32.xlu1 %v1216_v28 }
 0x6ab   : > { %v1143_v38 = vpop.xlane.xlu0 %1142 }
 0x6ac   : > { %v1147_v39 = vmul.f32 0.015625, %v1143_v38  ;;  %v2316_v38 = vld [vmem:[#allocation14] sm:$0xff]  }
 0x6ae   : > { %v1149_v42 = vmul.f32 %v1147_v39, %v1147_v39  ;;  %v1154_v57 = vsub.f32 %v3109_v19, %v1147_v39  ;;  %v1260_v19 = vrot.slane %v3145_v18, %v2977_v9 }
 0x6af   : > { %v1215_v40 = vpop.xlane.xlu1 %1214  ;;  %v1146_v41 = vpop.xlane.xlu0 %1145 }
 0x6b0   : > { %v1219_v43 = vmul.f32 0.015625, %v1215_v40  ;;  %v1148_v44 = vmul.f32 0.015625, %v1146_v41 }
 0x6b2   : > { %v1150_v45 = vsub.f32 %v1148_v44, %v1149_v42  ;;  %v1221_v47 = vmul.f32 %v1219_v43, %v1219_v43  ;;  %v1226_v61 = vsub.f32 %v3112_v23, %v1219_v43 }
 0x6b3   : > { %v1218_v46 = vpop.xlane.xlu1 %1217 }
 0x6b4   : > { %v1151_v50 = vmax.f32 %v1150_v45, 0.0  ;;  %v1220_v51 = vmul.f32 0.015625, %v1218_v46 }
 0x6b6   : > { %v1152_v52 = vadd.f32 1e-05, %v1151_v50  ;;  %v1222_v53 = vsub.f32 %v1220_v51, %v1221_v47 }
 0x6b8   : > { %2353 = vrsqrt.f32 %v1152_v52  ;;  %v1223_v54 = vmax.f32 %v1222_v53, 0.0 }
 0x6ba   : > { %v1224_v55 = vadd.f32 1e-05, %v1223_v54 }
 0x6bc   : > { %2355 = vrsqrt.f32 %v1224_v55 }
 0x6c5   : > { %v2354_v58 = vpop.eup %2353 }
 0x6c6   : > { %v1155_v60 = vmul.f32 %v2354_v58, %v1154_v57 }
 0x6c8   : > { %v1160_v62 = vmul.f32 %v1159_v56, %v1155_v60 }
 0x6c9   : > { %v2356_v63 = vpop.eup %2355 }
 0x6ca   : > { %v1165_v1 = vadd.f32 %v1164_v59, %v1160_v62  ;;  %v1227_v2 = vmul.f32 %v2356_v63, %v1226_v61 }
 0x6cc   : > { %v1810_v3 = vmul.f32 -1.442695, %v1165_v1  ;;  %v1228_v4 = vmul.f32 %v1227_v2, %v1159_v56 }
 0x6ce   : > { %2357 = vpow2.f32 %v1810_v3  ;;  %v1229_v5 = vadd.f32 %v1228_v4, %v1164_v59  ;;  %v1371_v59 = vrot.slane %v3145_v18, %v3013_v49 }
 0x6d0   : > { %v1811_v6 = vmul.f32 -1.442695, %v1229_v5 }
 0x6d2   : > { %2359 = vpow2.f32 %v1811_v6 }
 0x6db   : > { %v2358_v7 = vpop.eup %2357 }
 0x6dc   : > { %v1169_v8 = vadd.f32 1.0, %v2358_v7 }
 0x6de   : > { %2361 = vrcp.f32 %v1169_v8 }
 0x6df   : > { %v2360_v10 = vpop.eup %2359 }
 0x6e0   : > { %v1233_v11 = vadd.f32 1.0, %v2360_v10 }
 0x6e2   : > { %2363 = vrcp.f32 %v1233_v11 }
 0x6eb   : > { %v2362_v12 = vpop.eup %2361 }
 0x6ec   : > { %v1172_v13 = vmul.f32 %v2362_v12, %v1165_v1 }
 0x6ee   : > { %v1256_v14 = vpack.c.bf16 %v1172_v13, %v1172_v13 }
 0x6ef   : > { %v2364_v15 = vpop.eup %2363 }
 0x6f0   : > { %2087 = vmatmul.mubr.bf16.vlgmr.msra.gmra.mxu0 %v1256_v14  ;;  %v1236_v16 = vmul.f32 %v2364_v15, %v1229_v5 }
 0x6f1   : > { %2126 = vmatprep.mubr.msk.bf16.mxu0 %vm2686_vm0, %v2685_v0  ;;  %2111 = vmatpush3.bf16.msra.mxu0 %v2309_v31 }
 0x6f2   : > { %v1380_v17 = vpack.c.bf16 %v1236_v16, %v1236_v16  ;;  %2112 = vmatprep.subr.bf16.mxu0 %v2685_v0  ;;  %v1822_v16 = vld [vmem:[%s3241_s8] ss:$0 sm:$0xff] }
 0x6f4   : > { %2107 = vmatmul.mubr.bf16.vlgmr.msra.gmra.mxu1 %v1380_v17 }
 0x6f5   : > { %2146 = vmatprep.mubr.msk.bf16.mxu1 %vm2686_vm0, %v2685_v0  ;;  %2131 = vmatpush3.bf16.msra.mxu1 %v2309_v31 }
 0x6f6   : > { %2132 = vmatprep.subr.bf16.mxu1 %v2685_v0  ;;  %2113 = vmatpush3.bf16.msra.mxu0 %v2310_v32 }
 0x6f7   : > { %2114 = vmatprep.subr.bf16.mxu0 %v2685_v0 }
 0x6f9   : > { %2133 = vmatpush3.bf16.msra.mxu1 %v2310_v32 }
 0x6fa   : > { %2134 = vmatprep.subr.bf16.mxu1 %v2685_v0  ;;  %2115 = vmatpush3.bf16.msra.mxu0 %v2311_v33 }
 0x6fb   : > { %2116 = vmatprep.subr.bf16.mxu0 %v2685_v0 }
 0x6fd   : > { %2135 = vmatpush3.bf16.msra.mxu1 %v2311_v33 }
 0x6fe   : > { %2136 = vmatprep.subr.bf16.mxu1 %v2685_v0  ;;  %2117 = vmatpush3.bf16.msra.mxu0 %v2312_v34 }
 0x6ff   : > { %2118 = vmatprep.subr.bf16.mxu0 %v2685_v0 }
 0x701   : > { %2137 = vmatpush3.bf16.msra.mxu1 %v2312_v34 }
 0x702   : > { %2138 = vmatprep.subr.bf16.mxu1 %v2685_v0  ;;  %2119 = vmatpush3.bf16.msra.mxu0 %v2313_v35 }
 0x703   : > { %2120 = vmatprep.subr.bf16.mxu0 %v2685_v0 }
 0x705   : > { %2139 = vmatpush3.bf16.msra.mxu1 %v2313_v35 }
 0x706   : > { %2140 = vmatprep.subr.bf16.mxu1 %v2685_v0  ;;  %2121 = vmatpush3.bf16.msra.mxu0 %v2314_v36 }
 0x707   : > { %2122 = vmatprep.subr.bf16.mxu0 %v2685_v0 }
 0x709   : > { %2141 = vmatpush3.bf16.msra.mxu1 %v2314_v36 }
 0x70a   : > { %2142 = vmatprep.subr.bf16.mxu1 %v2685_v0  ;;  %2123 = vmatpush3.bf16.msra.mxu0 %v2315_v37 }
 0x70b   : > { %2124 = vmatprep.subr.bf16.mxu0 %v2685_v0 }
 0x70d   : > { %2143 = vmatpush3.bf16.msra.mxu1 %v2315_v37 }
 0x70e   : > { %2144 = vmatprep.subr.bf16.mxu1 %v2685_v0  ;;  %2125 = vmatpush3.bf16.msra.mxu0 %v2316_v38  ;;  %v1366_v0 = vrot.slane %v3145_v18, %v3010_v48 }
 0x711   : > { %2145 = vmatpush3.bf16.msra.mxu1 %v2316_v38 }
 0x7b0   : > { %v1343_v20 = vpop.f32.mrf.mxu0 }
 0x7b1   : > { %v3149_v21 = vadd.f32 %v1343_v20, %v1260_v19 }
 0x7b2   : > { %v2088_v22 = vpop.f32.mrf.mxu0 }
 0x7b3   : > { %1349 = vadd.xlane.f32.xlu0 %v3149_v21  ;;  %v1351_v26 = vmul.f32 %v3149_v21, %v3149_v21 }
 0x7b4   : > { %v1346_v23 = vpop.f32.mrf.mxu0  ;;  %v1415_v24 = vpop.f32.mrf.mxu1 }
 0x7b5   : > { %v3152_v25 = vadd.f32 %v1415_v24, %v1260_v19 }
 0x7b6   : > { %v2089_v27 = vpop.f32.mrf.mxu0  ;;  %v2108_v28 = vpop.f32.mrf.mxu1 }
 0x7b7   : > { %1421 = vadd.xlane.f32.xlu1 %v3152_v25  ;;  %1352 = vadd.xlane.f32.xlu0 %v1351_v26  ;;  %v1423_v9 = vmul.f32 %v3152_v25, %v3152_v25 }
 0x7b8   : > { %v1418_v29 = vpop.f32.mrf.mxu1 }
 0x7ba   : > { %v2109_v30 = vpop.f32.mrf.mxu1 }
 0x7bb   : > { %1424 = vadd.xlane.f32.xlu1 %v1423_v9 }
 0x83c   : > { %v1350_v39 = vpop.xlane.xlu0 %1349 }
 0x83d   : > { %v1354_v40 = vmul.f32 0.015625, %v1350_v39 }
 0x83f   : > { %v1356_v43 = vmul.f32 %v1354_v40, %v1354_v40  ;;  %v1361_v57 = vsub.f32 %v3149_v21, %v1354_v40 }
 0x840   : > { %v1422_v41 = vpop.xlane.xlu1 %1421  ;;  %v1353_v42 = vpop.xlane.xlu0 %1352 }
 0x841   : > { %v1426_v44 = vmul.f32 0.015625, %v1422_v41  ;;  %v1355_v45 = vmul.f32 0.015625, %v1353_v42 }
 0x843   : > { %v1357_v46 = vsub.f32 %v1355_v45, %v1356_v43  ;;  %v1428_v50 = vmul.f32 %v1426_v44, %v1426_v44  ;;  %v1433_v61 = vsub.f32 %v3152_v25, %v1426_v44 }
 0x844   : > { %v1425_v47 = vpop.xlane.xlu1 %1424 }
 0x845   : > { %v1358_v51 = vmax.f32 %v1357_v46, 0.0  ;;  %v1427_v52 = vmul.f32 0.015625, %v1425_v47 }
 0x847   : > { %v1359_v53 = vadd.f32 1e-05, %v1358_v51  ;;  %v1429_v54 = vsub.f32 %v1427_v52, %v1428_v50 }
 0x849   : > { %2365 = vrsqrt.f32 %v1359_v53  ;;  %v1430_v55 = vmax.f32 %v1429_v54, 0.0 }
 0x84b   : > { %v1431_v56 = vadd.f32 1e-05, %v1430_v55 }
 0x84d   : > { %2367 = vrsqrt.f32 %v1431_v56 }
 0x856   : > { %v2366_v58 = vpop.eup %2365 }
 0x857   : > { %v1362_v60 = vmul.f32 %v2366_v58, %v1361_v57 }
 0x859   : > { %v1367_v62 = vmul.f32 %v1366_v0, %v1362_v60 }
 0x85a   : > { %v2368_v63 = vpop.eup %2367 }
 0x85b   : > { %v1372_v1 = vadd.f32 %v1371_v59, %v1367_v62  ;;  %v1434_v2 = vmul.f32 %v2368_v63, %v1433_v61 }
 0x85d   : > { %v1820_v3 = vmul.f32 -1.442695, %v1372_v1  ;;  %v1435_v4 = vmul.f32 %v1434_v2, %v1366_v0 }
 0x85f   : > { %2369 = vpow2.f32 %v1820_v3  ;;  %v1436_v5 = vadd.f32 %v1435_v4, %v1371_v59 }
 0x861   : > { %v1821_v6 = vmul.f32 -1.442695, %v1436_v5 }
 0x863   : > { %2371 = vpow2.f32 %v1821_v6 }
 0x86c   : > { %v2370_v48 = vpop.eup %2369 }
 0x86d   : > { %v1376_v7 = vadd.f32 1.0, %v2370_v48 }
 0x86f   : > { %2373 = vrcp.f32 %v1376_v7 }
 0x870   : > { %v2372_v8 = vpop.eup %2371 }
 0x871   : > { %v1440_v10 = vadd.f32 1.0, %v2372_v8 }
 0x873   : > { %2375 = vrcp.f32 %v1440_v10 }
 0x87c   : > { %v2374_v49 = vpop.eup %2373 }
 0x87d   : > { %v1379_v11 = vmul.f32 %v2374_v49, %v1372_v1 }
 0x87f   : > { %v1461_v12 = vpack.c.bf16 %v1379_v11, %v1379_v11 }
 0x880   : > { %v2376_v13 = vpop.eup %2375 }
 0x881   : > { %2127 = vmatmul.mubr.bf16.vlgmr.msra.gmra.mxu0 %v1461_v12  ;;  %v1443_v14 = vmul.f32 %v2376_v13, %v1436_v5 }
 0x883   : > { %v1556_v15 = vpack.c.bf16 %v1443_v14, %v1443_v14 }
 0x885   : > { %2147 = vmatmul.mubr.bf16.vlgmr.msra.gmra.mxu1 %v1556_v15 }
 0x941   : > { %v1548_v17 = vpop.f32.mrf.mxu0 }
 0x942   : > { %v1549_v18 = vadd.f32 %v1822_v16, %v1548_v17 }
 0x943   : > { %v2128_v19 = vpop.f32.mrf.mxu0 }
 0x944   : > { %2377 = vtanh.f32 %v1549_v18 }
 0x945   : > { %v1551_v20 = vpop.f32.mrf.mxu0  ;;  %v1591_v21 = vpop.f32.mrf.mxu1 }
 0x946   : > { %v1592_v22 = vadd.f32 %v1822_v16, %v1591_v21 }
 0x947   : > { %v2129_v23 = vpop.f32.mrf.mxu0  ;;  %v2148_v24 = vpop.f32.mrf.mxu1 }
 0x948   : > { %2379 = vtanh.f32 %v1592_v22 }
 0x949   : > { %v1594_v25 = vpop.f32.mrf.mxu1 }
 0x94b   : > { %v2149_v26 = vpop.f32.mrf.mxu1 }
 0x951   : > { %v2378_v27 = vpop.eup %2377 }
 0x952   : > { %1555 = vst [vmem:[%s448_s29] sm:$0xff] %v2378_v27 }
 0x955   : > { %v2380_v28 = vpop.eup %2379 }
 0x956   : > { %1598 = vst [vmem:[%s448_s29 + $0x8] sm:$0xff] %v2380_v28 }
 0x957   : > { %2604 = shalt.err (!%p2601_p12)
}
 0x958   : > { %s2605_s21 = scalar_lea.hbm %s3188_s25, 256  ;;  %s2609_s26 = scalar_lea.hbm %s3242_s9, 512 }
 0x959   : > { %p2606_p13 = scmp.ne.s32.totalorder %s3188_s25, %s2605_s21  ;;  %p2610_p9 = scmp.lt.s32.totalorder %s3188_s25, %s3242_s9 }
 0x95a   : > { %p2611_p1 = scmp.lt.s32.totalorder %s2609_s26, %s2605_s21 }
 0x95b   : > { %p2607_p5 = pnand %p2606_p13, %p3275_p11 }
 0x95c   : > { %p2612_p3 = por %p2611_p1, %p2610_p9 }
 0x95d   : > { %p2608_p8 = pneg %p2607_p5 }
 0x95f   : > { %p2613_p10 = pnand %p2612_p3, %p2608_p8 }
 0x961   : > { %2616 = shalt.err (!%p2613_p10)
}
 0x962   : > { %s2688_s20 = smov 128   ;;  %s2689_s23 = smov 8  }
 0x963   : > { %2180 = dma.vmem_to_hbm [thread:$0]  (%p3275_p11), %s3190_s18, 256, %s3188_s25, %s1600_s14, %s2688_s20, %s2688_s20, %s2689_s23  }
 0x964 PF: > { %s1628_s1 = sand.u32 1, %s2659_s30   ;;  %p3276_p0 = scmp.ne.s32.totalorder %s3261_s13, 0 }
 0x965   : > { %p3277_p2 = scmp.ge.s32.totalorder %s2671_s12, 2  ;;  %s1629_s15 = scalar_lea.sflag [#allocation4], %s1628_s1 }
 0x967   : > { %p2209_p7 = pnand %p3277_p2, %p3276_p0 }
 0x969   : > { %p2210_p4 = pneg %p2209_p7 }
 0x96b   : > { %2654 = dma.done.wait (%p2210_p4), %s1629_s15, 256  }
 0x96c   : > { %2656 = vsyncadd (%p2210_p4), %s1629_s15, 4294967040  ;;  %p26_p6 = scmp.ge.s32.totalorder %s2865_s22, 4   ;;  %s3278_s30 = smov %s2663_s10 }
 0x96d   : > { %s3279_s10 = smov %s2667_s11  ;;  %s3280_s11 = smov %s2877_s27 }
 0x96e   : > { %s3281_s12 = smov %s2865_s22  ;;  %28 = sbr.rel (!%p26_p6) target bundleno = 13 (0xd), region = 133 }
 0x973   :  { %1634 = vsyncpa [#allocation3], 1 }
 0x974   :  { %1636 = vsyncpa [#allocation3 + $0x1], 1 }
 0x975   :  { %1637 = vsyncpa [#allocation6], 1 }
 0x976   :  { %1638 = vsyncpa [#allocation9], 1 }
 0x977   :  { %1639 = vsyncpa [#allocation12], 1 }
 0x978   :  { %1640 = vsyncpa [#allocation15], 1 }
 0x979   :  { %1641 = vsyncpa [#allocation4], 1 }
 0x97a   :  { %1643 = vsyncpa [#allocation4 + $0x1], 1 }

</bundles_post_ra>
